<compile_context>
chip_gen: v7x
topology: tpu7x:2x2x1
jax: 0.10.0
libtpu: 0.0.40
codegen_flags: <defaults>
</compile_context>

<pallas_src>
import jax
import jax.numpy as jnp
from jax import lax
from jax.experimental import pallas as pl
from jax.experimental.pallas import tpu as pltpu


def make_temporalnet_kernel(n_layers, seq_len, hidden_dim):
    H = hidden_dim
    P = 10  # per-layer params: w_ir,w_iz,w_in, w_hr,w_hz,w_hn, b_r,b_z,b_in,b_hn

    def kernel(*refs):
        x_ref = refs[0]
        layer_refs = [refs[1 + P * l: 1 + P * (l + 1)] for l in range(n_layers)]
        w_out_ref = refs[1 + P * n_layers]
        b_out_ref = refs[2 + P * n_layers]
        out_ref = refs[3 + P * n_layers]

        # Materialize all (tiny) weights once; they stay resident for the kernel.
        W = [tuple(r[...] for r in layer_refs[l]) for l in range(n_layers)]

        x = x_ref[...]                                    # (seq_len, D_in)

        # --- Layer 0: batched-over-time input projections (off the serial chain) ---
        w_ir0, w_iz0, w_in0, _, _, _, b_r0, b_z0, b_in0, _ = W[0]
        gi0_r = jnp.dot(x, w_ir0, preferred_element_type=jnp.float32) + b_r0
        gi0_z = jnp.dot(x, w_iz0, preferred_element_type=jnp.float32) + b_z0
        gi0_n = jnp.dot(x, w_in0, preferred_element_type=jnp.float32) + b_in0

        def gru_step(l, h_prev, gi_r, gi_z, gi_n):
            _, _, _, w_hr, w_hz, w_hn, _, _, _, b_hn = W[l]
            gh_r = jnp.dot(h_prev, w_hr, preferred_element_type=jnp.float32)
            gh_z = jnp.dot(h_prev, w_hz, preferred_element_type=jnp.float32)
            gh_n = jnp.dot(h_prev, w_hn, preferred_element_type=jnp.float32)
            r = jax.nn.sigmoid(gi_r + gh_r)
            z = jax.nn.sigmoid(gi_z + gh_z)
            n = jnp.tanh(gi_n + r * (gh_n + b_hn))
            return n + z * (h_prev - n)        # == (1 - z) * n + z * h_prev

        # --- Wavefront recurrence: clock s runs layer l's timestep t = s - l ---
        h = [jnp.zeros((1, H), jnp.float32) for _ in range(n_layers)]
        for s in range(seq_len + n_layers - 1):
            # Reversed layer order: layer l reads h[l-1] (its timestep-t input,
            # produced at clock s-1) before layer l-1 overwrites it this clock.
            for l in reversed(range(n_layers)):
                t = s - l
                if t < 0 or t >= seq_len:
                    continue
                if l == 0:
                    gi_r = gi0_r[t:t + 1, :]
                    gi_z = gi0_z[t:t + 1, :]
                    gi_n = gi0_n[t:t + 1, :]
                else:
                    inp = h[l - 1]             # prev layer's output at timestep t
                    w_ir, w_iz, w_in, _, _, _, b_r, b_z, b_in, _ = W[l]
                    gi_r = jnp.dot(inp, w_ir, preferred_element_type=jnp.float32) + b_r
                    gi_z = jnp.dot(inp, w_iz, preferred_element_type=jnp.float32) + b_z
                    gi_n = jnp.dot(inp, w_in, preferred_element_type=jnp.float32) + b_in
                h[l] = gru_step(l, h[l], gi_r, gi_z, gi_n)

        # --- Head: Softmax(Linear(h_last)) over the only dim ---
        logits = jnp.dot(h[-1], w_out_ref[...],
                         preferred_element_type=jnp.float32) + b_out_ref[...]
        m = jnp.max(logits, axis=-1, keepdims=True)
        e = jnp.exp(logits - m)
        out_ref[...] = e / jnp.sum(e, axis=-1, keepdims=True)

    return kernel


def temporal_net_forward(x, kernel_params, *, n_layers, hidden_dim, output_dim):
    seq_len = x.shape[0]
    vmem = pl.BlockSpec(memory_space=pltpu.MemorySpace.VMEM)
    inputs = (x,) + tuple(kernel_params)
    out = pl.pallas_call(
        make_temporalnet_kernel(n_layers, seq_len, hidden_dim),
        out_shape=jax.ShapeDtypeStruct((1, output_dim), jnp.float32),
        in_specs=[vmem] * len(inputs),
        out_specs=vmem,
    )(*inputs)
    return out.reshape((output_dim,))


# -------------------- Parameters (PyTorch-style) + packing --------------------

def init_params(key, input_dim, hidden_dim, n_layers, output_dim):
    """PyTorch-shaped params: per layer (w_ih (3H,Din), w_hh (3H,H), b_ih, b_hh),
    plus (w_out (O,H), b_out (O,)).  U(-1/sqrt(H), 1/sqrt(H)) init."""
    H = hidden_dim
    bound = 1.0 / (H ** 0.5)
    keys = jax.random.split(key, 4 * n_layers + 2)
    layers, ki = [], 0
    for l in range(n_layers):
        d_in = input_dim if l == 0 else H
        w_ih = jax.random.uniform(keys[ki + 0], (3 * H, d_in), jnp.float32, -bound, bound)
        w_hh = jax.random.uniform(keys[ki + 1], (3 * H, H), jnp.float32, -bound, bound)
        b_ih = jax.random.uniform(keys[ki + 2], (3 * H,), jnp.float32, -bound, bound)
        b_hh = jax.random.uniform(keys[ki + 3], (3 * H,), jnp.float32, -bound, bound)
        layers.append((w_ih, w_hh, b_ih, b_hh))
        ki += 4
    w_out = jax.random.uniform(keys[ki + 0], (output_dim, H), jnp.float32, -bound, bound)
    b_out = jax.random.uniform(keys[ki + 1], (output_dim,), jnp.float32, -bound, bound)
    return {"layers": layers, "out": (w_out, b_out)}


def pack_params_for_kernel(torch_params, hidden_dim):
    """Pre-transpose, split per gate (r,z,n) and fold b_ih+b_hh for r/z gates."""
    H = hidden_dim
    packed = []
    for (w_ih, w_hh, b_ih, b_hh) in torch_params["layers"]:
        w_ih_t = w_ih.T        # (D_in, 3H), gate columns [r | z | n]
        w_hh_t = w_hh.T        # (H,    3H)
        w_ir, w_iz, w_in = w_ih_t[:, :H], w_ih_t[:, H:2 * H], w_ih_t[:, 2 * H:]
        w_hr, w_hz, w_hn = w_hh_t[:, :H], w_hh_t[:, H:2 * H], w_hh_t[:, 2 * H:]
        b_r = (b_ih[:H] + b_hh[:H]).reshape(1, H)
        b_z = (b_ih[H:2 * H] + b_hh[H:2 * H]).reshape(1, H)
        b_in = b_ih[2 * H:].reshape(1, H)
        b_hn = b_hh[2 * H:].reshape(1, H)
        packed += [w_ir, w_iz, w_in, w_hr, w_hz, w_hn, b_r, b_z, b_in, b_hn]
    w_out, b_out = torch_params["out"]
    packed += [w_out.T, b_out.reshape(1, -1)]
    return packed


# -------------------- Pure-JAX reference (PyTorch GRU semantics) --------------------

def reference_forward(x, torch_params, *, n_layers, hidden_dim):
    H = hidden_dim
    hi = lax.Precision.HIGHEST
    seq = x
    for l in range(n_layers):
        w_ih, w_hh, b_ih, b_hh = torch_params["layers"][l]
        h = jnp.zeros((H,), jnp.float32)
        outs = []
        for t in range(seq.shape[0]):
            gi = jnp.dot(w_ih, seq[t], precision=hi) + b_ih
            gh = jnp.dot(w_hh, h, precision=hi) + b_hh
            r = jax.nn.sigmoid(gi[:H] + gh[:H])
            z = jax.nn.sigmoid(gi[H:2 * H] + gh[H:2 * H])
            n = jnp.tanh(gi[2 * H:] + r * gh[2 * H:])
            h = (1.0 - z) * n + z * h
            outs.append(h)
        seq = jnp.stack(outs)
    w_out, b_out = torch_params["out"]
    logits = jnp.dot(w_out, seq[-1], precision=hi) + b_out
    return jax.nn.softmax(logits, axis=0)


if __name__ == "__main__":
    seq_len, input_dim, hidden_dim, n_layers, output_dim = 8, 16, 32, 2, 8

    key = jax.random.PRNGKey(0)
    kx, kp = jax.random.split(key)
    x = jax.random.normal(kx, (seq_len, input_dim), jnp.float32)
    tparams = init_params(kp, input_dim, hidden_dim, n_layers, output_dim)
    kparams = pack_params_for_kernel(tparams, hidden_dim)

    out = temporal_net_forward(x, kparams, n_layers=n_layers,
                               hidden_dim=hidden_dim, output_dim=output_dim)
    jax.block_until_ready(out)

    ref = reference_forward(x, tparams, n_layers=n_layers, hidden_dim=hidden_dim)
    assert out.shape == (output_dim,)
    assert jnp.allclose(out, ref, atol=2e-5, rtol=1e-4), (out, ref)
    print("KERNEL_OK")
</pallas_src>

<mosaic_0001>
module attributes {stable_mosaic.version = 11 : i64} {
  func.func @kernel(%arg0: memref<8x16xf32, #tpu.memory_space<vmem>>, %arg1: memref<16x32xf32, #tpu.memory_space<vmem>>, %arg2: memref<16x32xf32, #tpu.memory_space<vmem>>, %arg3: memref<16x32xf32, #tpu.memory_space<vmem>>, %arg4: memref<32x32xf32, #tpu.memory_space<vmem>>, %arg5: memref<32x32xf32, #tpu.memory_space<vmem>>, %arg6: memref<32x32xf32, #tpu.memory_space<vmem>>, %arg7: memref<1x32xf32, #tpu.memory_space<vmem>>, %arg8: memref<1x32xf32, #tpu.memory_space<vmem>>, %arg9: memref<1x32xf32, #tpu.memory_space<vmem>>, %arg10: memref<1x32xf32, #tpu.memory_space<vmem>>, %arg11: memref<32x32xf32, #tpu.memory_space<vmem>>, %arg12: memref<32x32xf32, #tpu.memory_space<vmem>>, %arg13: memref<32x32xf32, #tpu.memory_space<vmem>>, %arg14: memref<32x32xf32, #tpu.memory_space<vmem>>, %arg15: memref<32x32xf32, #tpu.memory_space<vmem>>, %arg16: memref<32x32xf32, #tpu.memory_space<vmem>>, %arg17: memref<1x32xf32, #tpu.memory_space<vmem>>, %arg18: memref<1x32xf32, #tpu.memory_space<vmem>>, %arg19: memref<1x32xf32, #tpu.memory_space<vmem>>, %arg20: memref<1x32xf32, #tpu.memory_space<vmem>>, %arg21: memref<32x8xf32, #tpu.memory_space<vmem>>, %arg22: memref<1x8xf32, #tpu.memory_space<vmem>>, %arg23: memref<1x8xf32, #tpu.memory_space<vmem>>) attributes {dimension_semantics = [], scalar_prefetch = 0 : i64, scratch_operands = 0 : i64, tpu.core_type = #tpu.core_type<tc>} {
    %c0 = arith.constant 0 : index
    %c0_0 = arith.constant 0 : index
    %0 = vector.load %arg1[%c0, %c0_0] : memref<16x32xf32, #tpu.memory_space<vmem>>, vector<16x32xf32>
    %c0_1 = arith.constant 0 : index
    %c0_2 = arith.constant 0 : index
    %1 = vector.load %arg2[%c0_1, %c0_2] : memref<16x32xf32, #tpu.memory_space<vmem>>, vector<16x32xf32>
    %c0_3 = arith.constant 0 : index
    %c0_4 = arith.constant 0 : index
    %2 = vector.load %arg3[%c0_3, %c0_4] : memref<16x32xf32, #tpu.memory_space<vmem>>, vector<16x32xf32>
    %c0_5 = arith.constant 0 : index
    %c0_6 = arith.constant 0 : index
    %3 = vector.load %arg4[%c0_5, %c0_6] : memref<32x32xf32, #tpu.memory_space<vmem>>, vector<32x32xf32>
    %c0_7 = arith.constant 0 : index
    %c0_8 = arith.constant 0 : index
    %4 = vector.load %arg5[%c0_7, %c0_8] : memref<32x32xf32, #tpu.memory_space<vmem>>, vector<32x32xf32>
    %c0_9 = arith.constant 0 : index
    %c0_10 = arith.constant 0 : index
    %5 = vector.load %arg6[%c0_9, %c0_10] : memref<32x32xf32, #tpu.memory_space<vmem>>, vector<32x32xf32>
    %c0_11 = arith.constant 0 : index
    %c0_12 = arith.constant 0 : index
    %6 = vector.load %arg7[%c0_11, %c0_12] : memref<1x32xf32, #tpu.memory_space<vmem>>, vector<1x32xf32>
    %c0_13 = arith.constant 0 : index
    %c0_14 = arith.constant 0 : index
    %7 = vector.load %arg8[%c0_13, %c0_14] : memref<1x32xf32, #tpu.memory_space<vmem>>, vector<1x32xf32>
    %c0_15 = arith.constant 0 : index
    %c0_16 = arith.constant 0 : index
    %8 = vector.load %arg9[%c0_15, %c0_16] : memref<1x32xf32, #tpu.memory_space<vmem>>, vector<1x32xf32>
    %c0_17 = arith.constant 0 : index
    %c0_18 = arith.constant 0 : index
    %9 = vector.load %arg10[%c0_17, %c0_18] : memref<1x32xf32, #tpu.memory_space<vmem>>, vector<1x32xf32>
    %c0_19 = arith.constant 0 : index
    %c0_20 = arith.constant 0 : index
    %10 = vector.load %arg11[%c0_19, %c0_20] : memref<32x32xf32, #tpu.memory_space<vmem>>, vector<32x32xf32>
    %c0_21 = arith.constant 0 : index
    %c0_22 = arith.constant 0 : index
    %11 = vector.load %arg12[%c0_21, %c0_22] : memref<32x32xf32, #tpu.memory_space<vmem>>, vector<32x32xf32>
    %c0_23 = arith.constant 0 : index
    %c0_24 = arith.constant 0 : index
    %12 = vector.load %arg13[%c0_23, %c0_24] : memref<32x32xf32, #tpu.memory_space<vmem>>, vector<32x32xf32>
    %c0_25 = arith.constant 0 : index
    %c0_26 = arith.constant 0 : index
    %13 = vector.load %arg14[%c0_25, %c0_26] : memref<32x32xf32, #tpu.memory_space<vmem>>, vector<32x32xf32>
    %c0_27 = arith.constant 0 : index
    %c0_28 = arith.constant 0 : index
    %14 = vector.load %arg15[%c0_27, %c0_28] : memref<32x32xf32, #tpu.memory_space<vmem>>, vector<32x32xf32>
    %c0_29 = arith.constant 0 : index
    %c0_30 = arith.constant 0 : index
    %15 = vector.load %arg16[%c0_29, %c0_30] : memref<32x32xf32, #tpu.memory_space<vmem>>, vector<32x32xf32>
    %c0_31 = arith.constant 0 : index
    %c0_32 = arith.constant 0 : index
    %16 = vector.load %arg17[%c0_31, %c0_32] : memref<1x32xf32, #tpu.memory_space<vmem>>, vector<1x32xf32>
    %c0_33 = arith.constant 0 : index
    %c0_34 = arith.constant 0 : index
    %17 = vector.load %arg18[%c0_33, %c0_34] : memref<1x32xf32, #tpu.memory_space<vmem>>, vector<1x32xf32>
    %c0_35 = arith.constant 0 : index
    %c0_36 = arith.constant 0 : index
    %18 = vector.load %arg19[%c0_35, %c0_36] : memref<1x32xf32, #tpu.memory_space<vmem>>, vector<1x32xf32>
    %c0_37 = arith.constant 0 : index
    %c0_38 = arith.constant 0 : index
    %19 = vector.load %arg20[%c0_37, %c0_38] : memref<1x32xf32, #tpu.memory_space<vmem>>, vector<1x32xf32>
    %c0_39 = arith.constant 0 : index
    %c0_40 = arith.constant 0 : index
    %20 = vector.load %arg0[%c0_39, %c0_40] : memref<8x16xf32, #tpu.memory_space<vmem>>, vector<8x16xf32>
    %cst = arith.constant dense<0.000000e+00> : vector<8x32xf32>
    %21 = tpu.matmul %20, %0, %cst {dimension_numbers = #tpu.dot_dimension_numbers<[1], [0], [0], [1], [0, 0, 1, 1], [], []>} : vector<8x16xf32>, vector<16x32xf32>, vector<8x32xf32> -> vector<8x32xf32>
    %22 = vector.broadcast %6 : vector<1x32xf32> to vector<8x32xf32>
    %23 = arith.addf %21, %22 : vector<8x32xf32>
    %cst_41 = arith.constant dense<0.000000e+00> : vector<8x32xf32>
    %24 = tpu.matmul %20, %1, %cst_41 {dimension_numbers = #tpu.dot_dimension_numbers<[1], [0], [0], [1], [0, 0, 1, 1], [], []>} : vector<8x16xf32>, vector<16x32xf32>, vector<8x32xf32> -> vector<8x32xf32>
    %25 = vector.broadcast %7 : vector<1x32xf32> to vector<8x32xf32>
    %26 = arith.addf %24, %25 : vector<8x32xf32>
    %cst_42 = arith.constant dense<0.000000e+00> : vector<8x32xf32>
    %27 = tpu.matmul %20, %2, %cst_42 {dimension_numbers = #tpu.dot_dimension_numbers<[1], [0], [0], [1], [0, 0, 1, 1], [], []>} : vector<8x16xf32>, vector<16x32xf32>, vector<8x32xf32> -> vector<8x32xf32>
    %28 = vector.broadcast %8 : vector<1x32xf32> to vector<8x32xf32>
    %29 = arith.addf %27, %28 : vector<8x32xf32>
    %cst_43 = arith.constant 0.000000e+00 : f32
    %30 = vector.broadcast %cst_43 : f32 to vector<1x32xf32>
    %cst_44 = arith.constant 0.000000e+00 : f32
    %31 = vector.broadcast %cst_44 : f32 to vector<1x32xf32>
    %32 = vector.extract_strided_slice %23 {offsets = [0, 0], sizes = [1, 32], strides = [1, 1]} : vector<8x32xf32> to vector<1x32xf32>
    %33 = vector.extract_strided_slice %26 {offsets = [0, 0], sizes = [1, 32], strides = [1, 1]} : vector<8x32xf32> to vector<1x32xf32>
    %34 = vector.extract_strided_slice %29 {offsets = [0, 0], sizes = [1, 32], strides = [1, 1]} : vector<8x32xf32> to vector<1x32xf32>
    %cst_45 = arith.constant dense<0.000000e+00> : vector<1x32xf32>
    %35 = tpu.matmul %30, %3, %cst_45 {dimension_numbers = #tpu.dot_dimension_numbers<[1], [0], [0], [1], [0, 0, 1, 1], [], []>} : vector<1x32xf32>, vector<32x32xf32>, vector<1x32xf32> -> vector<1x32xf32>
    %cst_46 = arith.constant dense<0.000000e+00> : vector<1x32xf32>
    %36 = tpu.matmul %30, %4, %cst_46 {dimension_numbers = #tpu.dot_dimension_numbers<[1], [0], [0], [1], [0, 0, 1, 1], [], []>} : vector<1x32xf32>, vector<32x32xf32>, vector<1x32xf32> -> vector<1x32xf32>
    %cst_47 = arith.constant dense<0.000000e+00> : vector<1x32xf32>
    %37 = tpu.matmul %30, %5, %cst_47 {dimension_numbers = #tpu.dot_dimension_numbers<[1], [0], [0], [1], [0, 0, 1, 1], [], []>} : vector<1x32xf32>, vector<32x32xf32>, vector<1x32xf32> -> vector<1x32xf32>
    %38 = arith.addf %32, %35 : vector<1x32xf32>
    %39 = arith.negf %38 : vector<1x32xf32>
    %40 = math.exp %39 : vector<1x32xf32>
    %cst_48 = arith.constant 1.000000e+00 : f32
    %41 = vector.broadcast %cst_48 : f32 to vector<1x32xf32>
    %42 = arith.addf %41, %40 : vector<1x32xf32>
    %43 = arith.divf %41, %42 : vector<1x32xf32>
    %44 = arith.addf %33, %36 : vector<1x32xf32>
    %45 = arith.negf %44 : vector<1x32xf32>
    %46 = math.exp %45 : vector<1x32xf32>
    %cst_49 = arith.constant 1.000000e+00 : f32
    %47 = vector.broadcast %cst_49 : f32 to vector<1x32xf32>
    %48 = arith.addf %47, %46 : vector<1x32xf32>
    %49 = arith.divf %47, %48 : vector<1x32xf32>
    %50 = arith.addf %37, %9 : vector<1x32xf32>
    %51 = arith.mulf %43, %50 : vector<1x32xf32>
    %52 = arith.addf %34, %51 : vector<1x32xf32>
    %53 = math.tanh %52 : vector<1x32xf32>
    %54 = arith.subf %30, %53 : vector<1x32xf32>
    %55 = arith.mulf %49, %54 : vector<1x32xf32>
    %56 = arith.addf %53, %55 : vector<1x32xf32>
    %cst_50 = arith.constant dense<0.000000e+00> : vector<1x32xf32>
    %57 = tpu.matmul %56, %10, %cst_50 {dimension_numbers = #tpu.dot_dimension_numbers<[1], [0], [0], [1], [0, 0, 1, 1], [], []>} : vector<1x32xf32>, vector<32x32xf32>, vector<1x32xf32> -> vector<1x32xf32>
    %58 = arith.addf %57, %16 : vector<1x32xf32>
    %cst_51 = arith.constant dense<0.000000e+00> : vector<1x32xf32>
    %59 = tpu.matmul %56, %11, %cst_51 {dimension_numbers = #tpu.dot_dimension_numbers<[1], [0], [0], [1], [0, 0, 1, 1], [], []>} : vector<1x32xf32>, vector<32x32xf32>, vector<1x32xf32> -> vector<1x32xf32>
    %60 = arith.addf %59, %17 : vector<1x32xf32>
    %cst_52 = arith.constant dense<0.000000e+00> : vector<1x32xf32>
    %61 = tpu.matmul %56, %12, %cst_52 {dimension_numbers = #tpu.dot_dimension_numbers<[1], [0], [0], [1], [0, 0, 1, 1], [], []>} : vector<1x32xf32>, vector<32x32xf32>, vector<1x32xf32> -> vector<1x32xf32>
    %62 = arith.addf %61, %18 : vector<1x32xf32>
    %cst_53 = arith.constant dense<0.000000e+00> : vector<1x32xf32>
    %63 = tpu.matmul %31, %13, %cst_53 {dimension_numbers = #tpu.dot_dimension_numbers<[1], [0], [0], [1], [0, 0, 1, 1], [], []>} : vector<1x32xf32>, vector<32x32xf32>, vector<1x32xf32> -> vector<1x32xf32>
    %cst_54 = arith.constant dense<0.000000e+00> : vector<1x32xf32>
    %64 = tpu.matmul %31, %14, %cst_54 {dimension_numbers = #tpu.dot_dimension_numbers<[1], [0], [0], [1], [0, 0, 1, 1], [], []>} : vector<1x32xf32>, vector<32x32xf32>, vector<1x32xf32> -> vector<1x32xf32>
    %cst_55 = arith.constant dense<0.000000e+00> : vector<1x32xf32>
    %65 = tpu.matmul %31, %15, %cst_55 {dimension_numbers = #tpu.dot_dimension_numbers<[1], [0], [0], [1], [0, 0, 1, 1], [], []>} : vector<1x32xf32>, vector<32x32xf32>, vector<1x32xf32> -> vector<1x32xf32>
    %66 = arith.addf %58, %63 : vector<1x32xf32>
    %67 = arith.negf %66 : vector<1x32xf32>
    %68 = math.exp %67 : vector<1x32xf32>
    %cst_56 = arith.constant 1.000000e+00 : f32
    %69 = vector.broadcast %cst_56 : f32 to vector<1x32xf32>
    %70 = arith.addf %69, %68 : vector<1x32xf32>
    %71 = arith.divf %69, %70 : vector<1x32xf32>
    %72 = arith.addf %60, %64 : vector<1x32xf32>
    %73 = arith.negf %72 : vector<1x32xf32>
    %74 = math.exp %73 : vector<1x32xf32>
    %cst_57 = arith.constant 1.000000e+00 : f32
    %75 = vector.broadcast %cst_57 : f32 to vector<1x32xf32>
    %76 = arith.addf %75, %74 : vector<1x32xf32>
    %77 = arith.divf %75, %76 : vector<1x32xf32>
    %78 = arith.addf %65, %19 : vector<1x32xf32>
    %79 = arith.mulf %71, %78 : vector<1x32xf32>
    %80 = arith.addf %62, %79 : vector<1x32xf32>
    %81 = math.tanh %80 : vector<1x32xf32>
    %82 = arith.subf %31, %81 : vector<1x32xf32>
    %83 = arith.mulf %77, %82 : vector<1x32xf32>
    %84 = arith.addf %81, %83 : vector<1x32xf32>
    %85 = vector.extract_strided_slice %23 {offsets = [1, 0], sizes = [1, 32], strides = [1, 1]} : vector<8x32xf32> to vector<1x32xf32>
    %86 = vector.extract_strided_slice %26 {offsets = [1, 0], sizes = [1, 32], strides = [1, 1]} : vector<8x32xf32> to vector<1x32xf32>
    %87 = vector.extract_strided_slice %29 {offsets = [1, 0], sizes = [1, 32], strides = [1, 1]} : vector<8x32xf32> to vector<1x32xf32>
    %cst_58 = arith.constant dense<0.000000e+00> : vector<1x32xf32>
    %88 = tpu.matmul %56, %3, %cst_58 {dimension_numbers = #tpu.dot_dimension_numbers<[1], [0], [0], [1], [0, 0, 1, 1], [], []>} : vector<1x32xf32>, vector<32x32xf32>, vector<1x32xf32> -> vector<1x32xf32>
    %cst_59 = arith.constant dense<0.000000e+00> : vector<1x32xf32>
    %89 = tpu.matmul %56, %4, %cst_59 {dimension_numbers = #tpu.dot_dimension_numbers<[1], [0], [0], [1], [0, 0, 1, 1], [], []>} : vector<1x32xf32>, vector<32x32xf32>, vector<1x32xf32> -> vector<1x32xf32>
    %cst_60 = arith.constant dense<0.000000e+00> : vector<1x32xf32>
    %90 = tpu.matmul %56, %5, %cst_60 {dimension_numbers = #tpu.dot_dimension_numbers<[1], [0], [0], [1], [0, 0, 1, 1], [], []>} : vector<1x32xf32>, vector<32x32xf32>, vector<1x32xf32> -> vector<1x32xf32>
    %91 = arith.addf %85, %88 : vector<1x32xf32>
    %92 = arith.negf %91 : vector<1x32xf32>
    %93 = math.exp %92 : vector<1x32xf32>
    %cst_61 = arith.constant 1.000000e+00 : f32
    %94 = vector.broadcast %cst_61 : f32 to vector<1x32xf32>
    %95 = arith.addf %94, %93 : vector<1x32xf32>
    %96 = arith.divf %94, %95 : vector<1x32xf32>
    %97 = arith.addf %86, %89 : vector<1x32xf32>
    %98 = arith.negf %97 : vector<1x32xf32>
    %99 = math.exp %98 : vector<1x32xf32>
    %cst_62 = arith.constant 1.000000e+00 : f32
    %100 = vector.broadcast %cst_62 : f32 to vector<1x32xf32>
    %101 = arith.addf %100, %99 : vector<1x32xf32>
    %102 = arith.divf %100, %101 : vector<1x32xf32>
    %103 = arith.addf %90, %9 : vector<1x32xf32>
    %104 = arith.mulf %96, %103 : vector<1x32xf32>
    %105 = arith.addf %87, %104 : vector<1x32xf32>
    %106 = math.tanh %105 : vector<1x32xf32>
    %107 = arith.subf %56, %106 : vector<1x32xf32>
    %108 = arith.mulf %102, %107 : vector<1x32xf32>
    %109 = arith.addf %106, %108 : vector<1x32xf32>
    %cst_63 = arith.constant dense<0.000000e+00> : vector<1x32xf32>
    %110 = tpu.matmul %109, %10, %cst_63 {dimension_numbers = #tpu.dot_dimension_numbers<[1], [0], [0], [1], [0, 0, 1, 1], [], []>} : vector<1x32xf32>, vector<32x32xf32>, vector<1x32xf32> -> vector<1x32xf32>
    %111 = arith.addf %110, %16 : vector<1x32xf32>
    %cst_64 = arith.constant dense<0.000000e+00> : vector<1x32xf32>
    %112 = tpu.matmul %109, %11, %cst_64 {dimension_numbers = #tpu.dot_dimension_numbers<[1], [0], [0], [1], [0, 0, 1, 1], [], []>} : vector<1x32xf32>, vector<32x32xf32>, vector<1x32xf32> -> vector<1x32xf32>
    %113 = arith.addf %112, %17 : vector<1x32xf32>
    %cst_65 = arith.constant dense<0.000000e+00> : vector<1x32xf32>
    %114 = tpu.matmul %109, %12, %cst_65 {dimension_numbers = #tpu.dot_dimension_numbers<[1], [0], [0], [1], [0, 0, 1, 1], [], []>} : vector<1x32xf32>, vector<32x32xf32>, vector<1x32xf32> -> vector<1x32xf32>
    %115 = arith.addf %114, %18 : vector<1x32xf32>
    %cst_66 = arith.constant dense<0.000000e+00> : vector<1x32xf32>
    %116 = tpu.matmul %84, %13, %cst_66 {dimension_numbers = #tpu.dot_dimension_numbers<[1], [0], [0], [1], [0, 0, 1, 1], [], []>} : vector<1x32xf32>, vector<32x32xf32>, vector<1x32xf32> -> vector<1x32xf32>
    %cst_67 = arith.constant dense<0.000000e+00> : vector<1x32xf32>
    %117 = tpu.matmul %84, %14, %cst_67 {dimension_numbers = #tpu.dot_dimension_numbers<[1], [0], [0], [1], [0, 0, 1, 1], [], []>} : vector<1x32xf32>, vector<32x32xf32>, vector<1x32xf32> -> vector<1x32xf32>
    %cst_68 = arith.constant dense<0.000000e+00> : vector<1x32xf32>
    %118 = tpu.matmul %84, %15, %cst_68 {dimension_numbers = #tpu.dot_dimension_numbers<[1], [0], [0], [1], [0, 0, 1, 1], [], []>} : vector<1x32xf32>, vector<32x32xf32>, vector<1x32xf32> -> vector<1x32xf32>
    %119 = arith.addf %111, %116 : vector<1x32xf32>
    %120 = arith.negf %119 : vector<1x32xf32>
    %121 = math.exp %120 : vector<1x32xf32>
    %cst_69 = arith.constant 1.000000e+00 : f32
    %122 = vector.broadcast %cst_69 : f32 to vector<1x32xf32>
    %123 = arith.addf %122, %121 : vector<1x32xf32>
    %124 = arith.divf %122, %123 : vector<1x32xf32>
    %125 = arith.addf %113, %117 : vector<1x32xf32>
    %126 = arith.negf %125 : vector<1x32xf32>
    %127 = math.exp %126 : vector<1x32xf32>
    %cst_70 = arith.constant 1.000000e+00 : f32
    %128 = vector.broadcast %cst_70 : f32 to vector<1x32xf32>
    %129 = arith.addf %128, %127 : vector<1x32xf32>
    %130 = arith.divf %128, %129 : vector<1x32xf32>
    %131 = arith.addf %118, %19 : vector<1x32xf32>
    %132 = arith.mulf %124, %131 : vector<1x32xf32>
    %133 = arith.addf %115, %132 : vector<1x32xf32>
    %134 = math.tanh %133 : vector<1x32xf32>
    %135 = arith.subf %84, %134 : vector<1x32xf32>
    %136 = arith.mulf %130, %135 : vector<1x32xf32>
    %137 = arith.addf %134, %136 : vector<1x32xf32>
    %138 = vector.extract_strided_slice %23 {offsets = [2, 0], sizes = [1, 32], strides = [1, 1]} : vector<8x32xf32> to vector<1x32xf32>
    %139 = vector.extract_strided_slice %26 {offsets = [2, 0], sizes = [1, 32], strides = [1, 1]} : vector<8x32xf32> to vector<1x32xf32>
    %140 = vector.extract_strided_slice %29 {offsets = [2, 0], sizes = [1, 32], strides = [1, 1]} : vector<8x32xf32> to vector<1x32xf32>
    %cst_71 = arith.constant dense<0.000000e+00> : vector<1x32xf32>
    %141 = tpu.matmul %109, %3, %cst_71 {dimension_numbers = #tpu.dot_dimension_numbers<[1], [0], [0], [1], [0, 0, 1, 1], [], []>} : vector<1x32xf32>, vector<32x32xf32>, vector<1x32xf32> -> vector<1x32xf32>
    %cst_72 = arith.constant dense<0.000000e+00> : vector<1x32xf32>
    %142 = tpu.matmul %109, %4, %cst_72 {dimension_numbers = #tpu.dot_dimension_numbers<[1], [0], [0], [1], [0, 0, 1, 1], [], []>} : vector<1x32xf32>, vector<32x32xf32>, vector<1x32xf32> -> vector<1x32xf32>
    %cst_73 = arith.constant dense<0.000000e+00> : vector<1x32xf32>
    %143 = tpu.matmul %109, %5, %cst_73 {dimension_numbers = #tpu.dot_dimension_numbers<[1], [0], [0], [1], [0, 0, 1, 1], [], []>} : vector<1x32xf32>, vector<32x32xf32>, vector<1x32xf32> -> vector<1x32xf32>
    %144 = arith.addf %138, %141 : vector<1x32xf32>
    %145 = arith.negf %144 : vector<1x32xf32>
    %146 = math.exp %145 : vector<1x32xf32>
    %cst_74 = arith.constant 1.000000e+00 : f32
    %147 = vector.broadcast %cst_74 : f32 to vector<1x32xf32>
    %148 = arith.addf %147, %146 : vector<1x32xf32>
    %149 = arith.divf %147, %148 : vector<1x32xf32>
    %150 = arith.addf %139, %142 : vector<1x32xf32>
    %151 = arith.negf %150 : vector<1x32xf32>
    %152 = math.exp %151 : vector<1x32xf32>
    %cst_75 = arith.constant 1.000000e+00 : f32
    %153 = vector.broadcast %cst_75 : f32 to vector<1x32xf32>
    %154 = arith.addf %153, %152 : vector<1x32xf32>
    %155 = arith.divf %153, %154 : vector<1x32xf32>
    %156 = arith.addf %143, %9 : vector<1x32xf32>
    %157 = arith.mulf %149, %156 : vector<1x32xf32>
    %158 = arith.addf %140, %157 : vector<1x32xf32>
    %159 = math.tanh %158 : vector<1x32xf32>
    %160 = arith.subf %109, %159 : vector<1x32xf32>
    %161 = arith.mulf %155, %160 : vector<1x32xf32>
    %162 = arith.addf %159, %161 : vector<1x32xf32>
    %cst_76 = arith.constant dense<0.000000e+00> : vector<1x32xf32>
    %163 = tpu.matmul %162, %10, %cst_76 {dimension_numbers = #tpu.dot_dimension_numbers<[1], [0], [0], [1], [0, 0, 1, 1], [], []>} : vector<1x32xf32>, vector<32x32xf32>, vector<1x32xf32> -> vector<1x32xf32>
    %164 = arith.addf %163, %16 : vector<1x32xf32>
    %cst_77 = arith.constant dense<0.000000e+00> : vector<1x32xf32>
    %165 = tpu.matmul %162, %11, %cst_77 {dimension_numbers = #tpu.dot_dimension_numbers<[1], [0], [0], [1], [0, 0, 1, 1], [], []>} : vector<1x32xf32>, vector<32x32xf32>, vector<1x32xf32> -> vector<1x32xf32>
    %166 = arith.addf %165, %17 : vector<1x32xf32>
    %cst_78 = arith.constant dense<0.000000e+00> : vector<1x32xf32>
    %167 = tpu.matmul %162, %12, %cst_78 {dimension_numbers = #tpu.dot_dimension_numbers<[1], [0], [0], [1], [0, 0, 1, 1], [], []>} : vector<1x32xf32>, vector<32x32xf32>, vector<1x32xf32> -> vector<1x32xf32>
    %168 = arith.addf %167, %18 : vector<1x32xf32>
    %cst_79 = arith.constant dense<0.000000e+00> : vector<1x32xf32>
    %169 = tpu.matmul %137, %13, %cst_79 {dimension_numbers = #tpu.dot_dimension_numbers<[1], [0], [0], [1], [0, 0, 1, 1], [], []>} : vector<1x32xf32>, vector<32x32xf32>, vector<1x32xf32> -> vector<1x32xf32>
    %cst_80 = arith.constant dense<0.000000e+00> : vector<1x32xf32>
    %170 = tpu.matmul %137, %14, %cst_80 {dimension_numbers = #tpu.dot_dimension_numbers<[1], [0], [0], [1], [0, 0, 1, 1], [], []>} : vector<1x32xf32>, vector<32x32xf32>, vector<1x32xf32> -> vector<1x32xf32>
    %cst_81 = arith.constant dense<0.000000e+00> : vector<1x32xf32>
    %171 = tpu.matmul %137, %15, %cst_81 {dimension_numbers = #tpu.dot_dimension_numbers<[1], [0], [0], [1], [0, 0, 1, 1], [], []>} : vector<1x32xf32>, vector<32x32xf32>, vector<1x32xf32> -> vector<1x32xf32>
    %172 = arith.addf %164, %169 : vector<1x32xf32>
    %173 = arith.negf %172 : vector<1x32xf32>
    %174 = math.exp %173 : vector<1x32xf32>
    %cst_82 = arith.constant 1.000000e+00 : f32
    %175 = vector.broadcast %cst_82 : f32 to vector<1x32xf32>
    %176 = arith.addf %175, %174 : vector<1x32xf32>
    %177 = arith.divf %175, %176 : vector<1x32xf32>
    %178 = arith.addf %166, %170 : vector<1x32xf32>
    %179 = arith.negf %178 : vector<1x32xf32>
    %180 = math.exp %179 : vector<1x32xf32>
    %cst_83 = arith.constant 1.000000e+00 : f32
    %181 = vector.broadcast %cst_83 : f32 to vector<1x32xf32>
    %182 = arith.addf %181, %180 : vector<1x32xf32>
    %183 = arith.divf %181, %182 : vector<1x32xf32>
    %184 = arith.addf %171, %19 : vector<1x32xf32>
    %185 = arith.mulf %177, %184 : vector<1x32xf32>
    %186 = arith.addf %168, %185 : vector<1x32xf32>
    %187 = math.tanh %186 : vector<1x32xf32>
    %188 = arith.subf %137, %187 : vector<1x32xf32>
    %189 = arith.mulf %183, %188 : vector<1x32xf32>
    %190 = arith.addf %187, %189 : vector<1x32xf32>
    %191 = vector.extract_strided_slice %23 {offsets = [3, 0], sizes = [1, 32], strides = [1, 1]} : vector<8x32xf32> to vector<1x32xf32>
    %192 = vector.extract_strided_slice %26 {offsets = [3, 0], sizes = [1, 32], strides = [1, 1]} : vector<8x32xf32> to vector<1x32xf32>
    %193 = vector.extract_strided_slice %29 {offsets = [3, 0], sizes = [1, 32], strides = [1, 1]} : vector<8x32xf32> to vector<1x32xf32>
    %cst_84 = arith.constant dense<0.000000e+00> : vector<1x32xf32>
    %194 = tpu.matmul %162, %3, %cst_84 {dimension_numbers = #tpu.dot_dimension_numbers<[1], [0], [0], [1], [0, 0, 1, 1], [], []>} : vector<1x32xf32>, vector<32x32xf32>, vector<1x32xf32> -> vector<1x32xf32>
    %cst_85 = arith.constant dense<0.000000e+00> : vector<1x32xf32>
    %195 = tpu.matmul %162, %4, %cst_85 {dimension_numbers = #tpu.dot_dimension_numbers<[1], [0], [0], [1], [0, 0, 1, 1], [], []>} : vector<1x32xf32>, vector<32x32xf32>, vector<1x32xf32> -> vector<1x32xf32>
    %cst_86 = arith.constant dense<0.000000e+00> : vector<1x32xf32>
    %196 = tpu.matmul %162, %5, %cst_86 {dimension_numbers = #tpu.dot_dimension_numbers<[1], [0], [0], [1], [0, 0, 1, 1], [], []>} : vector<1x32xf32>, vector<32x32xf32>, vector<1x32xf32> -> vector<1x32xf32>
    %197 = arith.addf %191, %194 : vector<1x32xf32>
    %198 = arith.negf %197 : vector<1x32xf32>
    %199 = math.exp %198 : vector<1x32xf32>
    %cst_87 = arith.constant 1.000000e+00 : f32
    %200 = vector.broadcast %cst_87 : f32 to vector<1x32xf32>
    %201 = arith.addf %200, %199 : vector<1x32xf32>
    %202 = arith.divf %200, %201 : vector<1x32xf32>
    %203 = arith.addf %192, %195 : vector<1x32xf32>
    %204 = arith.negf %203 : vector<1x32xf32>
    %205 = math.exp %204 : vector<1x32xf32>
    %cst_88 = arith.constant 1.000000e+00 : f32
    %206 = vector.broadcast %cst_88 : f32 to vector<1x32xf32>
    %207 = arith.addf %206, %205 : vector<1x32xf32>
    %208 = arith.divf %206, %207 : vector<1x32xf32>
    %209 = arith.addf %196, %9 : vector<1x32xf32>
    %210 = arith.mulf %202, %209 : vector<1x32xf32>
    %211 = arith.addf %193, %210 : vector<1x32xf32>
    %212 = math.tanh %211 : vector<1x32xf32>
    %213 = arith.subf %162, %212 : vector<1x32xf32>
    %214 = arith.mulf %208, %213 : vector<1x32xf32>
    %215 = arith.addf %212, %214 : vector<1x32xf32>
    %cst_89 = arith.constant dense<0.000000e+00> : vector<1x32xf32>
    %216 = tpu.matmul %215, %10, %cst_89 {dimension_numbers = #tpu.dot_dimension_numbers<[1], [0], [0], [1], [0, 0, 1, 1], [], []>} : vector<1x32xf32>, vector<32x32xf32>, vector<1x32xf32> -> vector<1x32xf32>
    %217 = arith.addf %216, %16 : vector<1x32xf32>
    %cst_90 = arith.constant dense<0.000000e+00> : vector<1x32xf32>
    %218 = tpu.matmul %215, %11, %cst_90 {dimension_numbers = #tpu.dot_dimension_numbers<[1], [0], [0], [1], [0, 0, 1, 1], [], []>} : vector<1x32xf32>, vector<32x32xf32>, vector<1x32xf32> -> vector<1x32xf32>
    %219 = arith.addf %218, %17 : vector<1x32xf32>
    %cst_91 = arith.constant dense<0.000000e+00> : vector<1x32xf32>
    %220 = tpu.matmul %215, %12, %cst_91 {dimension_numbers = #tpu.dot_dimension_numbers<[1], [0], [0], [1], [0, 0, 1, 1], [], []>} : vector<1x32xf32>, vector<32x32xf32>, vector<1x32xf32> -> vector<1x32xf32>
    %221 = arith.addf %220, %18 : vector<1x32xf32>
    %cst_92 = arith.constant dense<0.000000e+00> : vector<1x32xf32>
    %222 = tpu.matmul %190, %13, %cst_92 {dimension_numbers = #tpu.dot_dimension_numbers<[1], [0], [0], [1], [0, 0, 1, 1], [], []>} : vector<1x32xf32>, vector<32x32xf32>, vector<1x32xf32> -> vector<1x32xf32>
    %cst_93 = arith.constant dense<0.000000e+00> : vector<1x32xf32>
    %223 = tpu.matmul %190, %14, %cst_93 {dimension_numbers = #tpu.dot_dimension_numbers<[1], [0], [0], [1], [0, 0, 1, 1], [], []>} : vector<1x32xf32>, vector<32x32xf32>, vector<1x32xf32> -> vector<1x32xf32>
    %cst_94 = arith.constant dense<0.000000e+00> : vector<1x32xf32>
    %224 = tpu.matmul %190, %15, %cst_94 {dimension_numbers = #tpu.dot_dimension_numbers<[1], [0], [0], [1], [0, 0, 1, 1], [], []>} : vector<1x32xf32>, vector<32x32xf32>, vector<1x32xf32> -> vector<1x32xf32>
    %225 = arith.addf %217, %222 : vector<1x32xf32>
    %226 = arith.negf %225 : vector<1x32xf32>
    %227 = math.exp %226 : vector<1x32xf32>
    %cst_95 = arith.constant 1.000000e+00 : f32
    %228 = vector.broadcast %cst_95 : f32 to vector<1x32xf32>
    %229 = arith.addf %228, %227 : vector<1x32xf32>
    %230 = arith.divf %228, %229 : vector<1x32xf32>
    %231 = arith.addf %219, %223 : vector<1x32xf32>
    %232 = arith.negf %231 : vector<1x32xf32>
    %233 = math.exp %232 : vector<1x32xf32>
    %cst_96 = arith.constant 1.000000e+00 : f32
    %234 = vector.broadcast %cst_96 : f32 to vector<1x32xf32>
    %235 = arith.addf %234, %233 : vector<1x32xf32>
    %236 = arith.divf %234, %235 : vector<1x32xf32>
    %237 = arith.addf %224, %19 : vector<1x32xf32>
    %238 = arith.mulf %230, %237 : vector<1x32xf32>
    %239 = arith.addf %221, %238 : vector<1x32xf32>
    %240 = math.tanh %239 : vector<1x32xf32>
    %241 = arith.subf %190, %240 : vector<1x32xf32>
    %242 = arith.mulf %236, %241 : vector<1x32xf32>
    %243 = arith.addf %240, %242 : vector<1x32xf32>
    %244 = vector.extract_strided_slice %23 {offsets = [4, 0], sizes = [1, 32], strides = [1, 1]} : vector<8x32xf32> to vector<1x32xf32>
    %245 = vector.extract_strided_slice %26 {offsets = [4, 0], sizes = [1, 32], strides = [1, 1]} : vector<8x32xf32> to vector<1x32xf32>
    %246 = vector.extract_strided_slice %29 {offsets = [4, 0], sizes = [1, 32], strides = [1, 1]} : vector<8x32xf32> to vector<1x32xf32>
    %cst_97 = arith.constant dense<0.000000e+00> : vector<1x32xf32>
    %247 = tpu.matmul %215, %3, %cst_97 {dimension_numbers = #tpu.dot_dimension_numbers<[1], [0], [0], [1], [0, 0, 1, 1], [], []>} : vector<1x32xf32>, vector<32x32xf32>, vector<1x32xf32> -> vector<1x32xf32>
    %cst_98 = arith.constant dense<0.000000e+00> : vector<1x32xf32>
    %248 = tpu.matmul %215, %4, %cst_98 {dimension_numbers = #tpu.dot_dimension_numbers<[1], [0], [0], [1], [0, 0, 1, 1], [], []>} : vector<1x32xf32>, vector<32x32xf32>, vector<1x32xf32> -> vector<1x32xf32>
    %cst_99 = arith.constant dense<0.000000e+00> : vector<1x32xf32>
    %249 = tpu.matmul %215, %5, %cst_99 {dimension_numbers = #tpu.dot_dimension_numbers<[1], [0], [0], [1], [0, 0, 1, 1], [], []>} : vector<1x32xf32>, vector<32x32xf32>, vector<1x32xf32> -> vector<1x32xf32>
    %250 = arith.addf %244, %247 : vector<1x32xf32>
    %251 = arith.negf %250 : vector<1x32xf32>
    %252 = math.exp %251 : vector<1x32xf32>
    %cst_100 = arith.constant 1.000000e+00 : f32
    %253 = vector.broadcast %cst_100 : f32 to vector<1x32xf32>
    %254 = arith.addf %253, %252 : vector<1x32xf32>
    %255 = arith.divf %253, %254 : vector<1x32xf32>
    %256 = arith.addf %245, %248 : vector<1x32xf32>
    %257 = arith.negf %256 : vector<1x32xf32>
    %258 = math.exp %257 : vector<1x32xf32>
    %cst_101 = arith.constant 1.000000e+00 : f32
    %259 = vector.broadcast %cst_101 : f32 to vector<1x32xf32>
    %260 = arith.addf %259, %258 : vector<1x32xf32>
    %261 = arith.divf %259, %260 : vector<1x32xf32>
    %262 = arith.addf %249, %9 : vector<1x32xf32>
    %263 = arith.mulf %255, %262 : vector<1x32xf32>
    %264 = arith.addf %246, %263 : vector<1x32xf32>
    %265 = math.tanh %264 : vector<1x32xf32>
    %266 = arith.subf %215, %265 : vector<1x32xf32>
    %267 = arith.mulf %261, %266 : vector<1x32xf32>
    %268 = arith.addf %265, %267 : vector<1x32xf32>
    %cst_102 = arith.constant dense<0.000000e+00> : vector<1x32xf32>
    %269 = tpu.matmul %268, %10, %cst_102 {dimension_numbers = #tpu.dot_dimension_numbers<[1], [0], [0], [1], [0, 0, 1, 1], [], []>} : vector<1x32xf32>, vector<32x32xf32>, vector<1x32xf32> -> vector<1x32xf32>
    %270 = arith.addf %269, %16 : vector<1x32xf32>
    %cst_103 = arith.constant dense<0.000000e+00> : vector<1x32xf32>
    %271 = tpu.matmul %268, %11, %cst_103 {dimension_numbers = #tpu.dot_dimension_numbers<[1], [0], [0], [1], [0, 0, 1, 1], [], []>} : vector<1x32xf32>, vector<32x32xf32>, vector<1x32xf32> -> vector<1x32xf32>
    %272 = arith.addf %271, %17 : vector<1x32xf32>
    %cst_104 = arith.constant dense<0.000000e+00> : vector<1x32xf32>
    %273 = tpu.matmul %268, %12, %cst_104 {dimension_numbers = #tpu.dot_dimension_numbers<[1], [0], [0], [1], [0, 0, 1, 1], [], []>} : vector<1x32xf32>, vector<32x32xf32>, vector<1x32xf32> -> vector<1x32xf32>
    %274 = arith.addf %273, %18 : vector<1x32xf32>
    %cst_105 = arith.constant dense<0.000000e+00> : vector<1x32xf32>
    %275 = tpu.matmul %243, %13, %cst_105 {dimension_numbers = #tpu.dot_dimension_numbers<[1], [0], [0], [1], [0, 0, 1, 1], [], []>} : vector<1x32xf32>, vector<32x32xf32>, vector<1x32xf32> -> vector<1x32xf32>
    %cst_106 = arith.constant dense<0.000000e+00> : vector<1x32xf32>
    %276 = tpu.matmul %243, %14, %cst_106 {dimension_numbers = #tpu.dot_dimension_numbers<[1], [0], [0], [1], [0, 0, 1, 1], [], []>} : vector<1x32xf32>, vector<32x32xf32>, vector<1x32xf32> -> vector<1x32xf32>
    %cst_107 = arith.constant dense<0.000000e+00> : vector<1x32xf32>
    %277 = tpu.matmul %243, %15, %cst_107 {dimension_numbers = #tpu.dot_dimension_numbers<[1], [0], [0], [1], [0, 0, 1, 1], [], []>} : vector<1x32xf32>, vector<32x32xf32>, vector<1x32xf32> -> vector<1x32xf32>
    %278 = arith.addf %270, %275 : vector<1x32xf32>
    %279 = arith.negf %278 : vector<1x32xf32>
    %280 = math.exp %279 : vector<1x32xf32>
    %cst_108 = arith.constant 1.000000e+00 : f32
    %281 = vector.broadcast %cst_108 : f32 to vector<1x32xf32>
    %282 = arith.addf %281, %280 : vector<1x32xf32>
    %283 = arith.divf %281, %282 : vector<1x32xf32>
    %284 = arith.addf %272, %276 : vector<1x32xf32>
    %285 = arith.negf %284 : vector<1x32xf32>
    %286 = math.exp %285 : vector<1x32xf32>
    %cst_109 = arith.constant 1.000000e+00 : f32
    %287 = vector.broadcast %cst_109 : f32 to vector<1x32xf32>
    %288 = arith.addf %287, %286 : vector<1x32xf32>
    %289 = arith.divf %287, %288 : vector<1x32xf32>
    %290 = arith.addf %277, %19 : vector<1x32xf32>
    %291 = arith.mulf %283, %290 : vector<1x32xf32>
    %292 = arith.addf %274, %291 : vector<1x32xf32>
    %293 = math.tanh %292 : vector<1x32xf32>
    %294 = arith.subf %243, %293 : vector<1x32xf32>
    %295 = arith.mulf %289, %294 : vector<1x32xf32>
    %296 = arith.addf %293, %295 : vector<1x32xf32>
    %297 = vector.extract_strided_slice %23 {offsets = [5, 0], sizes = [1, 32], strides = [1, 1]} : vector<8x32xf32> to vector<1x32xf32>
    %298 = vector.extract_strided_slice %26 {offsets = [5, 0], sizes = [1, 32], strides = [1, 1]} : vector<8x32xf32> to vector<1x32xf32>
    %299 = vector.extract_strided_slice %29 {offsets = [5, 0], sizes = [1, 32], strides = [1, 1]} : vector<8x32xf32> to vector<1x32xf32>
    %cst_110 = arith.constant dense<0.000000e+00> : vector<1x32xf32>
    %300 = tpu.matmul %268, %3, %cst_110 {dimension_numbers = #tpu.dot_dimension_numbers<[1], [0], [0], [1], [0, 0, 1, 1], [], []>} : vector<1x32xf32>, vector<32x32xf32>, vector<1x32xf32> -> vector<1x32xf32>
    %cst_111 = arith.constant dense<0.000000e+00> : vector<1x32xf32>
    %301 = tpu.matmul %268, %4, %cst_111 {dimension_numbers = #tpu.dot_dimension_numbers<[1], [0], [0], [1], [0, 0, 1, 1], [], []>} : vector<1x32xf32>, vector<32x32xf32>, vector<1x32xf32> -> vector<1x32xf32>
    %cst_112 = arith.constant dense<0.000000e+00> : vector<1x32xf32>
    %302 = tpu.matmul %268, %5, %cst_112 {dimension_numbers = #tpu.dot_dimension_numbers<[1], [0], [0], [1], [0, 0, 1, 1], [], []>} : vector<1x32xf32>, vector<32x32xf32>, vector<1x32xf32> -> vector<1x32xf32>
    %303 = arith.addf %297, %300 : vector<1x32xf32>
    %304 = arith.negf %303 : vector<1x32xf32>
    %305 = math.exp %304 : vector<1x32xf32>
    %cst_113 = arith.constant 1.000000e+00 : f32
    %306 = vector.broadcast %cst_113 : f32 to vector<1x32xf32>
    %307 = arith.addf %306, %305 : vector<1x32xf32>
    %308 = arith.divf %306, %307 : vector<1x32xf32>
    %309 = arith.addf %298, %301 : vector<1x32xf32>
    %310 = arith.negf %309 : vector<1x32xf32>
    %311 = math.exp %310 : vector<1x32xf32>
    %cst_114 = arith.constant 1.000000e+00 : f32
    %312 = vector.broadcast %cst_114 : f32 to vector<1x32xf32>
    %313 = arith.addf %312, %311 : vector<1x32xf32>
    %314 = arith.divf %312, %313 : vector<1x32xf32>
    %315 = arith.addf %302, %9 : vector<1x32xf32>
    %316 = arith.mulf %308, %315 : vector<1x32xf32>
    %317 = arith.addf %299, %316 : vector<1x32xf32>
    %318 = math.tanh %317 : vector<1x32xf32>
    %319 = arith.subf %268, %318 : vector<1x32xf32>
    %320 = arith.mulf %314, %319 : vector<1x32xf32>
    %321 = arith.addf %318, %320 : vector<1x32xf32>
    %cst_115 = arith.constant dense<0.000000e+00> : vector<1x32xf32>
    %322 = tpu.matmul %321, %10, %cst_115 {dimension_numbers = #tpu.dot_dimension_numbers<[1], [0], [0], [1], [0, 0, 1, 1], [], []>} : vector<1x32xf32>, vector<32x32xf32>, vector<1x32xf32> -> vector<1x32xf32>
    %323 = arith.addf %322, %16 : vector<1x32xf32>
    %cst_116 = arith.constant dense<0.000000e+00> : vector<1x32xf32>
    %324 = tpu.matmul %321, %11, %cst_116 {dimension_numbers = #tpu.dot_dimension_numbers<[1], [0], [0], [1], [0, 0, 1, 1], [], []>} : vector<1x32xf32>, vector<32x32xf32>, vector<1x32xf32> -> vector<1x32xf32>
    %325 = arith.addf %324, %17 : vector<1x32xf32>
    %cst_117 = arith.constant dense<0.000000e+00> : vector<1x32xf32>
    %326 = tpu.matmul %321, %12, %cst_117 {dimension_numbers = #tpu.dot_dimension_numbers<[1], [0], [0], [1], [0, 0, 1, 1], [], []>} : vector<1x32xf32>, vector<32x32xf32>, vector<1x32xf32> -> vector<1x32xf32>
    %327 = arith.addf %326, %18 : vector<1x32xf32>
    %cst_118 = arith.constant dense<0.000000e+00> : vector<1x32xf32>
    %328 = tpu.matmul %296, %13, %cst_118 {dimension_numbers = #tpu.dot_dimension_numbers<[1], [0], [0], [1], [0, 0, 1, 1], [], []>} : vector<1x32xf32>, vector<32x32xf32>, vector<1x32xf32> -> vector<1x32xf32>
    %cst_119 = arith.constant dense<0.000000e+00> : vector<1x32xf32>
    %329 = tpu.matmul %296, %14, %cst_119 {dimension_numbers = #tpu.dot_dimension_numbers<[1], [0], [0], [1], [0, 0, 1, 1], [], []>} : vector<1x32xf32>, vector<32x32xf32>, vector<1x32xf32> -> vector<1x32xf32>
    %cst_120 = arith.constant dense<0.000000e+00> : vector<1x32xf32>
    %330 = tpu.matmul %296, %15, %cst_120 {dimension_numbers = #tpu.dot_dimension_numbers<[1], [0], [0], [1], [0, 0, 1, 1], [], []>} : vector<1x32xf32>, vector<32x32xf32>, vector<1x32xf32> -> vector<1x32xf32>
    %331 = arith.addf %323, %328 : vector<1x32xf32>
    %332 = arith.negf %331 : vector<1x32xf32>
    %333 = math.exp %332 : vector<1x32xf32>
    %cst_121 = arith.constant 1.000000e+00 : f32
    %334 = vector.broadcast %cst_121 : f32 to vector<1x32xf32>
    %335 = arith.addf %334, %333 : vector<1x32xf32>
    %336 = arith.divf %334, %335 : vector<1x32xf32>
    %337 = arith.addf %325, %329 : vector<1x32xf32>
    %338 = arith.negf %337 : vector<1x32xf32>
    %339 = math.exp %338 : vector<1x32xf32>
    %cst_122 = arith.constant 1.000000e+00 : f32
    %340 = vector.broadcast %cst_122 : f32 to vector<1x32xf32>
    %341 = arith.addf %340, %339 : vector<1x32xf32>
    %342 = arith.divf %340, %341 : vector<1x32xf32>
    %343 = arith.addf %330, %19 : vector<1x32xf32>
    %344 = arith.mulf %336, %343 : vector<1x32xf32>
    %345 = arith.addf %327, %344 : vector<1x32xf32>
    %346 = math.tanh %345 : vector<1x32xf32>
    %347 = arith.subf %296, %346 : vector<1x32xf32>
    %348 = arith.mulf %342, %347 : vector<1x32xf32>
    %349 = arith.addf %346, %348 : vector<1x32xf32>
    %350 = vector.extract_strided_slice %23 {offsets = [6, 0], sizes = [1, 32], strides = [1, 1]} : vector<8x32xf32> to vector<1x32xf32>
    %351 = vector.extract_strided_slice %26 {offsets = [6, 0], sizes = [1, 32], strides = [1, 1]} : vector<8x32xf32> to vector<1x32xf32>
    %352 = vector.extract_strided_slice %29 {offsets = [6, 0], sizes = [1, 32], strides = [1, 1]} : vector<8x32xf32> to vector<1x32xf32>
    %cst_123 = arith.constant dense<0.000000e+00> : vector<1x32xf32>
    %353 = tpu.matmul %321, %3, %cst_123 {dimension_numbers = #tpu.dot_dimension_numbers<[1], [0], [0], [1], [0, 0, 1, 1], [], []>} : vector<1x32xf32>, vector<32x32xf32>, vector<1x32xf32> -> vector<1x32xf32>
    %cst_124 = arith.constant dense<0.000000e+00> : vector<1x32xf32>
    %354 = tpu.matmul %321, %4, %cst_124 {dimension_numbers = #tpu.dot_dimension_numbers<[1], [0], [0], [1], [0, 0, 1, 1], [], []>} : vector<1x32xf32>, vector<32x32xf32>, vector<1x32xf32> -> vector<1x32xf32>
    %cst_125 = arith.constant dense<0.000000e+00> : vector<1x32xf32>
    %355 = tpu.matmul %321, %5, %cst_125 {dimension_numbers = #tpu.dot_dimension_numbers<[1], [0], [0], [1], [0, 0, 1, 1], [], []>} : vector<1x32xf32>, vector<32x32xf32>, vector<1x32xf32> -> vector<1x32xf32>
    %356 = arith.addf %350, %353 : vector<1x32xf32>
    %357 = arith.negf %356 : vector<1x32xf32>
    %358 = math.exp %357 : vector<1x32xf32>
    %cst_126 = arith.constant 1.000000e+00 : f32
    %359 = vector.broadcast %cst_126 : f32 to vector<1x32xf32>
    %360 = arith.addf %359, %358 : vector<1x32xf32>
    %361 = arith.divf %359, %360 : vector<1x32xf32>
    %362 = arith.addf %351, %354 : vector<1x32xf32>
    %363 = arith.negf %362 : vector<1x32xf32>
    %364 = math.exp %363 : vector<1x32xf32>
    %cst_127 = arith.constant 1.000000e+00 : f32
    %365 = vector.broadcast %cst_127 : f32 to vector<1x32xf32>
    %366 = arith.addf %365, %364 : vector<1x32xf32>
    %367 = arith.divf %365, %366 : vector<1x32xf32>
    %368 = arith.addf %355, %9 : vector<1x32xf32>
    %369 = arith.mulf %361, %368 : vector<1x32xf32>
    %370 = arith.addf %352, %369 : vector<1x32xf32>
    %371 = math.tanh %370 : vector<1x32xf32>
    %372 = arith.subf %321, %371 : vector<1x32xf32>
    %373 = arith.mulf %367, %372 : vector<1x32xf32>
    %374 = arith.addf %371, %373 : vector<1x32xf32>
    %cst_128 = arith.constant dense<0.000000e+00> : vector<1x32xf32>
    %375 = tpu.matmul %374, %10, %cst_128 {dimension_numbers = #tpu.dot_dimension_numbers<[1], [0], [0], [1], [0, 0, 1, 1], [], []>} : vector<1x32xf32>, vector<32x32xf32>, vector<1x32xf32> -> vector<1x32xf32>
    %376 = arith.addf %375, %16 : vector<1x32xf32>
    %cst_129 = arith.constant dense<0.000000e+00> : vector<1x32xf32>
    %377 = tpu.matmul %374, %11, %cst_129 {dimension_numbers = #tpu.dot_dimension_numbers<[1], [0], [0], [1], [0, 0, 1, 1], [], []>} : vector<1x32xf32>, vector<32x32xf32>, vector<1x32xf32> -> vector<1x32xf32>
    %378 = arith.addf %377, %17 : vector<1x32xf32>
    %cst_130 = arith.constant dense<0.000000e+00> : vector<1x32xf32>
    %379 = tpu.matmul %374, %12, %cst_130 {dimension_numbers = #tpu.dot_dimension_numbers<[1], [0], [0], [1], [0, 0, 1, 1], [], []>} : vector<1x32xf32>, vector<32x32xf32>, vector<1x32xf32> -> vector<1x32xf32>
    %380 = arith.addf %379, %18 : vector<1x32xf32>
    %cst_131 = arith.constant dense<0.000000e+00> : vector<1x32xf32>
    %381 = tpu.matmul %349, %13, %cst_131 {dimension_numbers = #tpu.dot_dimension_numbers<[1], [0], [0], [1], [0, 0, 1, 1], [], []>} : vector<1x32xf32>, vector<32x32xf32>, vector<1x32xf32> -> vector<1x32xf32>
    %cst_132 = arith.constant dense<0.000000e+00> : vector<1x32xf32>
    %382 = tpu.matmul %349, %14, %cst_132 {dimension_numbers = #tpu.dot_dimension_numbers<[1], [0], [0], [1], [0, 0, 1, 1], [], []>} : vector<1x32xf32>, vector<32x32xf32>, vector<1x32xf32> -> vector<1x32xf32>
    %cst_133 = arith.constant dense<0.000000e+00> : vector<1x32xf32>
    %383 = tpu.matmul %349, %15, %cst_133 {dimension_numbers = #tpu.dot_dimension_numbers<[1], [0], [0], [1], [0, 0, 1, 1], [], []>} : vector<1x32xf32>, vector<32x32xf32>, vector<1x32xf32> -> vector<1x32xf32>
    %384 = arith.addf %376, %381 : vector<1x32xf32>
    %385 = arith.negf %384 : vector<1x32xf32>
    %386 = math.exp %385 : vector<1x32xf32>
    %cst_134 = arith.constant 1.000000e+00 : f32
    %387 = vector.broadcast %cst_134 : f32 to vector<1x32xf32>
    %388 = arith.addf %387, %386 : vector<1x32xf32>
    %389 = arith.divf %387, %388 : vector<1x32xf32>
    %390 = arith.addf %378, %382 : vector<1x32xf32>
    %391 = arith.negf %390 : vector<1x32xf32>
    %392 = math.exp %391 : vector<1x32xf32>
    %cst_135 = arith.constant 1.000000e+00 : f32
    %393 = vector.broadcast %cst_135 : f32 to vector<1x32xf32>
    %394 = arith.addf %393, %392 : vector<1x32xf32>
    %395 = arith.divf %393, %394 : vector<1x32xf32>
    %396 = arith.addf %383, %19 : vector<1x32xf32>
    %397 = arith.mulf %389, %396 : vector<1x32xf32>
    %398 = arith.addf %380, %397 : vector<1x32xf32>
    %399 = math.tanh %398 : vector<1x32xf32>
    %400 = arith.subf %349, %399 : vector<1x32xf32>
    %401 = arith.mulf %395, %400 : vector<1x32xf32>
    %402 = arith.addf %399, %401 : vector<1x32xf32>
    %403 = vector.extract_strided_slice %23 {offsets = [7, 0], sizes = [1, 32], strides = [1, 1]} : vector<8x32xf32> to vector<1x32xf32>
    %404 = vector.extract_strided_slice %26 {offsets = [7, 0], sizes = [1, 32], strides = [1, 1]} : vector<8x32xf32> to vector<1x32xf32>
    %405 = vector.extract_strided_slice %29 {offsets = [7, 0], sizes = [1, 32], strides = [1, 1]} : vector<8x32xf32> to vector<1x32xf32>
    %cst_136 = arith.constant dense<0.000000e+00> : vector<1x32xf32>
    %406 = tpu.matmul %374, %3, %cst_136 {dimension_numbers = #tpu.dot_dimension_numbers<[1], [0], [0], [1], [0, 0, 1, 1], [], []>} : vector<1x32xf32>, vector<32x32xf32>, vector<1x32xf32> -> vector<1x32xf32>
    %cst_137 = arith.constant dense<0.000000e+00> : vector<1x32xf32>
    %407 = tpu.matmul %374, %4, %cst_137 {dimension_numbers = #tpu.dot_dimension_numbers<[1], [0], [0], [1], [0, 0, 1, 1], [], []>} : vector<1x32xf32>, vector<32x32xf32>, vector<1x32xf32> -> vector<1x32xf32>
    %cst_138 = arith.constant dense<0.000000e+00> : vector<1x32xf32>
    %408 = tpu.matmul %374, %5, %cst_138 {dimension_numbers = #tpu.dot_dimension_numbers<[1], [0], [0], [1], [0, 0, 1, 1], [], []>} : vector<1x32xf32>, vector<32x32xf32>, vector<1x32xf32> -> vector<1x32xf32>
    %409 = arith.addf %403, %406 : vector<1x32xf32>
    %410 = arith.negf %409 : vector<1x32xf32>
    %411 = math.exp %410 : vector<1x32xf32>
    %cst_139 = arith.constant 1.000000e+00 : f32
    %412 = vector.broadcast %cst_139 : f32 to vector<1x32xf32>
    %413 = arith.addf %412, %411 : vector<1x32xf32>
    %414 = arith.divf %412, %413 : vector<1x32xf32>
    %415 = arith.addf %404, %407 : vector<1x32xf32>
    %416 = arith.negf %415 : vector<1x32xf32>
    %417 = math.exp %416 : vector<1x32xf32>
    %cst_140 = arith.constant 1.000000e+00 : f32
    %418 = vector.broadcast %cst_140 : f32 to vector<1x32xf32>
    %419 = arith.addf %418, %417 : vector<1x32xf32>
    %420 = arith.divf %418, %419 : vector<1x32xf32>
    %421 = arith.addf %408, %9 : vector<1x32xf32>
    %422 = arith.mulf %414, %421 : vector<1x32xf32>
    %423 = arith.addf %405, %422 : vector<1x32xf32>
    %424 = math.tanh %423 : vector<1x32xf32>
    %425 = arith.subf %374, %424 : vector<1x32xf32>
    %426 = arith.mulf %420, %425 : vector<1x32xf32>
    %427 = arith.addf %424, %426 : vector<1x32xf32>
    %cst_141 = arith.constant dense<0.000000e+00> : vector<1x32xf32>
    %428 = tpu.matmul %427, %10, %cst_141 {dimension_numbers = #tpu.dot_dimension_numbers<[1], [0], [0], [1], [0, 0, 1, 1], [], []>} : vector<1x32xf32>, vector<32x32xf32>, vector<1x32xf32> -> vector<1x32xf32>
    %429 = arith.addf %428, %16 : vector<1x32xf32>
    %cst_142 = arith.constant dense<0.000000e+00> : vector<1x32xf32>
    %430 = tpu.matmul %427, %11, %cst_142 {dimension_numbers = #tpu.dot_dimension_numbers<[1], [0], [0], [1], [0, 0, 1, 1], [], []>} : vector<1x32xf32>, vector<32x32xf32>, vector<1x32xf32> -> vector<1x32xf32>
    %431 = arith.addf %430, %17 : vector<1x32xf32>
    %cst_143 = arith.constant dense<0.000000e+00> : vector<1x32xf32>
    %432 = tpu.matmul %427, %12, %cst_143 {dimension_numbers = #tpu.dot_dimension_numbers<[1], [0], [0], [1], [0, 0, 1, 1], [], []>} : vector<1x32xf32>, vector<32x32xf32>, vector<1x32xf32> -> vector<1x32xf32>
    %433 = arith.addf %432, %18 : vector<1x32xf32>
    %cst_144 = arith.constant dense<0.000000e+00> : vector<1x32xf32>
    %434 = tpu.matmul %402, %13, %cst_144 {dimension_numbers = #tpu.dot_dimension_numbers<[1], [0], [0], [1], [0, 0, 1, 1], [], []>} : vector<1x32xf32>, vector<32x32xf32>, vector<1x32xf32> -> vector<1x32xf32>
    %cst_145 = arith.constant dense<0.000000e+00> : vector<1x32xf32>
    %435 = tpu.matmul %402, %14, %cst_145 {dimension_numbers = #tpu.dot_dimension_numbers<[1], [0], [0], [1], [0, 0, 1, 1], [], []>} : vector<1x32xf32>, vector<32x32xf32>, vector<1x32xf32> -> vector<1x32xf32>
    %cst_146 = arith.constant dense<0.000000e+00> : vector<1x32xf32>
    %436 = tpu.matmul %402, %15, %cst_146 {dimension_numbers = #tpu.dot_dimension_numbers<[1], [0], [0], [1], [0, 0, 1, 1], [], []>} : vector<1x32xf32>, vector<32x32xf32>, vector<1x32xf32> -> vector<1x32xf32>
    %437 = arith.addf %429, %434 : vector<1x32xf32>
    %438 = arith.negf %437 : vector<1x32xf32>
    %439 = math.exp %438 : vector<1x32xf32>
    %cst_147 = arith.constant 1.000000e+00 : f32
    %440 = vector.broadcast %cst_147 : f32 to vector<1x32xf32>
    %441 = arith.addf %440, %439 : vector<1x32xf32>
    %442 = arith.divf %440, %441 : vector<1x32xf32>
    %443 = arith.addf %431, %435 : vector<1x32xf32>
    %444 = arith.negf %443 : vector<1x32xf32>
    %445 = math.exp %444 : vector<1x32xf32>
    %cst_148 = arith.constant 1.000000e+00 : f32
    %446 = vector.broadcast %cst_148 : f32 to vector<1x32xf32>
    %447 = arith.addf %446, %445 : vector<1x32xf32>
    %448 = arith.divf %446, %447 : vector<1x32xf32>
    %449 = arith.addf %436, %19 : vector<1x32xf32>
    %450 = arith.mulf %442, %449 : vector<1x32xf32>
    %451 = arith.addf %433, %450 : vector<1x32xf32>
    %452 = math.tanh %451 : vector<1x32xf32>
    %453 = arith.subf %402, %452 : vector<1x32xf32>
    %454 = arith.mulf %448, %453 : vector<1x32xf32>
    %455 = arith.addf %452, %454 : vector<1x32xf32>
    %c0_149 = arith.constant 0 : index
    %c0_150 = arith.constant 0 : index
    %456 = vector.load %arg21[%c0_149, %c0_150] : memref<32x8xf32, #tpu.memory_space<vmem>>, vector<32x8xf32>
    %cst_151 = arith.constant dense<0.000000e+00> : vector<1x8xf32>
    %457 = tpu.matmul %455, %456, %cst_151 {dimension_numbers = #tpu.dot_dimension_numbers<[1], [0], [0], [1], [0, 0, 1, 1], [], []>} : vector<1x32xf32>, vector<32x8xf32>, vector<1x8xf32> -> vector<1x8xf32>
    %c0_152 = arith.constant 0 : index
    %c0_153 = arith.constant 0 : index
    %458 = vector.load %arg22[%c0_152, %c0_153] : memref<1x8xf32, #tpu.memory_space<vmem>>, vector<1x8xf32>
    %459 = arith.addf %457, %458 : vector<1x8xf32>
    %cst_154 = arith.constant dense<0xFF800000> : vector<1xf32>
    %460 = vector.multi_reduction <maximumf>, %459, %cst_154 [1] : vector<1x8xf32> to vector<1xf32>
    %461 = vector.shape_cast %460 : vector<1xf32> to vector<1x1xf32>
    %462 = vector.broadcast %461 : vector<1x1xf32> to vector<1x8xf32>
    %463 = arith.subf %459, %462 : vector<1x8xf32>
    %464 = math.exp %463 : vector<1x8xf32>
    %cst_155 = arith.constant dense<0.000000e+00> : vector<1xf32>
    %465 = vector.multi_reduction <add>, %464, %cst_155 [1] : vector<1x8xf32> to vector<1xf32>
    %466 = vector.shape_cast %465 : vector<1xf32> to vector<1x1xf32>
    %467 = vector.broadcast %466 : vector<1x1xf32> to vector<1x8xf32>
    %468 = arith.divf %464, %467 : vector<1x8xf32>
    %c0_156 = arith.constant 0 : index
    %c0_157 = arith.constant 0 : index
    %469 = vector.load %arg23[%c0_156, %c0_157] : memref<1x8xf32, #tpu.memory_space<vmem>>, vector<1x8xf32>
    tpu.vector_store %arg23[%c0_156, %c0_157], %468 {strides = array<i32>} : memref<1x8xf32, #tpu.memory_space<vmem>>, vector<1x8xf32>,
    return
  }
}

</mosaic_0001>

<bundles_post_ra>
// kernel: tpu_custom_call.1
= control target key start
LH: loop header
LB: loop body
LE: loop exit
PB: predicated region body
PF: predicated region fallthrough
CT: control target
= control target key end

     0   :  { %s9695_s0 = inlined_call_operand.hbm [shape: f32[8,16], index: 0, kind: input, shape index: {}]   ;;  %s9696_s1 = inlined_call_operand.hbm [shape: f32[16,32], index: 1, kind: input, shape index: {}]   ;;  %s9697_s2 = inlined_call_operand.hbm [shape: f32[16,32], index: 2, kind: input, shape index: {}]   ;;  %s9698_s3 = inlined_call_operand.hbm [shape: f32[16,32], index: 3, kind: input, shape index: {}]   ;;  %s9699_s4 = inlined_call_operand.vmem [shape: f32[32,32], index: 4, kind: input, shape index: {}]   ;;  %s9700_s5 = inlined_call_operand.hbm [shape: f32[32,32], index: 5, kind: input, shape index: {}]   ;;  %s9701_s6 = inlined_call_operand.hbm [shape: f32[32,32], index: 6, kind: input, shape index: {}]   ;;  %s9702_s7 = inlined_call_operand.hbm [shape: f32[1,32], index: 7, kind: input, shape index: {}]   ;;  %s9703_s8 = inlined_call_operand.hbm [shape: f32[1,32], index: 8, kind: input, shape index: {}]   ;;  %s9704_s9 = inlined_call_operand.hbm [shape: f32[1,32], index: 9, kind: input, shape index: {}]   ;;  %s9705_s10 = inlined_call_operand.hbm [shape: f32[1,32], index: 10, kind: input, shape index: {}]   ;;  %s9706_s11 = inlined_call_operand.vmem [shape: f32[32,32], index: 11, kind: input, shape index: {}]   ;;  %s9707_s12 = inlined_call_operand.hbm [shape: f32[32,32], index: 12, kind: input, shape index: {}]   ;;  %s9708_s13 = inlined_call_operand.hbm [shape: f32[32,32], index: 13, kind: input, shape index: {}]   ;;  %s9709_s14 = inlined_call_operand.hbm [shape: f32[32,32], index: 14, kind: input, shape index: {}]   ;;  %s9710_s15 = inlined_call_operand.vmem [shape: f32[32,32], index: 15, kind: input, shape index: {}]   ;;  %s9711_s16 = inlined_call_operand.hbm [shape: f32[32,32], index: 16, kind: input, shape index: {}]   ;;  %s9712_s17 = inlined_call_operand.hbm [shape: f32[1,32], index: 17, kind: input, shape index: {}]   ;;  %s9713_s18 = inlined_call_operand.vmem [shape: f32[1,32], index: 18, kind: input, shape index: {}]   ;;  %s9714_s19 = inlined_call_operand.vmem [shape: f32[1,32], index: 19, kind: input, shape index: {}]   ;;  %s9715_s20 = inlined_call_operand.vmem [shape: f32[1,32], index: 20, kind: input, shape index: {}]   ;;  %s9716_s21 = inlined_call_operand.vmem [shape: f32[32,8], index: 21, kind: input, shape index: {}]   ;;  %s9717_s22 = inlined_call_operand.vmem [shape: f32[1,8], index: 22, kind: input, shape index: {}]   ;;  %s9718_s23 = inlined_call_operand.hbm [shape: f32[1,8], index: 23, kind: output, shape index: {}]  }
   0x1   :  { %9729 = sst [smem:[#allocation36_spill]] %s9695_s0 }
   0x2   :  { %9730 = sst [smem:[#allocation37_spill]] %s9696_s1 }
   0x3   :  { %9731 = sst [smem:[#allocation38_spill]] %s9697_s2 }
   0x4   :  { %9732 = sst [smem:[#allocation39_spill]] %s9698_s3 }
   0x5   :  { %9733 = sst [smem:[#allocation40_spill]] %s9699_s4 }
   0x6   :  { %9734 = sst [smem:[#allocation41_spill]] %s9700_s5 }
   0x7   :  { %9735 = sst [smem:[#allocation42_spill]] %s9701_s6 }
   0x8   :  { %9736 = sst [smem:[#allocation43_spill]] %s9702_s7 }
   0x9   :  { %9737 = sst [smem:[#allocation44_spill]] %s9716_s21 }
   0xa   :  { %9738 = sst [smem:[#allocation45_spill]] %s9717_s22 }
   0xb   :  { %9739 = sst [smem:[#allocation46_spill]] %s9718_s23 }
   0xc   :  { %28 = vsyncpa [#allocation3], 0 }
   0xd   :  { %29 = vsyncpa [#allocation6], 0 }
   0xe   :  { %30 = vsyncpa [#allocation9], 0 }
   0xf   :  { %31 = vsyncpa [#allocation12], 0 }
  0x10   :  { %32 = vsyncpa [#allocation15], 0 }
  0x11   :  { %33 = vsyncpa [#allocation18], 0 }
  0x12   :  { %34 = vsyncpa [#allocation21], 0 }
  0x13   :  { %35 = vsyncpa [#allocation24], 0 }
  0x14   :  { %36 = vsyncpa [#allocation4], 0  ;;  %s8541_s4 = smov [#allocation5]   ;;  %s9740_s5 = sld [smem:[#allocation37_spill]] }
  0x15   :  { %s52_s30 = sshll.u32 %s8541_s4, 4  ;;  %s53_s30 = int_to_ptr.vmem [resolvable:$true] %s52_s30 }
  0x1a   :  { %s8171_s1 = scalar_lea.hbm %s9740_s5, 256 }
  0x1b   :  { %p8172_p0 = scmp.ne.s32.totalorder %s9740_s5, %s8171_s1  ;;  %p8175_p1 = scmp.lt.u32.totalorder %s8171_s1, %s9740_s5 }
  0x1d   :  { %p8177_p2 = pnand %p8175_p1, %p8172_p0 }
  0x1f   :  { %8180 = shalt.err (!%p8177_p2)
}
  0x20   :  { %s8181_s7 = scalar_lea.vmem %s53_s30, 256  ;;  %p8186_p4 = scmp.lt.s32.totalorder %s53_s30, %s53_s30 }
  0x21   :  { %p8182_p3 = scmp.ne.s32.totalorder %s53_s30, %s8181_s7  ;;  %p8187_p5 = scmp.lt.s32.totalorder %s8181_s7, %s8181_s7 }
  0x23   :  { %p8188_p6 = por %p8187_p5, %p8186_p4 }
  0x25   :  { %p8189_p7 = pnand %p8188_p6, %p8182_p3 }
  0x27   :  { %8192 = shalt.err (!%p8189_p7)
}
  0x28   :  { %s8542_s28 = smov 128   ;;  %s8543_s29 = smov 8  }
  0x29   :  { %58 = dma.hbm_to_vmem [thread:$0]  %s9740_s5, 256, %s53_s30, [#allocation6], %s8542_s28, %s8542_s28, %s8543_s29  }
  0x2a   :  { %s8544_s4 = smov [#allocation8]   ;;  %s8545_s25 = smov [#allocation11]  }
  0x2b   :  { %s76_s24 = sshll.u32 %s8544_s4, 4  ;;  %s102_s1 = sshll.u32 %s8545_s25, 4  ;;  %s77_s24 = int_to_ptr.vmem [resolvable:$true] %s76_s24  ;;  %s103_s1 = int_to_ptr.vmem [resolvable:$true] %s102_s1 }
  0x2c   :  { %s9741_s6 = sld [smem:[#allocation39_spill]] }
  0x32   :  { %s8193_s27 = scalar_lea.hbm %s9741_s6, 256 }
  0x33   :  { %p8194_p8 = scmp.ne.s32.totalorder %s9741_s6, %s8193_s27  ;;  %p8197_p9 = scmp.lt.u32.totalorder %s8193_s27, %s9741_s6 }
  0x35   :  { %p8199_p10 = pnand %p8197_p9, %p8194_p8 }
  0x37   :  { %8202 = shalt.err (!%p8199_p10)
}
  0x38   :  { %s8203_s30 = scalar_lea.vmem %s77_s24, 256  ;;  %p8208_p12 = scmp.lt.s32.totalorder %s77_s24, %s77_s24 }
  0x39   :  { %p8204_p11 = scmp.ne.s32.totalorder %s77_s24, %s8203_s30  ;;  %p8209_p13 = scmp.lt.s32.totalorder %s8203_s30, %s8203_s30 }
  0x3b   :  { %p8210_p0 = por %p8209_p13, %p8208_p12 }
  0x3d   :  { %p8211_p1 = pnand %p8210_p0, %p8204_p11 }
  0x3f   :  { %8214 = shalt.err (!%p8211_p1)
}
  0x40   :  { %82 = dma.hbm_to_vmem [thread:$0]  %s9741_s6, 256, %s77_s24, [#allocation9], %s8542_s28, %s8542_s28, %s8543_s29  }
  0x41   :  { %s9742_s22 = sld [smem:[#allocation42_spill]] }
  0x47   :  { %s8215_s0 = scalar_lea.hbm %s9742_s22, 512 }
  0x48   :  { %p8216_p2 = scmp.ne.s32.totalorder %s9742_s22, %s8215_s0  ;;  %p8219_p3 = scmp.lt.u32.totalorder %s8215_s0, %s9742_s22 }
  0x4a   :  { %p8221_p4 = pnand %p8219_p3, %p8216_p2 }
  0x4c   :  { %8224 = shalt.err (!%p8221_p4)
}
  0x4d   :  { %s8225_s27 = scalar_lea.vmem %s103_s1, 512  ;;  %p8230_p6 = scmp.lt.s32.totalorder %s103_s1, %s103_s1 }
  0x4e   :  { %p8226_p5 = scmp.ne.s32.totalorder %s103_s1, %s8225_s27  ;;  %p8231_p7 = scmp.lt.s32.totalorder %s8225_s27, %s8225_s27 }
  0x50   :  { %p8232_p8 = por %p8231_p7, %p8230_p6 }
  0x52   :  { %p8233_p9 = pnand %p8232_p8, %p8226_p5 }
  0x54   :  { %8236 = shalt.err (!%p8233_p9)
}
  0x55   :  { %108 = dma.hbm_to_vmem [thread:$0]  %s9742_s22, 512, %s103_s1, [#allocation12], %s8542_s28, %s8542_s28, %s8543_s29  }
  0x56   :  { %s8546_s7 = smov [#allocation14]   ;;  %s8547_s5 = smov [#allocation17]  }
  0x57   :  { %s125_s30 = sshll.u32 %s8546_s7, 4  ;;  %s145_s3 = sshll.u32 %s8547_s5, 4  ;;  %s126_s30 = int_to_ptr.vmem [resolvable:$true] %s125_s30  ;;  %s146_s3 = int_to_ptr.vmem [resolvable:$true] %s145_s3 }
  0x58   :  { %s8237_s0 = scalar_lea.hbm %s9703_s8, 16 }
  0x59   :  { %p8238_p10 = scmp.ne.s32.totalorder %s9703_s8, %s8237_s0  ;;  %p8241_p11 = scmp.lt.u32.totalorder %s8237_s0, %s9703_s8 }
  0x5b   :  { %p8243_p12 = pnand %p8241_p11, %p8238_p10 }
  0x5d   :  { %8246 = shalt.err (!%p8243_p12)
}
  0x5e   :  { %s8247_s1 = scalar_lea.vmem %s126_s30, 16  ;;  %s8251_s22 = scalar_lea.vmem %s126_s30, 32 }
  0x5f   :  { %p8248_p13 = scmp.ne.s32.totalorder %s126_s30, %s8247_s1  ;;  %p8252_p0 = scmp.lt.s32.totalorder %s126_s30, %s126_s30 }
  0x60   :  { %p8253_p1 = scmp.lt.s32.totalorder %s8251_s22, %s8247_s1 }
  0x62   :  { %p8254_p2 = por %p8253_p1, %p8252_p0 }
  0x64   :  { %p8255_p3 = pnand %p8254_p2, %p8248_p13 }
  0x66   :  { %8258 = shalt.err (!%p8255_p3)
}
  0x67   :  { %128 = dma.hbm_to_vmem [thread:$0]  %s9703_s8, 16, %s126_s30, [#allocation15]  }
  0x68   :  { %s8259_s5 = scalar_lea.hbm %s9705_s10, 16 }
  0x69   :  { %p8260_p4 = scmp.ne.s32.totalorder %s9705_s10, %s8259_s5  ;;  %p8263_p5 = scmp.lt.u32.totalorder %s8259_s5, %s9705_s10 }
  0x6b   :  { %p8265_p6 = pnand %p8263_p5, %p8260_p4 }
  0x6d   :  { %8268 = shalt.err (!%p8265_p6)
}
  0x6e   :  { %s8269_s25 = scalar_lea.vmem %s146_s3, 16  ;;  %s8273_s26 = scalar_lea.vmem %s146_s3, 32 }
  0x6f   :  { %p8270_p7 = scmp.ne.s32.totalorder %s146_s3, %s8269_s25  ;;  %p8274_p8 = scmp.lt.s32.totalorder %s146_s3, %s146_s3 }
  0x70   :  { %p8275_p9 = scmp.lt.s32.totalorder %s8273_s26, %s8269_s25 }
  0x72   :  { %p8276_p10 = por %p8275_p9, %p8274_p8 }
  0x74   :  { %p8277_p11 = pnand %p8276_p10, %p8270_p7 }
  0x76   :  { %8280 = shalt.err (!%p8277_p11)
}
  0x77   :  { %148 = dma.hbm_to_vmem [thread:$0]  %s9705_s10, 16, %s146_s3, [#allocation18]  }
  0x78   :  { %s8548_s2 = smov [#allocation20]   ;;  %s8549_s22 = smov [#allocation23]  }
  0x79   :  { %s168_s1 = sshll.u32 %s8548_s2, 4  ;;  %s194_s27 = sshll.u32 %s8549_s22, 4  ;;  %s169_s1 = int_to_ptr.vmem [resolvable:$true] %s168_s1  ;;  %s195_s27 = int_to_ptr.vmem [resolvable:$true] %s194_s27 }
  0x7a   :  { %s8281_s7 = scalar_lea.hbm %s9708_s13, 512 }
  0x7b   :  { %p8282_p12 = scmp.ne.s32.totalorder %s9708_s13, %s8281_s7  ;;  %p8285_p13 = scmp.lt.u32.totalorder %s8281_s7, %s9708_s13 }
  0x7d   :  { %p8287_p0 = pnand %p8285_p13, %p8282_p12 }
  0x7f   :  { %8290 = shalt.err (!%p8287_p0)
}
  0x80   :  { %s8291_s10 = scalar_lea.vmem %s169_s1, 512  ;;  %p8296_p2 = scmp.lt.s32.totalorder %s169_s1, %s169_s1 }
  0x81   :  { %p8292_p1 = scmp.ne.s32.totalorder %s169_s1, %s8291_s10  ;;  %p8297_p3 = scmp.lt.s32.totalorder %s8291_s10, %s8291_s10 }
  0x83   :  { %p8298_p4 = por %p8297_p3, %p8296_p2 }
  0x85   :  { %p8299_p5 = pnand %p8298_p4, %p8292_p1 }
  0x87   :  { %8302 = shalt.err (!%p8299_p5)
}
  0x88   :  { %174 = dma.hbm_to_vmem [thread:$0]  %s9708_s13, 512, %s169_s1, [#allocation21], %s8542_s28, %s8542_s28, %s8543_s29  }
  0x89   :  { %s8303_s8 = scalar_lea.hbm %s9711_s16, 512 }
  0x8a   :  { %p8304_p6 = scmp.ne.s32.totalorder %s9711_s16, %s8303_s8  ;;  %p8307_p7 = scmp.lt.u32.totalorder %s8303_s8, %s9711_s16 }
  0x8c   :  { %p8309_p8 = pnand %p8307_p7, %p8304_p6 }
  0x8e   :  { %8312 = shalt.err (!%p8309_p8)
}
  0x8f   :  { %s8313_s6 = scalar_lea.vmem %s195_s27, 512  ;;  %p8318_p10 = scmp.lt.s32.totalorder %s195_s27, %s195_s27 }
  0x90   :  { %p8314_p9 = scmp.ne.s32.totalorder %s195_s27, %s8313_s6  ;;  %p8319_p11 = scmp.lt.s32.totalorder %s8313_s6, %s8313_s6 }
  0x92   :  { %p8320_p12 = por %p8319_p11, %p8318_p10 }
  0x94   :  { %p8321_p13 = pnand %p8320_p12, %p8314_p9 }
  0x96   :  { %8324 = shalt.err (!%p8321_p13)
}
  0x97   :  { %200 = dma.hbm_to_vmem [thread:$0]  %s9711_s16, 512, %s195_s27, [#allocation24], %s8542_s28, %s8542_s28, %s8543_s29  }
  0x98   :  { %s8550_s7 = smov [#allocation2]   ;;  %s8551_s23 = smov [#allocation7]  }
  0x99   :  { %s43_s5 = sshll.u32 %s8550_s7, 4  ;;  %s64_s21 = sshll.u32 %s8551_s23, 4  ;;  %s44_s5 = int_to_ptr.vmem [resolvable:$true] %s43_s5  ;;  %s65_s21 = int_to_ptr.vmem [resolvable:$true] %s64_s21 }
  0x9a   :  { %s9743_s3 = sld [smem:[#allocation36_spill]] }
  0xa0   :  { %s8325_s4 = scalar_lea.hbm %s9743_s3, 128 }
  0xa1   :  { %p8326_p0 = scmp.ne.s32.totalorder %s9743_s3, %s8325_s4  ;;  %p8329_p1 = scmp.lt.u32.totalorder %s8325_s4, %s9743_s3 }
  0xa3   :  { %p8331_p2 = pnand %p8329_p1, %p8326_p0 }
  0xa5   :  { %8334 = shalt.err (!%p8331_p2)
}
  0xa6   :  { %s8335_s16 = scalar_lea.vmem %s44_s5, 128  ;;  %p8340_p4 = scmp.lt.s32.totalorder %s44_s5, %s44_s5 }
  0xa7   :  { %p8336_p3 = scmp.ne.s32.totalorder %s44_s5, %s8335_s16  ;;  %p8341_p5 = scmp.lt.s32.totalorder %s8335_s16, %s8335_s16 }
  0xa9   :  { %p8342_p6 = por %p8341_p5, %p8340_p4 }
  0xab   :  { %p8343_p7 = pnand %p8342_p6, %p8336_p3 }
  0xad   :  { %8346 = shalt.err (!%p8343_p7)
}
  0xae   :  { %46 = dma.hbm_to_vmem [thread:$0]  %s9743_s3, 128, %s44_s5, [#allocation3]  }
  0xaf   :  { %s9744_s6 = sld [smem:[#allocation38_spill]] }
  0xb5   :  { %s8347_s13 = scalar_lea.hbm %s9744_s6, 256 }
  0xb6   :  { %p8348_p8 = scmp.ne.s32.totalorder %s9744_s6, %s8347_s13  ;;  %p8351_p9 = scmp.lt.u32.totalorder %s8347_s13, %s9744_s6 }
  0xb8   :  { %p8353_p10 = pnand %p8351_p9, %p8348_p8 }
  0xba   :  { %8356 = shalt.err (!%p8353_p10)
}
  0xbb   :  { %s8357_s10 = scalar_lea.vmem %s65_s21, 256  ;;  %p8362_p12 = scmp.lt.s32.totalorder %s65_s21, %s65_s21 }
  0xbc   :  { %p8358_p11 = scmp.ne.s32.totalorder %s65_s21, %s8357_s10  ;;  %p8363_p13 = scmp.lt.s32.totalorder %s8357_s10, %s8357_s10 }
  0xbe   :  { %p8364_p0 = por %p8363_p13, %p8362_p12 }
  0xc0   :  { %p8365_p1 = pnand %p8364_p0, %p8358_p11 }
  0xc2   :  { %8368 = shalt.err (!%p8365_p1)
}
  0xc3   :  { %70 = dma.hbm_to_vmem [thread:$0]  %s9744_s6, 256, %s65_s21, [#allocation6], %s8542_s28, %s8542_s28, %s8543_s29  }
  0xc4   :  { %s8552_s4 = smov [#allocation10]   ;;  %s8553_s26 = smov [#allocation13]  }
  0xc5   :  { %s90_s25 = sshll.u32 %s8552_s4, 4  ;;  %s115_s8 = sshll.u32 %s8553_s26, 4  ;;  %s91_s25 = int_to_ptr.vmem [resolvable:$true] %s90_s25  ;;  %s116_s8 = int_to_ptr.vmem [resolvable:$true] %s115_s8 }
  0xc6   :  { %s9745_s27 = sld [smem:[#allocation41_spill]] }
  0xcc   :  { %s8369_s2 = scalar_lea.hbm %s9745_s27, 512 }
  0xcd   :  { %p8370_p2 = scmp.ne.s32.totalorder %s9745_s27, %s8369_s2  ;;  %p8373_p3 = scmp.lt.u32.totalorder %s8369_s2, %s9745_s27 }
  0xcf   :  { %p8375_p4 = pnand %p8373_p3, %p8370_p2 }
  0xd1   :  { %8378 = shalt.err (!%p8375_p4)
}
  0xd2   :  { %s8379_s21 = scalar_lea.vmem %s91_s25, 512  ;;  %p8384_p6 = scmp.lt.s32.totalorder %s91_s25, %s91_s25 }
  0xd3   :  { %p8380_p5 = scmp.ne.s32.totalorder %s91_s25, %s8379_s21  ;;  %p8385_p7 = scmp.lt.s32.totalorder %s8379_s21, %s8379_s21 }
  0xd5   :  { %p8386_p8 = por %p8385_p7, %p8384_p6 }
  0xd7   :  { %p8387_p9 = pnand %p8386_p8, %p8380_p5 }
  0xd9   :  { %8390 = shalt.err (!%p8387_p9)
}
  0xda   :  { %96 = dma.hbm_to_vmem [thread:$0]  %s9745_s27, 512, %s91_s25, [#allocation9], %s8542_s28, %s8542_s28, %s8543_s29  }
  0xdb   :  { %s9746_s10 = sld [smem:[#allocation43_spill]] }
  0xe1   :  { %s8391_s5 = scalar_lea.hbm %s9746_s10, 16 }
  0xe2   :  { %p8392_p10 = scmp.ne.s32.totalorder %s9746_s10, %s8391_s5  ;;  %p8395_p11 = scmp.lt.u32.totalorder %s8391_s5, %s9746_s10 }
  0xe4   :  { %p8397_p12 = pnand %p8395_p11, %p8392_p10 }
  0xe6   :  { %8400 = shalt.err (!%p8397_p12)
}
  0xe7   :  { %s8401_s16 = scalar_lea.vmem %s116_s8, 16  ;;  %s8405_s2 = scalar_lea.vmem %s116_s8, 32 }
  0xe8   :  { %p8402_p13 = scmp.ne.s32.totalorder %s116_s8, %s8401_s16  ;;  %p8406_p0 = scmp.lt.s32.totalorder %s116_s8, %s116_s8 }
  0xe9   :  { %p8407_p1 = scmp.lt.s32.totalorder %s8405_s2, %s8401_s16 }
  0xeb   :  { %p8408_p2 = por %p8407_p1, %p8406_p0 }
  0xed   :  { %p8409_p3 = pnand %p8408_p2, %p8402_p13 }
  0xef   :  { %8412 = shalt.err (!%p8409_p3)
}
  0xf0   :  { %118 = dma.hbm_to_vmem [thread:$0]  %s9746_s10, 16, %s116_s8, [#allocation12]  }
  0xf1   :  { %s8554_s22 = smov [#allocation16]   ;;  %s8555_s13 = smov [#allocation19]  }
  0xf2   :  { %s135_s24 = sshll.u32 %s8554_s22, 4  ;;  %s156_s1 = sshll.u32 %s8555_s13, 4  ;;  %s136_s24 = int_to_ptr.vmem [resolvable:$true] %s135_s24  ;;  %s157_s1 = int_to_ptr.vmem [resolvable:$true] %s156_s1 }
  0xf3   :  { %s8413_s7 = scalar_lea.hbm %s9704_s9, 16 }
  0xf4   :  { %p8414_p4 = scmp.ne.s32.totalorder %s9704_s9, %s8413_s7  ;;  %p8417_p5 = scmp.lt.u32.totalorder %s8413_s7, %s9704_s9 }
  0xf6   :  { %p8419_p6 = pnand %p8417_p5, %p8414_p4 }
  0xf8   :  { %8422 = shalt.err (!%p8419_p6)
}
  0xf9   :  { %s8423_s8 = scalar_lea.vmem %s136_s24, 16  ;;  %s8427_s10 = scalar_lea.vmem %s136_s24, 32 }
  0xfa   :  { %p8424_p7 = scmp.ne.s32.totalorder %s136_s24, %s8423_s8  ;;  %p8428_p8 = scmp.lt.s32.totalorder %s136_s24, %s136_s24 }
  0xfb   :  { %p8429_p9 = scmp.lt.s32.totalorder %s8427_s10, %s8423_s8 }
  0xfd   :  { %p8430_p10 = por %p8429_p9, %p8428_p8 }
  0xff   :  { %p8431_p11 = pnand %p8430_p10, %p8424_p7 }
 0x101   :  { %8434 = shalt.err (!%p8431_p11)
}
 0x102   :  { %138 = dma.hbm_to_vmem [thread:$0]  %s9704_s9, 16, %s136_s24, [#allocation15]  }
 0x103   :  { %s8435_s2 = scalar_lea.hbm %s9707_s12, 512 }
 0x104   :  { %p8436_p12 = scmp.ne.s32.totalorder %s9707_s12, %s8435_s2  ;;  %p8439_p13 = scmp.lt.u32.totalorder %s8435_s2, %s9707_s12 }
 0x106   :  { %p8441_p0 = pnand %p8439_p13, %p8436_p12 }
 0x108   :  { %8444 = shalt.err (!%p8441_p0)
}
 0x109   :  { %s8445_s21 = scalar_lea.vmem %s157_s1, 512  ;;  %p8450_p2 = scmp.lt.s32.totalorder %s157_s1, %s157_s1 }
 0x10a   :  { %p8446_p1 = scmp.ne.s32.totalorder %s157_s1, %s8445_s21  ;;  %p8451_p3 = scmp.lt.s32.totalorder %s8445_s21, %s8445_s21 }
 0x10c   :  { %p8452_p4 = por %p8451_p3, %p8450_p2 }
 0x10e   :  { %p8453_p5 = pnand %p8452_p4, %p8446_p1 }
 0x110   :  { %8456 = shalt.err (!%p8453_p5)
}
 0x111   :  { %162 = dma.hbm_to_vmem [thread:$0]  %s9707_s12, 512, %s157_s1, [#allocation18], %s8542_s28, %s8542_s28, %s8543_s29  }
 0x112   :  { %s8556_s6 = smov [#allocation22]   ;;  %s8557_s23 = smov [#allocation25]  }
 0x113   :  { %s180_s7 = sshll.u32 %s8556_s6, 4  ;;  %s207_s0 = sshll.u32 %s8557_s23, 4  ;;  %s181_s7 = int_to_ptr.vmem [resolvable:$true] %s180_s7  ;;  %s208_s0 = int_to_ptr.vmem [resolvable:$true] %s207_s0 }
 0x114   :  { %s8457_s8 = scalar_lea.hbm %s9709_s14, 512 }
 0x115   :  { %p8458_p6 = scmp.ne.s32.totalorder %s9709_s14, %s8457_s8  ;;  %p8461_p7 = scmp.lt.u32.totalorder %s8457_s8, %s9709_s14 }
 0x117   :  { %p8463_p8 = pnand %p8461_p7, %p8458_p6 }
 0x119   :  { %8466 = shalt.err (!%p8463_p8)
}
 0x11a   :  { %s8467_s12 = scalar_lea.vmem %s181_s7, 512  ;;  %p8472_p10 = scmp.lt.s32.totalorder %s181_s7, %s181_s7 }
 0x11b   :  { %p8468_p9 = scmp.ne.s32.totalorder %s181_s7, %s8467_s12  ;;  %p8473_p11 = scmp.lt.s32.totalorder %s8467_s12, %s8467_s12 }
 0x11d   :  { %p8474_p12 = por %p8473_p11, %p8472_p10 }
 0x11f   :  { %p8475_p13 = pnand %p8474_p12, %p8468_p9 }
 0x121   :  { %8478 = shalt.err (!%p8475_p13)
}
 0x122   :  { %186 = dma.hbm_to_vmem [thread:$0]  %s9709_s14, 512, %s181_s7, [#allocation21], %s8542_s28, %s8542_s28, %s8543_s29  }
 0x123   :  { %s8479_s27 = scalar_lea.hbm %s9712_s17, 16 }
 0x124   :  { %p8480_p0 = scmp.ne.s32.totalorder %s9712_s17, %s8479_s27  ;;  %p8483_p1 = scmp.lt.u32.totalorder %s8479_s27, %s9712_s17 }
 0x126   :  { %p8485_p2 = pnand %p8483_p1, %p8480_p0 }
 0x128   :  { %8488 = shalt.err (!%p8485_p2)
}
 0x129   :  { %s8489_s24 = scalar_lea.vmem %s208_s0, 16  ;;  %s8493_s6 = scalar_lea.vmem %s208_s0, 32 }
 0x12a   :  { %p8490_p3 = scmp.ne.s32.totalorder %s208_s0, %s8489_s24  ;;  %p8494_p4 = scmp.lt.s32.totalorder %s208_s0, %s208_s0 }
 0x12b   :  { %p8495_p5 = scmp.lt.s32.totalorder %s8493_s6, %s8489_s24 }
 0x12d   :  { %p8496_p6 = por %p8495_p5, %p8494_p4 }
 0x12f   :  { %p8497_p7 = pnand %p8496_p6, %p8490_p3 }
 0x131   :  { %8500 = shalt.err (!%p8497_p7)
}
 0x132   :  { %210 = dma.hbm_to_vmem [thread:$0]  %s9712_s17, 16, %s208_s0, [#allocation24]  }
 0x133   :  { %8523 = dma.done.wait [#allocation3], 128  }
 0x134   :  { %8524 = vsyncadd [#allocation3], 4294967168 }
 0x135   :  { %8525 = dma.done.wait [#allocation6], 512  }
 0x136   :  { %8526 = vsyncadd [#allocation6], 4294966784 }
 0x137   :  { %8527 = dma.done.wait [#allocation9], 768  }
 0x138   :  { %8528 = vsyncadd [#allocation9], 4294966528 }
 0x139   :  { %8529 = dma.done.wait [#allocation12], 528  }
 0x13a   :  { %8530 = vsyncadd [#allocation12], 4294966768 }
 0x13b   :  { %8531 = dma.done.wait [#allocation15], 32  }
 0x13c   :  { %8532 = vsyncadd [#allocation15], 4294967264 }
 0x13d   :  { %8533 = dma.done.wait [#allocation18], 528  }
 0x13e   :  { %8534 = vsyncadd [#allocation18], 4294966768 }
 0x13f   :  { %8535 = dma.done.wait [#allocation21], 1024  }
 0x140   :  { %8536 = vsyncadd [#allocation21], 4294966272 }
 0x141   :  { %8537 = dma.done.wait [#allocation24], 528  }
 0x142   :  { %8538 = vsyncadd [#allocation24], 4294966768  ;;  %v8558_v0 = vmov 0.0|0.0   ;;  %vm8559_vm0 = vmmov 0   ;;  %v8560_v1 = vmov 0.0   ;;  %v266_v2 = vld [vmem:[#allocation5] sm:$0xff] }
 0x143   :  { %7486 = vmatprep.subr.bf16.mxu0 %v8558_v0  ;;  %7489 = vmatprep.subr.bf16.mxu1 %v8558_v0  ;;  %v267_v3 = vld [vmem:[#allocation5 + $0x8] sm:$0xff]  ;;  %v268_v4 = vld [vmem:[#allocation7] sm:$0xff]  ;;  %v269_v6 = vld [vmem:[#allocation7 + $0x8] sm:$0xff]  ;;  %s9747_s7 = sld [smem:[#allocation40_spill]]  ;;  %vm323_vm1 = vcmask 130048   ;;  %vm549_vm2 = vcmask 261120  }
 0x144   :  { %6673 = vmatprep.mubr.msk.f32.mxu1 %vm8559_vm0, %v8560_v1  ;;  %6666 = vmatprep.mubr.msk.f32.mxu0 %vm8559_vm0, %v8560_v1  ;;  %v7487_v5 = vpack.c.bf16 %v267_v3, %v266_v2  ;;  %v270_v7 = vld [vmem:[#allocation8] sm:$0xff]  ;;  %v7490_v8 = vpack.c.bf16 %v269_v6, %v268_v4  ;;  %v271_v9 = vld [vmem:[#allocation8 + $0x8] sm:$0xff]  ;;  %v316_v12 = vld [vmem:[#allocation2] sm:$0xff]  ;;  %s9748_s10 = sld [smem:[#allocation44_spill]]  ;;  %vm6148_vm3 = vcmask 57344   ;;  %s8561_s27 = smov [#allocation26]  }
 0x145   :  { %v7493_v13 = vpack.c.bf16 %v271_v9, %v270_v7  ;;  %v276_v15 = vld [vmem:[#allocation10] sm:$0xff]  ;;  %v277_v16 = vld [vmem:[#allocation10 + $0x8] sm:$0xff]  ;;  %v278_v21 = vld [vmem:[#allocation10 + $0x10] sm:$0xff]  ;;  %s6167_s22 = sshll.u32 %s8561_s27, 4  ;;  %s6168_s22 = int_to_ptr.vmem [resolvable:$true] %s6167_s22 }
 0x146   :  { %7488 = vmatpush3.bf16.msra.mxu0 %v7487_v5  ;;  %7491 = vmatpush3.bf16.msra.mxu1 %v7490_v8  ;;  %v8913_v19 = vpack.c.bf16 %v277_v16, %v276_v15  ;;  %v279_v22 = vld [vmem:[#allocation10 + $0x18] sm:$0xff]  ;;  %v280_v23 = vld [vmem:[#allocation11] sm:$0xff]  ;;  %v281_v24 = vld [vmem:[#allocation11 + $0x8] sm:$0xff]  ;;  %s8501_s13 = scalar_lea.vmem %s6168_s22, 16  ;;  %s8505_s21 = scalar_lea.vmem %s6168_s22, 32 }
 0x147   :  { %7492 = vmatprep.subr.bf16.mxu0 %v8558_v0  ;;  %7495 = vmatprep.subr.bf16.mxu1 %v8558_v0  ;;  %v8926_v25 = vpack.c.bf16 %v279_v22, %v278_v21  ;;  %v8932_v26 = vpack.c.bf16 %v281_v24, %v280_v23  ;;  %v282_v27 = vld [vmem:[#allocation11 + $0x10] sm:$0xff]  ;;  %v283_v28 = vld [vmem:[#allocation11 + $0x18] sm:$0xff]  ;;  %v288_v30 = vld [vmem:[%s9706_s11] sm:$0xff]  ;;  %p8502_p8 = scmp.ne.s32.totalorder %s6168_s22, %s8501_s13  ;;  %p8506_p9 = scmp.lt.s32.totalorder %s6168_s22, %s6168_s22 }
 0x148   :  { %v8938_v29 = vpack.c.bf16 %v283_v28, %v282_v27  ;;  %v289_v31 = vld [vmem:[%s9706_s11 + $0x8] sm:$0xff]  ;;  %v292_v32 = vld [vmem:[#allocation19] sm:$0xff]  ;;  %v290_v36 = vld [vmem:[%s9706_s11 + $0x10] sm:$0xff]  ;;  %p8507_p10 = scmp.lt.s32.totalorder %s8505_s21, %s8501_s13 }
 0x149   :  { %v272_v10 = vld [vmem:[%s9747_s7] sm:$0xff]  ;;  %v273_v11 = vld [vmem:[%s9747_s7 + $0x8] sm:$0xff]  ;;  %v274_v17 = vld [vmem:[%s9747_s7 + $0x10] sm:$0xff]  ;;  %6667 = vmatmul.mubr.msk.f32.vlgmr.msra.gmra.mrb[0].mxu0 %vm323_vm1, %v316_v12  ;;  %6674 = vmatmul.mubr.msk.f32.vlgmr.msra.gmra.mrb[0].mxu1 %vm323_vm1, %v316_v12  ;;  %v8958_v33 = vpack.c.bf16 %v289_v31, %v288_v30 }
 0x14a   :  { %v8902_v14 = vpack.c.bf16 %v273_v11, %v272_v10  ;;  %v275_v18 = vld [vmem:[%s9747_s7 + $0x18] sm:$0xff]  ;;  %7494 = vmatpush3.bf16.msra.mxu0 %v7493_v13  ;;  %6680 = vmatprep.mubr.msk.f32.mxu0 %vm8559_vm0, %v8560_v1  ;;  %v293_v34 = vld [vmem:[#allocation19 + $0x8] sm:$0xff]  ;;  %v294_v38 = vld [vmem:[#allocation19 + $0x10] sm:$0xff]  ;;  %p8508_p11 = por %p8507_p10, %p8506_p9 }
 0x14b   :  { %v8918_v20 = vpack.c.bf16 %v275_v18, %v274_v17  ;;  %7501 = vmatprep.subr.bf16.mxu0 %v8558_v0  ;;  %6691 = vmatprep.mubr.msk.f32.mxu1 %vm8559_vm0, %v8560_v1  ;;  %v8960_v35 = vpack.c.bf16 %v293_v34, %v292_v32  ;;  %v291_v37 = vld [vmem:[%s9706_s11 + $0x18] sm:$0xff]  ;;  %v297_v15 = vld [vmem:[#allocation20 + $0x8] sm:$0xff]  ;;  %v304_v16 = vld [vmem:[%s9710_s15] sm:$0xff]  ;;  %s9749_s11 = sld [smem:[#allocation45_spill]] }
 0x14c   :  { %7497 = vmatpush3.bf16.msra.mxu1 %v8902_v14  ;;  %v8972_v39 = vpack.c.bf16 %v291_v37, %v290_v36  ;;  %v295_v40 = vld [vmem:[#allocation19 + $0x18] sm:$0xff]  ;;  %v305_v17 = vld [vmem:[%s9710_s15 + $0x8] sm:$0xff]  ;;  %v298_v24 = vld [vmem:[#allocation20 + $0x10] sm:$0xff]  ;;  %p8509_p12 = pnand %p8508_p11, %p8502_p8 }
 0x14d   :  { %7498 = vmatprep.subr.bf16.mxu1 %v8558_v0  ;;  %6681 = vmatmul.mubr.msk.f32.vlgmr.msra.gmra.mrb[2].mxu0 %vm323_vm1, %v316_v12  ;;  %v8974_v41 = vpack.c.bf16 %v295_v40, %v294_v38  ;;  %v6183_v46 = vld [vmem:[#allocation13] ss:$0 sm:$0xff]  ;;  %v6185_v55 = vld [vmem:[#allocation14] ss:$0 sm:$0xff]  ;;  %v8986_v2 = vld [vmem:[#allocation17] sm:$0x1]  ;;  %v9000_v23 = vpack.c.bf16 %v305_v17, %v304_v16 }
 0x14e   :  { %7503 = vmatpush3.bf16.msra.mxu0 %v8913_v19  ;;  %6702 = vmatprep.mubr.msk.f32.mxu0 %vm8559_vm0, %v8560_v1  ;;  %v6187_v4 = vld [vmem:[#allocation16] ss:$0 sm:$0xff]  ;;  %v296_v12 = vld [vmem:[#allocation20] sm:$0xff]  ;;  %v306_v30 = vld [vmem:[%s9710_s15 + $0x10] sm:$0xff] }
 0x14f   :  { %7504 = vmatprep.subr.bf16.mxu0 %v8558_v0  ;;  %v8998_v22 = vpack.c.bf16 %v297_v15, %v296_v12  ;;  %v299_v28 = vld [vmem:[#allocation20 + $0x18] sm:$0xff]  ;;  %v300_v36 = vld [vmem:[#allocation22] sm:$0xff]  ;;  %v301_v37 = vld [vmem:[#allocation22 + $0x8] sm:$0xff] }
 0x150   :  { %7500 = vmatpush3.bf16.msra.mxu1 %v8918_v20  ;;  %v307_v31 = vld [vmem:[%s9710_s15 + $0x18] sm:$0xff]  ;;  %v9016_v32 = vpack.c.bf16 %v299_v28, %v298_v24  ;;  %v308_v38 = vld [vmem:[#allocation23] sm:$0xff]  ;;  %v309_v40 = vld [vmem:[#allocation23 + $0x8] sm:$0xff] }
 0x151   :  { %7507 = vmatprep.subr.bf16.mxu1 %v8558_v0  ;;  %v9018_v34 = vpack.c.bf16 %v307_v31, %v306_v30  ;;  %v9110_v30 = vld [vmem:[%s9714_s19] sm:$0x1] }
 0x152   :  { %7506 = vmatpush3.bf16.msra.mxu0 %v8926_v25 }
 0x153   :  { %6692 = vmatmul.mubr.f32.vlgmr.msra.gmra.mrb[2].mxu1 %v8560_v1  ;;  %7513 = vmatprep.subr.bf16.mxu0 %v8558_v0 }
 0x154   :  { %7509 = vmatpush3.bf16.msra.mxu1 %v8932_v26  ;;  %6713 = vmatprep.mubr.msk.f32.mxu1 %vm8559_vm0, %v8560_v1 }
 0x155   :  { %7510 = vmatprep.subr.bf16.mxu1 %v8558_v0  ;;  %6703 = vmatmul.mubr.f32.vlgmr.msra.gmra.mrb[4].mxu0 %v8560_v1 }
 0x156   :  { %6724 = vmatprep.mubr.msk.f32.mxu0 %vm8559_vm0, %v8560_v1  ;;  %7515 = vmatpush3.bf16.msra.mxu0 %v8958_v33 }
 0x157   :  { %7516 = vmatprep.subr.bf16.mxu0 %v8558_v0 }
 0x158   :  { %7512 = vmatpush3.bf16.msra.mxu1 %v8938_v29 }
 0x159   :  { %7519 = vmatprep.subr.bf16.mxu1 %v8558_v0 }
 0x15a   :  { %7518 = vmatpush3.bf16.msra.mxu0 %v8972_v39 }
 0x15b   :  { %6714 = vmatmul.mubr.f32.vlgmr.msra.gmra.mrb[4].mxu1 %v8560_v1  ;;  %7525 = vmatprep.subr.bf16.mxu0 %v8558_v0 }
 0x15c   :  { %6735 = vmatprep.mubr.msk.f32.mxu1 %vm8559_vm0, %v8560_v1  ;;  %7521 = vmatpush3.bf16.msra.mxu1 %v8960_v35 }
 0x15d   :  { %7522 = vmatprep.subr.bf16.mxu1 %v8558_v0 }
 0x160   :  { %7524 = vmatpush3.bf16.msra.mxu1 %v8974_v41 }
 0x161   :  { %7537 = vmatprep.subr.bf16.mxu1 %v8558_v0 }
 0x21c   :  { %v393_v42 = vpop.f32.mrb[0].mxu0  ;;  %v469_v43 = vpop.f32.mrb[0].mxu1 }
 0x21d   :  { %v6668_v44 = vpop.f32.mrb[1].mxu0  ;;  %v6675_v45 = vpop.f32.mrb[1].mxu1  ;;  %v8980_v49 = vadd.f32 %v6183_v46, %v393_v42  ;;  %v8983_v57 = vadd.f32 %v6185_v55, %v469_v43  ;;  %v9028_v42 = vpack.c.bf16 %v301_v37, %v300_v36  ;;  %v9030_v43 = vpack.c.bf16 %v309_v40, %v308_v38  ;;  %v310_v46 = vld [vmem:[#allocation23 + $0x10] sm:$0xff]  ;;  %v9091_v55 = vld [vmem:[#allocation25] sm:$0x1] }
 0x21e   :  { %v302_v44 = vld [vmem:[#allocation22 + $0x10] sm:$0xff]  ;;  %v303_v45 = vld [vmem:[#allocation22 + $0x18] sm:$0xff] }
 0x220   :  { %v545_v47 = vpop.f32.mrb[2].mxu0 }
 0x221   :  { %v6682_v48 = vpop.f32.mrb[3].mxu0  ;;  %v8989_v7 = vadd.f32 %v6187_v4, %v545_v47  ;;  %v311_v47 = vld [vmem:[#allocation23 + $0x18] sm:$0xff] }
 0x222   :  { %v9039_v48 = vpack.c.bf16 %v303_v45, %v302_v44 }
 0x226   :  { %v619_v50 = vpop.f32.mrb[2].mxu1 }
 0x227   :  { %v693_v51 = vadd.f32 %v619_v50, %v8980_v49  ;;  %v6693_v52 = vpop.f32.mrb[3].mxu1  ;;  %v9041_v50 = vpack.c.bf16 %v311_v47, %v310_v46 }
 0x228   :  { %v689_v54 = vpop.f32.mrb[4].mxu0 }
 0x229   :  { %v6189_v53 = vmul.f32 -1.442695, %v693_v51  ;;  %v6704_v56 = vpop.f32.mrb[5].mxu0  ;;  %v700_v59 = vadd.f32 %v689_v54, %v8983_v57 }
 0x22b   :  { %8002 = vpow2.f32 %v6189_v53  ;;  %v6190_v61 = vmul.f32 -1.442695, %v700_v59 }
 0x22d   :  { %8004 = vpow2.f32 %v6190_v61 }
 0x22e   :  { %v773_v58 = vpop.f32.mrb[4].mxu1 }
 0x22f   :  { %v6715_v60 = vpop.f32.mrb[5].mxu1  ;;  %v774_v3 = vadd.f32 %v773_v58, %v8986_v2 }
 0x235   :  { %v8003_v62 = vpop.eup %8002 }
 0x236   :  { %v697_v63 = vadd.f32 1.0, %v8003_v62 }
 0x237   :  { %v8005_v5 = vpop.eup %8004 }
 0x238   :  { %8006 = vrcp.f32 %v697_v63  ;;  %v704_v9 = vadd.f32 1.0, %v8005_v5  ;;  %v9097_v63 = vld [vmem:[%s9713_s18] sm:$0x1] }
 0x242   :  { %v8007_v6 = vpop.eup %8006 }
 0x243   :  { %v777_v8 = vmul.f32 %v8007_v6, %v774_v3 }
 0x245   :  { %v778_v10 = vadd.f32 %v777_v8, %v8989_v7 }
 0x247   :  { %8008 = vtanh.f32 %v778_v10 }
 0x248   :  { %8010 = vrcp.f32 %v704_v9 }
 0x251   :  { %v8009_v11 = vpop.eup %8008 }
 0x252   :  { %v780_v13 = vsub.f32 0.0, %v8009_v11  ;;  %v8011_v18 = vpop.eup %8010 }
 0x254   :  { %v781_v21 = vmul.f32 %v8011_v18, %v780_v13 }
 0x256   :  { %v9002_v27 = vadd.f32 %v8009_v11, %v781_v21  ;;  %v9104_v21 = vld [vmem:[%s9715_s20] sm:$0x1] }
 0x258   :  { %6725 = vmatmul.mubr.msk.f32.vlgmr.msra.gmra.mrb[6].mxu0 %vm549_vm2, %v9002_v27  ;;  %6736 = vmatmul.mubr.msk.f32.vlgmr.msra.gmra.mrb[6].mxu1 %vm549_vm2, %v9002_v27 }
 0x259   :  { %7527 = vmatpush3.bf16.msra.mxu0 %v8998_v22  ;;  %7539 = vmatpush3.bf16.msra.mxu1 %v9000_v23 }
 0x25a   :  { %7528 = vmatprep.subr.bf16.mxu0 %v8558_v0  ;;  %7540 = vmatprep.subr.bf16.mxu1 %v8558_v0 }
 0x25b   :  { %6746 = vmatprep.mubr.msk.f32.mxu0 %vm8559_vm0, %v8560_v1  ;;  %6768 = vmatprep.mubr.msk.f32.mxu1 %vm8559_vm0, %v8560_v1 }
 0x25d   :  { %7530 = vmatpush3.bf16.msra.mxu0 %v9016_v32  ;;  %7542 = vmatpush3.bf16.msra.mxu1 %v9018_v34 }
 0x25e   :  { %7531 = vmatprep.subr.bf16.mxu0 %v8558_v0  ;;  %7543 = vmatprep.subr.bf16.mxu1 %v8558_v0 }
 0x260   :  { %6747 = vmatmul.mubr.msk.f32.vlgmr.msra.gmra.mrb[8].mxu0 %vm549_vm2, %v9002_v27  ;;  %6769 = vmatmul.mubr.f32.vlgmr.msra.gmra.mrb[6].mxu1 %v8560_v1 }
 0x261   :  { %7533 = vmatpush3.bf16.msra.mxu0 %v9028_v42  ;;  %7545 = vmatpush3.bf16.msra.mxu1 %v9030_v43 }
 0x262   :  { %7534 = vmatprep.subr.bf16.mxu0 %v8558_v0  ;;  %7546 = vmatprep.subr.bf16.mxu1 %v8558_v0 }
 0x263   :  { %6757 = vmatprep.mubr.msk.f32.mxu0 %vm8559_vm0, %v8560_v1  ;;  %6779 = vmatprep.mubr.msk.f32.mxu1 %vm8559_vm0, %v8560_v1 }
 0x265   :  { %7536 = vmatpush3.bf16.msra.mxu0 %v9039_v48  ;;  %7548 = vmatpush3.bf16.msra.mxu1 %v9041_v50 }
 0x266   :  { %7549 = vmatprep.subr.bf16.mxu0 %v8558_v0  ;;  %7555 = vmatprep.subr.bf16.mxu1 %v8558_v0 }
 0x268   :  { %6758 = vmatmul.mubr.f32.vlgmr.msra.gmra.mrb[6].mxu0 %v8560_v1  ;;  %6780 = vmatmul.mubr.f32.vlgmr.msra.gmra.mrb[8].mxu1 %v8560_v1 }
 0x269   :  { %7551 = vmatpush3.bf16.msra.mxu0 %v8902_v14  ;;  %7557 = vmatpush3.bf16.msra.mxu1 %v8913_v19 }
 0x26a   :  { %7552 = vmatprep.subr.bf16.mxu0 %v8558_v0  ;;  %7558 = vmatprep.subr.bf16.mxu1 %v8558_v0 }
 0x26b   :  { %6790 = vmatprep.mubr.msk.f32.mxu0 %vm8559_vm0, %v8560_v1  ;;  %6801 = vmatprep.mubr.msk.f32.mxu1 %vm8559_vm0, %v8560_v1 }
 0x26d   :  { %7554 = vmatpush3.bf16.msra.mxu0 %v8918_v20  ;;  %7560 = vmatpush3.bf16.msra.mxu1 %v8926_v25 }
 0x26e   :  { %7561 = vmatprep.subr.bf16.mxu0 %v8558_v0  ;;  %7567 = vmatprep.subr.bf16.mxu1 %v8558_v0 }
 0x270   :  { %6791 = vmatmul.mubr.msk.f32.vlgmr.msra.gmra.mrb[10].mxu0 %vm549_vm2, %v9002_v27  ;;  %6802 = vmatmul.mubr.msk.f32.vlgmr.msra.gmra.mrb[10].mxu1 %vm549_vm2, %v9002_v27 }
 0x271   :  { %7563 = vmatpush3.bf16.msra.mxu0 %v8932_v26  ;;  %6812 = vmatprep.mubr.msk.f32.mxu0 %vm8559_vm0, %v8560_v1 }
 0x272   :  { %7564 = vmatprep.subr.bf16.mxu0 %v8558_v0  ;;  %7569 = vmatpush3.bf16.msra.mxu1 %v8958_v33 }
 0x273   :  { %7570 = vmatprep.subr.bf16.mxu1 %v8558_v0  ;;  %6823 = vmatprep.mubr.msk.f32.mxu1 %vm8559_vm0, %v8560_v1 }
 0x275   :  { %7566 = vmatpush3.bf16.msra.mxu0 %v8938_v29 }
 0x276   :  { %7573 = vmatprep.subr.bf16.mxu0 %v8558_v0  ;;  %7572 = vmatpush3.bf16.msra.mxu1 %v8972_v39 }
 0x277   :  { %7579 = vmatprep.subr.bf16.mxu1 %v8558_v0 }
 0x278   :  { %6813 = vmatmul.mubr.msk.f32.vlgmr.msra.gmra.mrb[12].mxu0 %vm549_vm2, %v9002_v27 }
 0x279   :  { %7575 = vmatpush3.bf16.msra.mxu0 %v8960_v35  ;;  %6834 = vmatprep.mubr.msk.f32.mxu0 %vm8559_vm0, %v8560_v1 }
 0x27a   :  { %7576 = vmatprep.subr.bf16.mxu0 %v8558_v0 }
 0x27d   :  { %7578 = vmatpush3.bf16.msra.mxu0 %v8974_v41 }
 0x27e   :  { %7591 = vmatprep.subr.bf16.mxu0 %v8558_v0 }
 0x333   :  { %v992_v51 = vpop.f32.mrb[8].mxu0  ;;  %v1132_v52 = vpop.f32.mrb[6].mxu1 }
 0x334   :  { %v6748_v53 = vpop.f32.mrb[9].mxu0  ;;  %v6770_v54 = vpop.f32.mrb[7].mxu1  ;;  %v7934_v5 = vadd.f32 %v1132_v52, %v9097_v63  ;;  %v993_v44 = vadd.f32 %v992_v51, %v9110_v30 }
 0x336   :  { %v6195_v11 = vmul.f32 -1.442695, %v7934_v5 }
 0x33b   :  { %v1062_v56 = vpop.f32.mrb[6].mxu0  ;;  %v1216_v58 = vpop.f32.mrb[8].mxu1 }
 0x33c   :  { %v7933_v59 = vadd.f32 %v1062_v56, %v9091_v55  ;;  %v6759_v60 = vpop.f32.mrb[7].mxu0  ;;  %v6781_v61 = vpop.f32.mrb[9].mxu1  ;;  %v1217_v37 = vadd.f32 %v1216_v58, %v9104_v21 }
 0x33e   :  { %v6194_v62 = vmul.f32 -1.442695, %v7933_v59 }
 0x340   :  { %8012 = vpow2.f32 %v6194_v62 }
 0x343   :  { %v1292_v3 = vpop.f32.mrb[10].mxu0  ;;  %v1362_v4 = vpop.f32.mrb[10].mxu1 }
 0x344   :  { %v1367_v6 = vrot.slane %v1292_v3, 7  ;;  %v6792_v8 = vpop.f32.mrb[11].mxu0  ;;  %v6803_v9 = vpop.f32.mrb[11].mxu1  ;;  %v1377_v18 = vrot.slane %v1362_v4, 7 }
 0x346   :  { %v1369_v10 = vadd.f32 %v1367_v6, %v8980_v49  ;;  %v1379_v24 = vadd.f32 %v1377_v18, %v8983_v57 }
 0x348   :  { %v6198_v12 = vmul.f32 -1.442695, %v1369_v10  ;;  %v6199_v40 = vmul.f32 -1.442695, %v1379_v24 }
 0x34a   :  { %v8013_v13 = vpop.eup %8012  ;;  %8014 = vpow2.f32 %v6198_v12 }
 0x34b   :  { %v1140_v15 = vadd.f32 1.0, %v8013_v13  ;;  %v1452_v16 = vpop.f32.mrb[12].mxu0  ;;  %8016 = vpow2.f32 %v6195_v11 }
 0x34c   :  { %v6814_v17 = vpop.f32.mrb[13].mxu0  ;;  %v1453_v52 = vadd.f32 %v1452_v16, %v8986_v2 }
 0x34d   :  { %8018 = vrcp.f32 %v1140_v15 }
 0x34e   :  { %v1457_v53 = vrot.slane %v1453_v52, 7 }
 0x354   :  { %v8015_v28 = vpop.eup %8014 }
 0x355   :  { %v1373_v31 = vadd.f32 1.0, %v8015_v28  ;;  %v8017_v36 = vpop.eup %8016 }
 0x356   :  { %v1147_v46 = vadd.f32 1.0, %v8017_v36 }
 0x357   :  { %v8019_v38 = vpop.eup %8018  ;;  %8020 = vrcp.f32 %v1373_v31 }
 0x358   :  { %v1220_v45 = vmul.f32 %v8019_v38, %v1217_v37  ;;  %8022 = vpow2.f32 %v6199_v40 }
 0x35a   :  { %v1221_v47 = vadd.f32 %v1220_v45, %v993_v44 }
 0x35c   :  { %8024 = vtanh.f32 %v1221_v47 }
 0x35d   :  { %8026 = vrcp.f32 %v1147_v46 }
 0x361   :  { %v8021_v54 = vpop.eup %8020 }
 0x362   :  { %v1459_v56 = vmul.f32 %v8021_v54, %v1457_v53  ;;  %v8023_v60 = vpop.eup %8022 }
 0x363   :  { %v1383_v3 = vadd.f32 1.0, %v8023_v60 }
 0x364   :  { %v1460_v59 = vadd.f32 %v1459_v56, %v8989_v7 }
 0x366   :  { %v8025_v58 = vpop.eup %8024  ;;  %8028 = vtanh.f32 %v1460_v59 }
 0x367   :  { %v1223_v61 = vsub.f32 0.0, %v8025_v58  ;;  %v8027_v62 = vpop.eup %8026  ;;  %8030 = vrcp.f32 %v1383_v3 }
 0x369   :  { %v1224_v51 = vmul.f32 %v8027_v62, %v1223_v61 }
 0x36b   :  { %v9116_v4 = vadd.f32 %v8025_v58, %v1224_v51 }
 0x370   :  { %v8029_v5 = vpop.eup %8028 }
 0x371   :  { %v1463_v6 = vrot.slane %v8029_v5, 1  ;;  %v8031_v10 = vpop.eup %8030 }
 0x373   :  { %v1465_v8 = vsub.f32 %v9002_v27, %v1463_v6 }
 0x375   :  { %v1467_v9 = vrot.slane %v1465_v8, 7 }
 0x377   :  { %v1469_v11 = vmul.f32 %v8031_v10, %v1467_v9 }
 0x379   :  { %v9119_v12 = vadd.f32 %v8029_v5, %v1469_v11 }
 0x37b   :  { %v1472_v13 = vrot.slane %v9119_v12, 1 }
 0x37d   :  { %6824 = vmatmul.mubr.msk.f32.vlgmr.msra.gmra.mrb[12].mxu1 %vm549_vm2, %v1472_v13  ;;  %6835 = vmatmul.mubr.msk.f32.vlgmr.msra.gmra.mrb[14].mxu0 %vm549_vm2, %v1472_v13 }
 0x37e   :  { %7581 = vmatpush3.bf16.msra.mxu1 %v8998_v22  ;;  %7593 = vmatpush3.bf16.msra.mxu0 %v9000_v23 }
 0x37f   :  { %7582 = vmatprep.subr.bf16.mxu1 %v8558_v0  ;;  %7594 = vmatprep.subr.bf16.mxu0 %v8558_v0 }
 0x380   :  { %6845 = vmatprep.mubr.msk.f32.mxu1 %vm8559_vm0, %v8560_v1  ;;  %6867 = vmatprep.mubr.msk.f32.mxu0 %vm8559_vm0, %v8560_v1 }
 0x382   :  { %7584 = vmatpush3.bf16.msra.mxu1 %v9016_v32  ;;  %7596 = vmatpush3.bf16.msra.mxu0 %v9018_v34 }
 0x383   :  { %7585 = vmatprep.subr.bf16.mxu1 %v8558_v0  ;;  %7597 = vmatprep.subr.bf16.mxu0 %v8558_v0 }
 0x385   :  { %6846 = vmatmul.mubr.msk.f32.vlgmr.msra.gmra.mrb[14].mxu1 %vm549_vm2, %v1472_v13  ;;  %6868 = vmatmul.mubr.msk.f32.vlgmr.msra.gmra.mrb[14].mxu0 %vm549_vm2, %v9116_v4 }
 0x386   :  { %7587 = vmatpush3.bf16.msra.mxu1 %v9028_v42  ;;  %7599 = vmatpush3.bf16.msra.mxu0 %v9030_v43 }
 0x387   :  { %7588 = vmatprep.subr.bf16.mxu1 %v8558_v0  ;;  %7600 = vmatprep.subr.bf16.mxu0 %v8558_v0 }
 0x388   :  { %6856 = vmatprep.mubr.msk.f32.mxu1 %vm8559_vm0, %v8560_v1  ;;  %6878 = vmatprep.mubr.msk.f32.mxu0 %vm8559_vm0, %v8560_v1 }
 0x38a   :  { %7590 = vmatpush3.bf16.msra.mxu1 %v9039_v48  ;;  %7602 = vmatpush3.bf16.msra.mxu0 %v9041_v50 }
 0x38b   :  { %7603 = vmatprep.subr.bf16.mxu1 %v8558_v0  ;;  %7609 = vmatprep.subr.bf16.mxu0 %v8558_v0 }
 0x38d   :  { %6857 = vmatmul.mubr.msk.f32.vlgmr.msra.gmra.mrb[12].mxu1 %vm549_vm2, %v9116_v4  ;;  %6879 = vmatmul.mubr.msk.f32.vlgmr.msra.gmra.mrb[16].mxu0 %vm549_vm2, %v9116_v4 }
 0x38e   :  { %7605 = vmatpush3.bf16.msra.mxu1 %v8902_v14  ;;  %7611 = vmatpush3.bf16.msra.mxu0 %v8913_v19 }
 0x38f   :  { %7606 = vmatprep.subr.bf16.mxu1 %v8558_v0  ;;  %7612 = vmatprep.subr.bf16.mxu0 %v8558_v0 }
 0x390   :  { %6889 = vmatprep.mubr.msk.f32.mxu1 %vm8559_vm0, %v8560_v1  ;;  %6900 = vmatprep.mubr.msk.f32.mxu0 %vm8559_vm0, %v8560_v1 }
 0x392   :  { %7608 = vmatpush3.bf16.msra.mxu1 %v8918_v20  ;;  %7614 = vmatpush3.bf16.msra.mxu0 %v8926_v25 }
 0x393   :  { %7615 = vmatprep.subr.bf16.mxu1 %v8558_v0  ;;  %7621 = vmatprep.subr.bf16.mxu0 %v8558_v0 }
 0x395   :  { %6890 = vmatmul.mubr.msk.f32.vlgmr.msra.gmra.mrb[16].mxu1 %vm549_vm2, %v1472_v13  ;;  %6901 = vmatmul.mubr.msk.f32.vlgmr.msra.gmra.mrb[18].mxu0 %vm549_vm2, %v1472_v13 }
 0x396   :  { %7617 = vmatpush3.bf16.msra.mxu1 %v8932_v26  ;;  %6911 = vmatprep.mubr.msk.f32.mxu1 %vm8559_vm0, %v8560_v1 }
 0x397   :  { %7618 = vmatprep.subr.bf16.mxu1 %v8558_v0  ;;  %7623 = vmatpush3.bf16.msra.mxu0 %v8958_v33 }
 0x398   :  { %7624 = vmatprep.subr.bf16.mxu0 %v8558_v0  ;;  %6922 = vmatprep.mubr.msk.f32.mxu0 %vm8559_vm0, %v8560_v1 }
 0x39a   :  { %7620 = vmatpush3.bf16.msra.mxu1 %v8938_v29 }
 0x39b   :  { %7627 = vmatprep.subr.bf16.mxu1 %v8558_v0  ;;  %7626 = vmatpush3.bf16.msra.mxu0 %v8972_v39 }
 0x39c   :  { %7633 = vmatprep.subr.bf16.mxu0 %v8558_v0 }
 0x39d   :  { %6912 = vmatmul.mubr.msk.f32.vlgmr.msra.gmra.mrb[18].mxu1 %vm549_vm2, %v1472_v13 }
 0x39e   :  { %7629 = vmatpush3.bf16.msra.mxu1 %v8960_v35  ;;  %6933 = vmatprep.mubr.msk.f32.mxu1 %vm8559_vm0, %v8560_v1 }
 0x39f   :  { %7630 = vmatprep.subr.bf16.mxu1 %v8558_v0 }
 0x3a2   :  { %7632 = vmatpush3.bf16.msra.mxu1 %v8974_v41 }
 0x3a3   :  { %7645 = vmatprep.subr.bf16.mxu1 %v8558_v0 }
 0x458   :  { %v1681_v27 = vpop.f32.mrb[14].mxu1  ;;  %v1824_v15 = vpop.f32.mrb[14].mxu0 }
 0x459   :  { %v6847_v16 = vpop.f32.mrb[15].mxu1  ;;  %v6869_v17 = vpop.f32.mrb[15].mxu0  ;;  %v7936_v44 = vadd.f32 %v1824_v15, %v9097_v63  ;;  %v1682_v10 = vadd.f32 %v1681_v27, %v9110_v30 }
 0x45b   :  { %v6207_v53 = vmul.f32 -1.442695, %v7936_v44 }
 0x460   :  { %v1754_v18 = vpop.f32.mrb[12].mxu1  ;;  %v1908_v24 = vpop.f32.mrb[16].mxu0 }
 0x461   :  { %v7935_v28 = vadd.f32 %v1754_v18, %v9091_v55  ;;  %v6858_v31 = vpop.f32.mrb[13].mxu1  ;;  %v6880_v36 = vpop.f32.mrb[17].mxu0  ;;  %v1909_v6 = vadd.f32 %v1908_v24, %v9104_v21 }
 0x463   :  { %v6206_v37 = vmul.f32 -1.442695, %v7935_v28 }
 0x465   :  { %8032 = vpow2.f32 %v6206_v37 }
 0x468   :  { %v1984_v38 = vpop.f32.mrb[16].mxu1  ;;  %v2054_v40 = vpop.f32.mrb[18].mxu0 }
 0x469   :  { %v2059_v45 = vrot.slane %v1984_v38, 6  ;;  %v6891_v46 = vpop.f32.mrb[17].mxu1  ;;  %v6902_v47 = vpop.f32.mrb[19].mxu0  ;;  %v2069_v61 = vrot.slane %v2054_v40, 6 }
 0x46b   :  { %v2061_v52 = vadd.f32 %v2059_v45, %v8980_v49  ;;  %v2071_v62 = vadd.f32 %v2069_v61, %v8983_v57 }
 0x46d   :  { %v6211_v54 = vmul.f32 -1.442695, %v2061_v52  ;;  %v6212_v9 = vmul.f32 -1.442695, %v2071_v62 }
 0x46f   :  { %v8033_v56 = vpop.eup %8032  ;;  %8034 = vpow2.f32 %v6211_v54 }
 0x470   :  { %v1832_v59 = vadd.f32 1.0, %v8033_v56  ;;  %v2144_v60 = vpop.f32.mrb[18].mxu1  ;;  %8036 = vpow2.f32 %v6207_v53 }
 0x471   :  { %v6913_v58 = vpop.f32.mrb[19].mxu1  ;;  %v2145_v16 = vadd.f32 %v2144_v60, %v8986_v2 }
 0x472   :  { %8038 = vrcp.f32 %v1832_v59 }
 0x473   :  { %v2149_v17 = vrot.slane %v2145_v16, 6 }
 0x479   :  { %v8035_v3 = vpop.eup %8034 }
 0x47a   :  { %v2065_v51 = vadd.f32 1.0, %v8035_v3  ;;  %v8037_v5 = vpop.eup %8036 }
 0x47b   :  { %v1839_v13 = vadd.f32 1.0, %v8037_v5 }
 0x47c   :  { %v8039_v8 = vpop.eup %8038  ;;  %8040 = vrcp.f32 %v2065_v51 }
 0x47d   :  { %v1912_v11 = vmul.f32 %v8039_v8, %v1909_v6  ;;  %8042 = vpow2.f32 %v6212_v9 }
 0x47f   :  { %v1913_v15 = vadd.f32 %v1912_v11, %v1682_v10 }
 0x481   :  { %8044 = vtanh.f32 %v1913_v15 }
 0x482   :  { %8046 = vrcp.f32 %v1839_v13 }
 0x486   :  { %v8041_v18 = vpop.eup %8040 }
 0x487   :  { %v2151_v28 = vmul.f32 %v8041_v18, %v2149_v17  ;;  %v8043_v36 = vpop.eup %8042 }
 0x488   :  { %v2075_v27 = vadd.f32 1.0, %v8043_v36 }
 0x489   :  { %v2152_v31 = vadd.f32 %v2151_v28, %v8989_v7 }
 0x48b   :  { %v8045_v24 = vpop.eup %8044  ;;  %8048 = vtanh.f32 %v2152_v31 }
 0x48c   :  { %v1915_v37 = vsub.f32 %v9116_v4, %v8045_v24  ;;  %v8047_v38 = vpop.eup %8046  ;;  %8050 = vrcp.f32 %v2075_v27 }
 0x48e   :  { %v1916_v40 = vmul.f32 %v8047_v38, %v1915_v37 }
 0x490   :  { %v9197_v44 = vadd.f32 %v8045_v24, %v1916_v40 }
 0x495   :  { %v8049_v45 = vpop.eup %8048 }
 0x496   :  { %v2155_v46 = vrot.slane %v8049_v45, 1  ;;  %v8051_v53 = vpop.eup %8050 }
 0x498   :  { %v2157_v47 = vsub.f32 %v9119_v12, %v2155_v46 }
 0x49a   :  { %v2159_v52 = vrot.slane %v2157_v47, 7 }
 0x49c   :  { %v2161_v54 = vmul.f32 %v8051_v53, %v2159_v52 }
 0x49e   :  { %v9200_v56 = vadd.f32 %v8049_v45, %v2161_v54 }
 0x4a0   :  { %v2164_v59 = vrot.slane %v9200_v56, 2 }
 0x4a2   :  { %6923 = vmatmul.mubr.msk.f32.vlgmr.msra.gmra.mrb[20].mxu0 %vm549_vm2, %v2164_v59  ;;  %6934 = vmatmul.mubr.msk.f32.vlgmr.msra.gmra.mrb[20].mxu1 %vm549_vm2, %v2164_v59 }
 0x4a3   :  { %7635 = vmatpush3.bf16.msra.mxu0 %v8998_v22  ;;  %7647 = vmatpush3.bf16.msra.mxu1 %v9000_v23 }
 0x4a4   :  { %7636 = vmatprep.subr.bf16.mxu0 %v8558_v0  ;;  %7648 = vmatprep.subr.bf16.mxu1 %v8558_v0 }
 0x4a5   :  { %6944 = vmatprep.mubr.msk.f32.mxu0 %vm8559_vm0, %v8560_v1  ;;  %6966 = vmatprep.mubr.msk.f32.mxu1 %vm8559_vm0, %v8560_v1 }
 0x4a7   :  { %7638 = vmatpush3.bf16.msra.mxu0 %v9016_v32  ;;  %7650 = vmatpush3.bf16.msra.mxu1 %v9018_v34 }
 0x4a8   :  { %7639 = vmatprep.subr.bf16.mxu0 %v8558_v0  ;;  %7651 = vmatprep.subr.bf16.mxu1 %v8558_v0 }
 0x4aa   :  { %6945 = vmatmul.mubr.msk.f32.vlgmr.msra.gmra.mrb[22].mxu0 %vm549_vm2, %v2164_v59  ;;  %6967 = vmatmul.mubr.msk.f32.vlgmr.msra.gmra.mrb[20].mxu1 %vm549_vm2, %v9197_v44 }
 0x4ab   :  { %7641 = vmatpush3.bf16.msra.mxu0 %v9028_v42  ;;  %7653 = vmatpush3.bf16.msra.mxu1 %v9030_v43 }
 0x4ac   :  { %7642 = vmatprep.subr.bf16.mxu0 %v8558_v0  ;;  %7654 = vmatprep.subr.bf16.mxu1 %v8558_v0 }
 0x4ad   :  { %6955 = vmatprep.mubr.msk.f32.mxu0 %vm8559_vm0, %v8560_v1  ;;  %6977 = vmatprep.mubr.msk.f32.mxu1 %vm8559_vm0, %v8560_v1 }
 0x4af   :  { %7644 = vmatpush3.bf16.msra.mxu0 %v9039_v48  ;;  %7656 = vmatpush3.bf16.msra.mxu1 %v9041_v50 }
 0x4b0   :  { %7657 = vmatprep.subr.bf16.mxu0 %v8558_v0  ;;  %7663 = vmatprep.subr.bf16.mxu1 %v8558_v0 }
 0x4b2   :  { %6956 = vmatmul.mubr.msk.f32.vlgmr.msra.gmra.mrb[20].mxu0 %vm549_vm2, %v9197_v44  ;;  %6978 = vmatmul.mubr.msk.f32.vlgmr.msra.gmra.mrb[22].mxu1 %vm549_vm2, %v9197_v44 }
 0x4b3   :  { %7659 = vmatpush3.bf16.msra.mxu0 %v8902_v14  ;;  %7665 = vmatpush3.bf16.msra.mxu1 %v8913_v19 }
 0x4b4   :  { %7660 = vmatprep.subr.bf16.mxu0 %v8558_v0  ;;  %7666 = vmatprep.subr.bf16.mxu1 %v8558_v0 }
 0x4b5   :  { %6988 = vmatprep.mubr.msk.f32.mxu0 %vm8559_vm0, %v8560_v1  ;;  %6999 = vmatprep.mubr.msk.f32.mxu1 %vm8559_vm0, %v8560_v1 }
 0x4b7   :  { %7662 = vmatpush3.bf16.msra.mxu0 %v8918_v20  ;;  %7668 = vmatpush3.bf16.msra.mxu1 %v8926_v25 }
 0x4b8   :  { %7669 = vmatprep.subr.bf16.mxu0 %v8558_v0  ;;  %7675 = vmatprep.subr.bf16.mxu1 %v8558_v0 }
 0x4ba   :  { %6989 = vmatmul.mubr.msk.f32.vlgmr.msra.gmra.mrb[24].mxu0 %vm549_vm2, %v2164_v59  ;;  %7000 = vmatmul.mubr.msk.f32.vlgmr.msra.gmra.mrb[24].mxu1 %vm549_vm2, %v2164_v59 }
 0x4bb   :  { %7671 = vmatpush3.bf16.msra.mxu0 %v8932_v26  ;;  %7010 = vmatprep.mubr.msk.f32.mxu0 %vm8559_vm0, %v8560_v1 }
 0x4bc   :  { %7672 = vmatprep.subr.bf16.mxu0 %v8558_v0  ;;  %7677 = vmatpush3.bf16.msra.mxu1 %v8958_v33 }
 0x4bd   :  { %7678 = vmatprep.subr.bf16.mxu1 %v8558_v0  ;;  %7021 = vmatprep.mubr.msk.f32.mxu1 %vm8559_vm0, %v8560_v1 }
 0x4bf   :  { %7674 = vmatpush3.bf16.msra.mxu0 %v8938_v29 }
 0x4c0   :  { %7681 = vmatprep.subr.bf16.mxu0 %v8558_v0  ;;  %7680 = vmatpush3.bf16.msra.mxu1 %v8972_v39 }
 0x4c1   :  { %7687 = vmatprep.subr.bf16.mxu1 %v8558_v0 }
 0x4c2   :  { %7011 = vmatmul.mubr.msk.f32.vlgmr.msra.gmra.mrb[26].mxu0 %vm549_vm2, %v2164_v59 }
 0x4c3   :  { %7683 = vmatpush3.bf16.msra.mxu0 %v8960_v35  ;;  %7032 = vmatprep.mubr.msk.f32.mxu0 %vm8559_vm0, %v8560_v1 }
 0x4c4   :  { %7684 = vmatprep.subr.bf16.mxu0 %v8558_v0 }
 0x4c7   :  { %7686 = vmatpush3.bf16.msra.mxu0 %v8974_v41 }
 0x4c8   :  { %7699 = vmatprep.subr.bf16.mxu0 %v8558_v0 }
 0x57d   :  { %v2373_v4 = vpop.f32.mrb[22].mxu0  ;;  %v2516_v12 = vpop.f32.mrb[20].mxu1 }
 0x57e   :  { %v6946_v60 = vpop.f32.mrb[23].mxu0  ;;  %v6968_v58 = vpop.f32.mrb[21].mxu1  ;;  %v7938_v10 = vadd.f32 %v2516_v12, %v9097_v63  ;;  %v2374_v53 = vadd.f32 %v2373_v4, %v9110_v30 }
 0x580   :  { %v6220_v17 = vmul.f32 -1.442695, %v7938_v10 }
 0x585   :  { %v2446_v61 = vpop.f32.mrb[20].mxu0  ;;  %v2600_v62 = vpop.f32.mrb[22].mxu1 }
 0x586   :  { %v7937_v3 = vadd.f32 %v2446_v61, %v9091_v55  ;;  %v6957_v51 = vpop.f32.mrb[21].mxu0  ;;  %v6979_v5 = vpop.f32.mrb[23].mxu1  ;;  %v2601_v46 = vadd.f32 %v2600_v62, %v9104_v21 }
 0x588   :  { %v6219_v6 = vmul.f32 -1.442695, %v7937_v3 }
 0x58a   :  { %8052 = vpow2.f32 %v6219_v6 }
 0x58d   :  { %v2676_v8 = vpop.f32.mrb[24].mxu0  ;;  %v2746_v9 = vpop.f32.mrb[24].mxu1 }
 0x58e   :  { %v2751_v11 = vrot.slane %v2676_v8, 5  ;;  %v6990_v13 = vpop.f32.mrb[25].mxu0  ;;  %v7001_v15 = vpop.f32.mrb[25].mxu1  ;;  %v2761_v37 = vrot.slane %v2746_v9, 5 }
 0x590   :  { %v2753_v16 = vadd.f32 %v2751_v11, %v8980_v49  ;;  %v2763_v38 = vadd.f32 %v2761_v37, %v8983_v57 }
 0x592   :  { %v6224_v18 = vmul.f32 -1.442695, %v2753_v16  ;;  %v6225_v52 = vmul.f32 -1.442695, %v2763_v38 }
 0x594   :  { %v8053_v28 = vpop.eup %8052  ;;  %8054 = vpow2.f32 %v6224_v18 }
 0x595   :  { %v2524_v31 = vadd.f32 1.0, %v8053_v28  ;;  %v2836_v36 = vpop.f32.mrb[26].mxu0  ;;  %8056 = vpow2.f32 %v6220_v17 }
 0x596   :  { %v7012_v24 = vpop.f32.mrb[27].mxu0  ;;  %v2837_v60 = vadd.f32 %v2836_v36, %v8986_v2 }
 0x597   :  { %8058 = vrcp.f32 %v2524_v31 }
 0x598   :  { %v2841_v58 = vrot.slane %v2837_v60, 5 }
 0x59e   :  { %v8055_v27 = vpop.eup %8054 }
 0x59f   :  { %v2757_v40 = vadd.f32 1.0, %v8055_v27  ;;  %v8057_v45 = vpop.eup %8056 }
 0x5a0   :  { %v2531_v59 = vadd.f32 1.0, %v8057_v45 }
 0x5a1   :  { %v8059_v47 = vpop.eup %8058  ;;  %8060 = vrcp.f32 %v2757_v40 }
 0x5a2   :  { %v2604_v54 = vmul.f32 %v8059_v47, %v2601_v46  ;;  %8062 = vpow2.f32 %v6225_v52 }
 0x5a4   :  { %v2605_v12 = vadd.f32 %v2604_v54, %v2374_v53 }
 0x5a6   :  { %8064 = vtanh.f32 %v2605_v12 }
 0x5a7   :  { %8066 = vrcp.f32 %v2531_v59 }
 0x5ab   :  { %v8061_v61 = vpop.eup %8060 }
 0x5ac   :  { %v2843_v3 = vmul.f32 %v8061_v61, %v2841_v58  ;;  %v8063_v5 = vpop.eup %8062 }
 0x5ad   :  { %v2767_v4 = vadd.f32 1.0, %v8063_v5 }
 0x5ae   :  { %v2844_v51 = vadd.f32 %v2843_v3, %v8989_v7 }
 0x5b0   :  { %v8065_v62 = vpop.eup %8064  ;;  %8068 = vtanh.f32 %v2844_v51 }
 0x5b1   :  { %v2607_v6 = vsub.f32 %v9197_v44, %v8065_v62  ;;  %v8067_v8 = vpop.eup %8066  ;;  %8070 = vrcp.f32 %v2767_v4 }
 0x5b3   :  { %v2608_v9 = vmul.f32 %v8067_v8, %v2607_v6 }
 0x5b5   :  { %v9278_v10 = vadd.f32 %v8065_v62, %v2608_v9 }
 0x5ba   :  { %v8069_v11 = vpop.eup %8068 }
 0x5bb   :  { %v2847_v13 = vrot.slane %v8069_v11, 1  ;;  %v8071_v17 = vpop.eup %8070 }
 0x5bd   :  { %v2849_v15 = vsub.f32 %v9200_v56, %v2847_v13 }
 0x5bf   :  { %v2851_v16 = vrot.slane %v2849_v15, 7 }
 0x5c1   :  { %v2853_v18 = vmul.f32 %v8071_v17, %v2851_v16 }
 0x5c3   :  { %v9281_v28 = vadd.f32 %v8069_v11, %v2853_v18 }
 0x5c5   :  { %v2856_v31 = vrot.slane %v9281_v28, 3 }
 0x5c7   :  { %7022 = vmatmul.mubr.msk.f32.vlgmr.msra.gmra.mrb[26].mxu1 %vm549_vm2, %v2856_v31  ;;  %7033 = vmatmul.mubr.msk.f32.vlgmr.msra.gmra.mrb[28].mxu0 %vm549_vm2, %v2856_v31 }
 0x5c8   :  { %7689 = vmatpush3.bf16.msra.mxu1 %v8998_v22  ;;  %7701 = vmatpush3.bf16.msra.mxu0 %v9000_v23 }
 0x5c9   :  { %7690 = vmatprep.subr.bf16.mxu1 %v8558_v0  ;;  %7702 = vmatprep.subr.bf16.mxu0 %v8558_v0 }
 0x5ca   :  { %7043 = vmatprep.mubr.msk.f32.mxu1 %vm8559_vm0, %v8560_v1  ;;  %7065 = vmatprep.mubr.msk.f32.mxu0 %vm8559_vm0, %v8560_v1 }
 0x5cc   :  { %7692 = vmatpush3.bf16.msra.mxu1 %v9016_v32  ;;  %7704 = vmatpush3.bf16.msra.mxu0 %v9018_v34 }
 0x5cd   :  { %7693 = vmatprep.subr.bf16.mxu1 %v8558_v0  ;;  %7705 = vmatprep.subr.bf16.mxu0 %v8558_v0 }
 0x5cf   :  { %7044 = vmatmul.mubr.msk.f32.vlgmr.msra.gmra.mrb[28].mxu1 %vm549_vm2, %v2856_v31  ;;  %7066 = vmatmul.mubr.msk.f32.vlgmr.msra.gmra.mrb[28].mxu0 %vm549_vm2, %v9278_v10 }
 0x5d0   :  { %7695 = vmatpush3.bf16.msra.mxu1 %v9028_v42  ;;  %7707 = vmatpush3.bf16.msra.mxu0 %v9030_v43 }
 0x5d1   :  { %7696 = vmatprep.subr.bf16.mxu1 %v8558_v0  ;;  %7708 = vmatprep.subr.bf16.mxu0 %v8558_v0 }
 0x5d2   :  { %7054 = vmatprep.mubr.msk.f32.mxu1 %vm8559_vm0, %v8560_v1  ;;  %7076 = vmatprep.mubr.msk.f32.mxu0 %vm8559_vm0, %v8560_v1 }
 0x5d4   :  { %7698 = vmatpush3.bf16.msra.mxu1 %v9039_v48  ;;  %7710 = vmatpush3.bf16.msra.mxu0 %v9041_v50 }
 0x5d5   :  { %7711 = vmatprep.subr.bf16.mxu1 %v8558_v0  ;;  %7717 = vmatprep.subr.bf16.mxu0 %v8558_v0 }
 0x5d7   :  { %7055 = vmatmul.mubr.msk.f32.vlgmr.msra.gmra.mrb[26].mxu1 %vm549_vm2, %v9278_v10  ;;  %7077 = vmatmul.mubr.msk.f32.vlgmr.msra.gmra.mrb[30].mxu0 %vm549_vm2, %v9278_v10 }
 0x5d8   :  { %7713 = vmatpush3.bf16.msra.mxu1 %v8902_v14  ;;  %7719 = vmatpush3.bf16.msra.mxu0 %v8913_v19 }
 0x5d9   :  { %7714 = vmatprep.subr.bf16.mxu1 %v8558_v0  ;;  %7720 = vmatprep.subr.bf16.mxu0 %v8558_v0 }
 0x5da   :  { %7087 = vmatprep.mubr.msk.f32.mxu1 %vm8559_vm0, %v8560_v1  ;;  %7098 = vmatprep.mubr.msk.f32.mxu0 %vm8559_vm0, %v8560_v1 }
 0x5dc   :  { %7716 = vmatpush3.bf16.msra.mxu1 %v8918_v20  ;;  %7722 = vmatpush3.bf16.msra.mxu0 %v8926_v25 }
 0x5dd   :  { %7723 = vmatprep.subr.bf16.mxu1 %v8558_v0  ;;  %7729 = vmatprep.subr.bf16.mxu0 %v8558_v0 }
 0x5df   :  { %7088 = vmatmul.mubr.msk.f32.vlgmr.msra.gmra.mrb[30].mxu1 %vm549_vm2, %v2856_v31  ;;  %7099 = vmatmul.mubr.msk.f32.vlgmr.msra.gmra.mrb[32].mxu0 %vm549_vm2, %v2856_v31 }
 0x5e0   :  { %7725 = vmatpush3.bf16.msra.mxu1 %v8932_v26  ;;  %7109 = vmatprep.mubr.msk.f32.mxu1 %vm8559_vm0, %v8560_v1 }
 0x5e1   :  { %7726 = vmatprep.subr.bf16.mxu1 %v8558_v0  ;;  %7731 = vmatpush3.bf16.msra.mxu0 %v8958_v33 }
 0x5e2   :  { %7732 = vmatprep.subr.bf16.mxu0 %v8558_v0  ;;  %7120 = vmatprep.mubr.msk.f32.mxu0 %vm8559_vm0, %v8560_v1 }
 0x5e4   :  { %7728 = vmatpush3.bf16.msra.mxu1 %v8938_v29 }
 0x5e5   :  { %7735 = vmatprep.subr.bf16.mxu1 %v8558_v0  ;;  %7734 = vmatpush3.bf16.msra.mxu0 %v8972_v39 }
 0x5e6   :  { %7741 = vmatprep.subr.bf16.mxu0 %v8558_v0 }
 0x5e7   :  { %7110 = vmatmul.mubr.msk.f32.vlgmr.msra.gmra.mrb[32].mxu1 %vm549_vm2, %v2856_v31 }
 0x5e8   :  { %7737 = vmatpush3.bf16.msra.mxu1 %v8960_v35  ;;  %7131 = vmatprep.mubr.msk.f32.mxu1 %vm8559_vm0, %v8560_v1 }
 0x5e9   :  { %7738 = vmatprep.subr.bf16.mxu1 %v8558_v0 }
 0x5ec   :  { %7740 = vmatpush3.bf16.msra.mxu1 %v8974_v41 }
 0x5ed   :  { %7753 = vmatprep.subr.bf16.mxu1 %v8558_v0 }
 0x6a2   :  { %v3065_v44 = vpop.f32.mrb[28].mxu1  ;;  %v3208_v56 = vpop.f32.mrb[28].mxu0 }
 0x6a3   :  { %v7045_v36 = vpop.f32.mrb[29].mxu1  ;;  %v7067_v24 = vpop.f32.mrb[29].mxu0  ;;  %v7940_v53 = vadd.f32 %v3208_v56, %v9097_v63  ;;  %v3066_v17 = vadd.f32 %v3065_v44, %v9110_v30 }
 0x6a5   :  { %v6233_v58 = vmul.f32 -1.442695, %v7940_v53 }
 0x6aa   :  { %v3138_v37 = vpop.f32.mrb[26].mxu1  ;;  %v3292_v38 = vpop.f32.mrb[30].mxu0 }
 0x6ab   :  { %v7939_v27 = vadd.f32 %v3138_v37, %v9091_v55  ;;  %v7056_v40 = vpop.f32.mrb[27].mxu1  ;;  %v7078_v45 = vpop.f32.mrb[31].mxu0  ;;  %v3293_v13 = vadd.f32 %v3292_v38, %v9104_v21 }
 0x6ad   :  { %v6232_v46 = vmul.f32 -1.442695, %v7939_v27 }
 0x6af   :  { %8072 = vpow2.f32 %v6232_v46 }
 0x6b2   :  { %v3368_v47 = vpop.f32.mrb[30].mxu1  ;;  %v3438_v52 = vpop.f32.mrb[32].mxu0 }
 0x6b3   :  { %v3443_v54 = vrot.slane %v3368_v47, 4  ;;  %v7089_v59 = vpop.f32.mrb[31].mxu1  ;;  %v7100_v12 = vpop.f32.mrb[33].mxu0  ;;  %v3453_v6 = vrot.slane %v3438_v52, 4 }
 0x6b5   :  { %v3445_v60 = vadd.f32 %v3443_v54, %v8980_v49  ;;  %v3455_v8 = vadd.f32 %v3453_v6, %v8983_v57 }
 0x6b7   :  { %v6237_v61 = vmul.f32 -1.442695, %v3445_v60  ;;  %v6238_v16 = vmul.f32 -1.442695, %v3455_v8 }
 0x6b9   :  { %v8073_v3 = vpop.eup %8072  ;;  %8074 = vpow2.f32 %v6237_v61 }
 0x6ba   :  { %v3216_v51 = vadd.f32 1.0, %v8073_v3  ;;  %v3528_v5 = vpop.f32.mrb[32].mxu1  ;;  %8076 = vpow2.f32 %v6233_v58 }
 0x6bb   :  { %v7111_v62 = vpop.f32.mrb[33].mxu1  ;;  %v3529_v36 = vadd.f32 %v3528_v5, %v8986_v2 }
 0x6bc   :  { %8078 = vrcp.f32 %v3216_v51 }
 0x6bd   :  { %v3533_v24 = vrot.slane %v3529_v36, 4 }
 0x6c3   :  { %v8075_v4 = vpop.eup %8074 }
 0x6c4   :  { %v3449_v9 = vadd.f32 1.0, %v8075_v4  ;;  %v8077_v11 = vpop.eup %8076 }
 0x6c5   :  { %v3223_v31 = vadd.f32 1.0, %v8077_v11 }
 0x6c6   :  { %v8079_v15 = vpop.eup %8078  ;;  %8080 = vrcp.f32 %v3449_v9 }
 0x6c7   :  { %v3296_v18 = vmul.f32 %v8079_v15, %v3293_v13  ;;  %8082 = vpow2.f32 %v6238_v16 }
 0x6c9   :  { %v3297_v56 = vadd.f32 %v3296_v18, %v3066_v17 }
 0x6cb   :  { %8084 = vtanh.f32 %v3297_v56 }
 0x6cc   :  { %8086 = vrcp.f32 %v3223_v31 }
 0x6d0   :  { %v8081_v37 = vpop.eup %8080 }
 0x6d1   :  { %v3535_v27 = vmul.f32 %v8081_v37, %v3533_v24  ;;  %v8083_v45 = vpop.eup %8082 }
 0x6d2   :  { %v3459_v44 = vadd.f32 1.0, %v8083_v45 }
 0x6d3   :  { %v3536_v40 = vadd.f32 %v3535_v27, %v8989_v7 }
 0x6d5   :  { %v8085_v38 = vpop.eup %8084  ;;  %8088 = vtanh.f32 %v3536_v40 }
 0x6d6   :  { %v3299_v46 = vsub.f32 %v9278_v10, %v8085_v38  ;;  %v8087_v47 = vpop.eup %8086  ;;  %8090 = vrcp.f32 %v3459_v44 }
 0x6d8   :  { %v3300_v52 = vmul.f32 %v8087_v47, %v3299_v46 }
 0x6da   :  { %v9359_v53 = vadd.f32 %v8085_v38, %v3300_v52 }
 0x6df   :  { %v8089_v54 = vpop.eup %8088 }
 0x6e0   :  { %v3539_v59 = vrot.slane %v8089_v54, 1  ;;  %v8091_v60 = vpop.eup %8090 }
 0x6e2   :  { %v3541_v2 = vsub.f32 %v9281_v28, %v3539_v59 }
 0x6e4   :  { %v3543_v12 = vrot.slane %v3541_v2, 7 }
 0x6e6   :  { %v3545_v58 = vmul.f32 %v8091_v60, %v3543_v12 }
 0x6e8   :  { %v9362_v61 = vadd.f32 %v8089_v54, %v3545_v58  ;;  %v9437_v58 = vld [vmem:[#allocation17] sm:$0x1] }
 0x6ea   :  { %v3548_v3 = vrot.slane %v9362_v61, 4 }
 0x6ec   :  { %7121 = vmatmul.mubr.msk.f32.vlgmr.msra.gmra.mrb[34].mxu0 %vm549_vm2, %v3548_v3  ;;  %7132 = vmatmul.mubr.msk.f32.vlgmr.msra.gmra.mrb[34].mxu1 %vm549_vm2, %v3548_v3 }
 0x6ed   :  { %7743 = vmatpush3.bf16.msra.mxu0 %v8998_v22  ;;  %7755 = vmatpush3.bf16.msra.mxu1 %v9000_v23 }
 0x6ee   :  { %7744 = vmatprep.subr.bf16.mxu0 %v8558_v0  ;;  %7756 = vmatprep.subr.bf16.mxu1 %v8558_v0 }
 0x6ef   :  { %7142 = vmatprep.mubr.msk.f32.mxu0 %vm8559_vm0, %v8560_v1  ;;  %7164 = vmatprep.mubr.msk.f32.mxu1 %vm8559_vm0, %v8560_v1 }
 0x6f1   :  { %7746 = vmatpush3.bf16.msra.mxu0 %v9016_v32  ;;  %7758 = vmatpush3.bf16.msra.mxu1 %v9018_v34 }
 0x6f2   :  { %7747 = vmatprep.subr.bf16.mxu0 %v8558_v0  ;;  %7759 = vmatprep.subr.bf16.mxu1 %v8558_v0 }
 0x6f4   :  { %7143 = vmatmul.mubr.msk.f32.vlgmr.msra.gmra.mrb[36].mxu0 %vm549_vm2, %v3548_v3  ;;  %7165 = vmatmul.mubr.msk.f32.vlgmr.msra.gmra.mrb[34].mxu1 %vm549_vm2, %v9359_v53 }
 0x6f5   :  { %7749 = vmatpush3.bf16.msra.mxu0 %v9028_v42  ;;  %7761 = vmatpush3.bf16.msra.mxu1 %v9030_v43 }
 0x6f6   :  { %7750 = vmatprep.subr.bf16.mxu0 %v8558_v0  ;;  %7762 = vmatprep.subr.bf16.mxu1 %v8558_v0 }
 0x6f7   :  { %7153 = vmatprep.mubr.msk.f32.mxu0 %vm8559_vm0, %v8560_v1  ;;  %7175 = vmatprep.mubr.msk.f32.mxu1 %vm8559_vm0, %v8560_v1 }
 0x6f9   :  { %7752 = vmatpush3.bf16.msra.mxu0 %v9039_v48  ;;  %7764 = vmatpush3.bf16.msra.mxu1 %v9041_v50 }
 0x6fa   :  { %7765 = vmatprep.subr.bf16.mxu0 %v8558_v0  ;;  %7771 = vmatprep.subr.bf16.mxu1 %v8558_v0 }
 0x6fc   :  { %7154 = vmatmul.mubr.msk.f32.vlgmr.msra.gmra.mrb[34].mxu0 %vm549_vm2, %v9359_v53  ;;  %7176 = vmatmul.mubr.msk.f32.vlgmr.msra.gmra.mrb[36].mxu1 %vm549_vm2, %v9359_v53 }
 0x6fd   :  { %7767 = vmatpush3.bf16.msra.mxu0 %v8902_v14  ;;  %7773 = vmatpush3.bf16.msra.mxu1 %v8913_v19 }
 0x6fe   :  { %7768 = vmatprep.subr.bf16.mxu0 %v8558_v0  ;;  %7774 = vmatprep.subr.bf16.mxu1 %v8558_v0 }
 0x6ff   :  { %7186 = vmatprep.mubr.msk.f32.mxu0 %vm8559_vm0, %v8560_v1  ;;  %7197 = vmatprep.mubr.msk.f32.mxu1 %vm8559_vm0, %v8560_v1 }
 0x701   :  { %7770 = vmatpush3.bf16.msra.mxu0 %v8918_v20  ;;  %7776 = vmatpush3.bf16.msra.mxu1 %v8926_v25 }
 0x702   :  { %7777 = vmatprep.subr.bf16.mxu0 %v8558_v0  ;;  %7783 = vmatprep.subr.bf16.mxu1 %v8558_v0 }
 0x704   :  { %7187 = vmatmul.mubr.msk.f32.vlgmr.msra.gmra.mrb[38].mxu0 %vm549_vm2, %v3548_v3  ;;  %7198 = vmatmul.mubr.msk.f32.vlgmr.msra.gmra.mrb[38].mxu1 %vm549_vm2, %v3548_v3 }
 0x705   :  { %7779 = vmatpush3.bf16.msra.mxu0 %v8932_v26  ;;  %7208 = vmatprep.mubr.msk.f32.mxu0 %vm8559_vm0, %v8560_v1 }
 0x706   :  { %7780 = vmatprep.subr.bf16.mxu0 %v8558_v0  ;;  %7785 = vmatpush3.bf16.msra.mxu1 %v8958_v33 }
 0x707   :  { %7786 = vmatprep.subr.bf16.mxu1 %v8558_v0  ;;  %7219 = vmatprep.mubr.msk.f32.mxu1 %vm8559_vm0, %v8560_v1 }
 0x709   :  { %7782 = vmatpush3.bf16.msra.mxu0 %v8938_v29 }
 0x70a   :  { %7789 = vmatprep.subr.bf16.mxu0 %v8558_v0  ;;  %7788 = vmatpush3.bf16.msra.mxu1 %v8972_v39 }
 0x70b   :  { %7795 = vmatprep.subr.bf16.mxu1 %v8558_v0 }
 0x70c   :  { %7209 = vmatmul.mubr.msk.f32.vlgmr.msra.gmra.mrb[40].mxu0 %vm549_vm2, %v3548_v3 }
 0x70d   :  { %7791 = vmatpush3.bf16.msra.mxu0 %v8960_v35  ;;  %7230 = vmatprep.mubr.msk.f32.mxu0 %vm8559_vm0, %v8560_v1 }
 0x70e   :  { %7792 = vmatprep.subr.bf16.mxu0 %v8558_v0 }
 0x711   :  { %7794 = vmatpush3.bf16.msra.mxu0 %v8974_v41 }
 0x712   :  { %7807 = vmatprep.subr.bf16.mxu0 %v8558_v0 }
 0x7c7   :  { %v3757_v10 = vpop.f32.mrb[36].mxu0  ;;  %v3900_v28 = vpop.f32.mrb[34].mxu1 }
 0x7c8   :  { %v7144_v51 = vpop.f32.mrb[37].mxu0  ;;  %v7166_v5 = vpop.f32.mrb[35].mxu1  ;;  %v7942_v16 = vadd.f32 %v3900_v28, %v9097_v63  ;;  %v3758_v59 = vadd.f32 %v3757_v10, %v9110_v30 }
 0x7ca   :  { %v6246_v36 = vmul.f32 -1.442695, %v7942_v16 }
 0x7cf   :  { %v3830_v62 = vpop.f32.mrb[34].mxu0  ;;  %v3984_v6 = vpop.f32.mrb[36].mxu1 }
 0x7d0   :  { %v7941_v8 = vadd.f32 %v3830_v62, %v9091_v55  ;;  %v7155_v4 = vpop.f32.mrb[35].mxu0  ;;  %v7177_v9 = vpop.f32.mrb[37].mxu1  ;;  %v3985_v44 = vadd.f32 %v3984_v6, %v9104_v21 }
 0x7d2   :  { %v6245_v11 = vmul.f32 -1.442695, %v7941_v8 }
 0x7d4   :  { %8092 = vpow2.f32 %v6245_v11 }
 0x7d7   :  { %v4060_v13 = vpop.f32.mrb[38].mxu0  ;;  %v4130_v15 = vpop.f32.mrb[38].mxu1 }
 0x7d8   :  { %v4135_v17 = vrot.slane %v4060_v13, 3  ;;  %v7188_v18 = vpop.f32.mrb[39].mxu0  ;;  %v7199_v31 = vpop.f32.mrb[39].mxu1  ;;  %v4145_v45 = vrot.slane %v4130_v15, 3 }
 0x7da   :  { %v4137_v56 = vadd.f32 %v4135_v17, %v8980_v49  ;;  %v4147_v38 = vadd.f32 %v4145_v45, %v8983_v57 }
 0x7dc   :  { %v6250_v24 = vmul.f32 -1.442695, %v4137_v56  ;;  %v6251_v54 = vmul.f32 -1.442695, %v4147_v38 }
 0x7de   :  { %v8093_v37 = vpop.eup %8092  ;;  %8094 = vpow2.f32 %v6250_v24 }
 0x7df   :  { %v3908_v27 = vadd.f32 1.0, %v8093_v37  ;;  %v4220_v40 = vpop.f32.mrb[40].mxu0  ;;  %8096 = vpow2.f32 %v6246_v36 }
 0x7e0   :  { %v7210_v55 = vpop.f32.mrb[41].mxu0  ;;  %v4221_v3 = vadd.f32 %v9437_v58, %v4220_v40  ;;  %v9514_v40 = vld [vmem:[#allocation25] sm:$0x1] }
 0x7e1   :  { %8098 = vrcp.f32 %v3908_v27 }
 0x7e2   :  { %v4225_v28 = vrot.slane %v4221_v3, 3 }
 0x7e8   :  { %v8095_v46 = vpop.eup %8094 }
 0x7e9   :  { %v4141_v47 = vadd.f32 1.0, %v8095_v46  ;;  %v8097_v63 = vpop.eup %8096 }
 0x7ea   :  { %v3915_v12 = vadd.f32 1.0, %v8097_v63 }
 0x7eb   :  { %v8099_v52 = vpop.eup %8098  ;;  %8100 = vrcp.f32 %v4141_v47 }
 0x7ec   :  { %v3988_v2 = vmul.f32 %v8099_v52, %v3985_v44  ;;  %8102 = vpow2.f32 %v6251_v54  ;;  %v9520_v44 = vld [vmem:[%s9713_s18] sm:$0x1] }
 0x7ee   :  { %v3989_v60 = vadd.f32 %v3988_v2, %v3758_v59 }
 0x7f0   :  { %8104 = vtanh.f32 %v3989_v60 }
 0x7f1   :  { %8106 = vrcp.f32 %v3915_v12 }
 0x7f5   :  { %v8101_v51 = vpop.eup %8100 }
 0x7f6   :  { %v4227_v5 = vmul.f32 %v8101_v51, %v4225_v28  ;;  %v8103_v62 = vpop.eup %8102 }
 0x7f7   :  { %v4151_v8 = vadd.f32 1.0, %v8103_v62 }
 0x7f8   :  { %v4228_v21 = vadd.f32 %v4227_v5, %v8989_v7 }
 0x7fa   :  { %v8105_v6 = vpop.eup %8104  ;;  %8108 = vtanh.f32 %v4228_v21 }
 0x7fb   :  { %v3991_v30 = vsub.f32 %v9359_v53, %v8105_v6  ;;  %v8107_v10 = vpop.eup %8106  ;;  %8110 = vrcp.f32 %v4151_v8 }
 0x7fd   :  { %v3992_v4 = vmul.f32 %v8107_v10, %v3991_v30 }
 0x7ff   :  { %v9442_v9 = vadd.f32 %v8105_v6, %v3992_v4  ;;  %v9528_v4 = vld [vmem:[%s9715_s20] sm:$0x1] }
 0x804   :  { %v8109_v11 = vpop.eup %8108 }
 0x805   :  { %v4231_v13 = vrot.slane %v8109_v11, 1  ;;  %v8111_v17 = vpop.eup %8110 }
 0x807   :  { %v4233_v15 = vsub.f32 %v9362_v61, %v4231_v13 }
 0x809   :  { %v4235_v16 = vrot.slane %v4233_v15, 7 }
 0x80b   :  { %v4237_v18 = vmul.f32 %v8111_v17, %v4235_v16  ;;  %v9534_v16 = vld [vmem:[%s9714_s19] sm:$0x1] }
 0x80d   :  { %v9445_v31 = vadd.f32 %v8109_v11, %v4237_v18 }
 0x80f   :  { %v4240_v56 = vrot.slane %v9445_v31, 5 }
 0x811   :  { %7220 = vmatmul.mubr.msk.f32.vlgmr.msra.gmra.mrb[40].mxu1 %vm549_vm2, %v4240_v56  ;;  %7231 = vmatmul.mubr.msk.f32.vlgmr.msra.gmra.mrb[42].mxu0 %vm549_vm2, %v4240_v56 }
 0x812   :  { %7797 = vmatpush3.bf16.msra.mxu1 %v8998_v22  ;;  %7809 = vmatpush3.bf16.msra.mxu0 %v9000_v23 }
 0x813   :  { %7798 = vmatprep.subr.bf16.mxu1 %v8558_v0  ;;  %7810 = vmatprep.subr.bf16.mxu0 %v8558_v0 }
 0x814   :  { %7241 = vmatprep.mubr.msk.f32.mxu1 %vm8559_vm0, %v8560_v1  ;;  %7263 = vmatprep.mubr.msk.f32.mxu0 %vm8559_vm0, %v8560_v1 }
 0x816   :  { %7800 = vmatpush3.bf16.msra.mxu1 %v9016_v32  ;;  %7812 = vmatpush3.bf16.msra.mxu0 %v9018_v34 }
 0x817   :  { %7801 = vmatprep.subr.bf16.mxu1 %v8558_v0  ;;  %7813 = vmatprep.subr.bf16.mxu0 %v8558_v0 }
 0x819   :  { %7242 = vmatmul.mubr.msk.f32.vlgmr.msra.gmra.mrb[42].mxu1 %vm549_vm2, %v4240_v56  ;;  %7264 = vmatmul.mubr.msk.f32.vlgmr.msra.gmra.mrb[42].mxu0 %vm549_vm2, %v9442_v9 }
 0x81a   :  { %7803 = vmatpush3.bf16.msra.mxu1 %v9028_v42  ;;  %7815 = vmatpush3.bf16.msra.mxu0 %v9030_v43 }
 0x81b   :  { %7804 = vmatprep.subr.bf16.mxu1 %v8558_v0  ;;  %7816 = vmatprep.subr.bf16.mxu0 %v8558_v0 }
 0x81c   :  { %7252 = vmatprep.mubr.msk.f32.mxu1 %vm8559_vm0, %v8560_v1  ;;  %7274 = vmatprep.mubr.msk.f32.mxu0 %vm8559_vm0, %v8560_v1 }
 0x81e   :  { %7806 = vmatpush3.bf16.msra.mxu1 %v9039_v48  ;;  %7818 = vmatpush3.bf16.msra.mxu0 %v9041_v50 }
 0x81f   :  { %7819 = vmatprep.subr.bf16.mxu1 %v8558_v0  ;;  %7825 = vmatprep.subr.bf16.mxu0 %v8558_v0 }
 0x821   :  { %7253 = vmatmul.mubr.msk.f32.vlgmr.msra.gmra.mrb[40].mxu1 %vm549_vm2, %v9442_v9  ;;  %7275 = vmatmul.mubr.msk.f32.vlgmr.msra.gmra.mrb[44].mxu0 %vm549_vm2, %v9442_v9 }
 0x822   :  { %7821 = vmatpush3.bf16.msra.mxu1 %v8902_v14  ;;  %7827 = vmatpush3.bf16.msra.mxu0 %v8913_v19 }
 0x823   :  { %7822 = vmatprep.subr.bf16.mxu1 %v8558_v0  ;;  %7828 = vmatprep.subr.bf16.mxu0 %v8558_v0 }
 0x824   :  { %7285 = vmatprep.mubr.msk.f32.mxu1 %vm8559_vm0, %v8560_v1  ;;  %7296 = vmatprep.mubr.msk.f32.mxu0 %vm8559_vm0, %v8560_v1 }
 0x826   :  { %7824 = vmatpush3.bf16.msra.mxu1 %v8918_v20  ;;  %7830 = vmatpush3.bf16.msra.mxu0 %v8926_v25 }
 0x827   :  { %7831 = vmatprep.subr.bf16.mxu1 %v8558_v0  ;;  %7837 = vmatprep.subr.bf16.mxu0 %v8558_v0 }
 0x829   :  { %7286 = vmatmul.mubr.msk.f32.vlgmr.msra.gmra.mrb[44].mxu1 %vm549_vm2, %v4240_v56  ;;  %7297 = vmatmul.mubr.msk.f32.vlgmr.msra.gmra.mrb[46].mxu0 %vm549_vm2, %v4240_v56 }
 0x82a   :  { %7833 = vmatpush3.bf16.msra.mxu1 %v8932_v26  ;;  %7307 = vmatprep.mubr.msk.f32.mxu1 %vm8559_vm0, %v8560_v1 }
 0x82b   :  { %7834 = vmatprep.subr.bf16.mxu1 %v8558_v0  ;;  %7839 = vmatpush3.bf16.msra.mxu0 %v8958_v33 }
 0x82c   :  { %7840 = vmatprep.subr.bf16.mxu0 %v8558_v0  ;;  %7318 = vmatprep.mubr.msk.f32.mxu0 %vm8559_vm0, %v8560_v1 }
 0x82e   :  { %7836 = vmatpush3.bf16.msra.mxu1 %v8938_v29 }
 0x82f   :  { %7843 = vmatprep.subr.bf16.mxu1 %v8558_v0  ;;  %7842 = vmatpush3.bf16.msra.mxu0 %v8972_v39 }
 0x830   :  { %7849 = vmatprep.subr.bf16.mxu0 %v8558_v0 }
 0x831   :  { %7308 = vmatmul.mubr.msk.f32.vlgmr.msra.gmra.mrb[46].mxu1 %vm549_vm2, %v4240_v56 }
 0x832   :  { %7845 = vmatpush3.bf16.msra.mxu1 %v8960_v35  ;;  %7329 = vmatprep.mubr.msk.f32.mxu1 %vm8559_vm0, %v8560_v1 }
 0x833   :  { %7846 = vmatprep.subr.bf16.mxu1 %v8558_v0 }
 0x836   :  { %7848 = vmatpush3.bf16.msra.mxu1 %v8974_v41 }
 0x837   :  { %7861 = vmatprep.subr.bf16.mxu1 %v8558_v0 }
 0x8ec   :  { %v4449_v53 = vpop.f32.mrb[42].mxu1  ;;  %v4592_v61 = vpop.f32.mrb[42].mxu0 }
 0x8ed   :  { %v7243_v36 = vpop.f32.mrb[43].mxu1  ;;  %v7265_v24 = vpop.f32.mrb[43].mxu0  ;;  %v7944_v52 = vadd.f32 %v9520_v44, %v4592_v61  ;;  %v4450_v17 = vadd.f32 %v9534_v16, %v4449_v53 }
 0x8ef   :  { %v6259_v60 = vmul.f32 -1.442695, %v7944_v52 }
 0x8f4   :  { %v4522_v37 = vpop.f32.mrb[40].mxu1  ;;  %v4676_v27 = vpop.f32.mrb[44].mxu0 }
 0x8f5   :  { %v7943_v55 = vadd.f32 %v9514_v40, %v4522_v37  ;;  %v7254_v45 = vpop.f32.mrb[41].mxu1  ;;  %v7276_v38 = vpop.f32.mrb[45].mxu0  ;;  %v4677_v11 = vadd.f32 %v9528_v4, %v4676_v27 }
 0x8f7   :  { %v6258_v46 = vmul.f32 -1.442695, %v7943_v55 }
 0x8f9   :  { %8112 = vpow2.f32 %v6258_v46 }
 0x8fc   :  { %v4752_v47 = vpop.f32.mrb[44].mxu1  ;;  %v4822_v63 = vpop.f32.mrb[46].mxu0 }
 0x8fd   :  { %v4827_v54 = vrot.slane %v4752_v47, 2  ;;  %v7287_v59 = vpop.f32.mrb[45].mxu1  ;;  %v7298_v2 = vpop.f32.mrb[47].mxu0  ;;  %v4837_v62 = vrot.slane %v4822_v63, 2 }
 0x8ff   :  { %v4829_v12 = vadd.f32 %v4827_v54, %v8980_v49  ;;  %v4839_v6 = vadd.f32 %v4837_v62, %v8983_v57 }
 0x901   :  { %v6263_v3 = vmul.f32 -1.442695, %v4829_v12  ;;  %v6264_v15 = vmul.f32 -1.442695, %v4839_v6 }
 0x903   :  { %v8113_v28 = vpop.eup %8112  ;;  %8114 = vpow2.f32 %v6263_v3 }
 0x904   :  { %v4600_v51 = vadd.f32 1.0, %v8113_v28  ;;  %v4912_v5 = vpop.f32.mrb[46].mxu1  ;;  %8116 = vpow2.f32 %v6259_v60 }
 0x905   :  { %v7309_v21 = vpop.f32.mrb[47].mxu1  ;;  %v4913_v36 = vadd.f32 %v9437_v58, %v4912_v5 }
 0x906   :  { %8118 = vrcp.f32 %v4600_v51 }
 0x907   :  { %v4917_v24 = vrot.slane %v4913_v36, 2 }
 0x90d   :  { %v8115_v30 = vpop.eup %8114 }
 0x90e   :  { %v4833_v10 = vadd.f32 1.0, %v8115_v30  ;;  %v8117_v8 = vpop.eup %8116 }
 0x90f   :  { %v4607_v56 = vadd.f32 1.0, %v8117_v8 }
 0x910   :  { %v8119_v13 = vpop.eup %8118  ;;  %8120 = vrcp.f32 %v4833_v10 }
 0x911   :  { %v4680_v18 = vmul.f32 %v8119_v13, %v4677_v11  ;;  %8122 = vpow2.f32 %v6264_v15 }
 0x913   :  { %v4681_v61 = vadd.f32 %v4680_v18, %v4450_v17 }
 0x915   :  { %8124 = vtanh.f32 %v4681_v61 }
 0x916   :  { %8126 = vrcp.f32 %v4607_v56 }
 0x91a   :  { %v8121_v37 = vpop.eup %8120 }
 0x91b   :  { %v4919_v27 = vmul.f32 %v8121_v37, %v4917_v24  ;;  %v8123_v45 = vpop.eup %8122 }
 0x91c   :  { %v4843_v53 = vadd.f32 1.0, %v8123_v45 }
 0x91d   :  { %v4920_v55 = vadd.f32 %v4919_v27, %v8989_v7 }
 0x91f   :  { %v8125_v38 = vpop.eup %8124  ;;  %8128 = vtanh.f32 %v4920_v55 }
 0x920   :  { %v4683_v46 = vsub.f32 %v9442_v9, %v8125_v38  ;;  %v8127_v47 = vpop.eup %8126  ;;  %8130 = vrcp.f32 %v4843_v53 }
 0x922   :  { %v4684_v63 = vmul.f32 %v8127_v47, %v4683_v46 }
 0x924   :  { %v9540_v52 = vadd.f32 %v8125_v38, %v4684_v63 }
 0x929   :  { %v8129_v54 = vpop.eup %8128 }
 0x92a   :  { %v4923_v59 = vrot.slane %v8129_v54, 1  ;;  %v8131_v60 = vpop.eup %8130 }
 0x92c   :  { %v4925_v2 = vsub.f32 %v9445_v31, %v4923_v59 }
 0x92e   :  { %v4927_v12 = vrot.slane %v4925_v2, 7 }
 0x930   :  { %v4929_v3 = vmul.f32 %v8131_v60, %v4927_v12 }
 0x932   :  { %v9543_v28 = vadd.f32 %v8129_v54, %v4929_v3 }
 0x934   :  { %v4932_v51 = vrot.slane %v9543_v28, 6 }
 0x936   :  { %7319 = vmatmul.mubr.msk.f32.vlgmr.msra.gmra.mrb[48].mxu0 %vm549_vm2, %v4932_v51  ;;  %7330 = vmatmul.mubr.msk.f32.vlgmr.msra.gmra.mrb[48].mxu1 %vm549_vm2, %v4932_v51 }
 0x937   :  { %7851 = vmatpush3.bf16.msra.mxu0 %v8998_v22  ;;  %7863 = vmatpush3.bf16.msra.mxu1 %v9000_v23 }
 0x938   :  { %7852 = vmatprep.subr.bf16.mxu0 %v8558_v0  ;;  %7864 = vmatprep.subr.bf16.mxu1 %v8558_v0 }
 0x939   :  { %7340 = vmatprep.mubr.msk.f32.mxu0 %vm8559_vm0, %v8560_v1  ;;  %7362 = vmatprep.mubr.msk.f32.mxu1 %vm8559_vm0, %v8560_v1 }
 0x93b   :  { %7854 = vmatpush3.bf16.msra.mxu0 %v9016_v32  ;;  %7866 = vmatpush3.bf16.msra.mxu1 %v9018_v34 }
 0x93c   :  { %7855 = vmatprep.subr.bf16.mxu0 %v8558_v0  ;;  %7867 = vmatprep.subr.bf16.mxu1 %v8558_v0 }
 0x93e   :  { %7341 = vmatmul.mubr.msk.f32.vlgmr.msra.gmra.mrb[50].mxu0 %vm549_vm2, %v4932_v51  ;;  %7363 = vmatmul.mubr.msk.f32.vlgmr.msra.gmra.mrb[48].mxu1 %vm549_vm2, %v9540_v52 }
 0x93f   :  { %7857 = vmatpush3.bf16.msra.mxu0 %v9028_v42  ;;  %7869 = vmatpush3.bf16.msra.mxu1 %v9030_v43 }
 0x940   :  { %7858 = vmatprep.subr.bf16.mxu0 %v8558_v0  ;;  %7870 = vmatprep.subr.bf16.mxu1 %v8558_v0 }
 0x941   :  { %7351 = vmatprep.mubr.msk.f32.mxu0 %vm8559_vm0, %v8560_v1  ;;  %7373 = vmatprep.mubr.msk.f32.mxu1 %vm8559_vm0, %v8560_v1 }
 0x943   :  { %7860 = vmatpush3.bf16.msra.mxu0 %v9039_v48  ;;  %7872 = vmatpush3.bf16.msra.mxu1 %v9041_v50 }
 0x944   :  { %7873 = vmatprep.subr.bf16.mxu0 %v8558_v0  ;;  %7879 = vmatprep.subr.bf16.mxu1 %v8558_v0 }
 0x946   :  { %7352 = vmatmul.mubr.msk.f32.vlgmr.msra.gmra.mrb[48].mxu0 %vm549_vm2, %v9540_v52  ;;  %7374 = vmatmul.mubr.msk.f32.vlgmr.msra.gmra.mrb[50].mxu1 %vm549_vm2, %v9540_v52 }
 0x947   :  { %7875 = vmatpush3.bf16.msra.mxu0 %v8902_v14  ;;  %7881 = vmatpush3.bf16.msra.mxu1 %v8913_v19 }
 0x948   :  { %7876 = vmatprep.subr.bf16.mxu0 %v8558_v0  ;;  %7882 = vmatprep.subr.bf16.mxu1 %v8558_v0 }
 0x949   :  { %7384 = vmatprep.mubr.msk.f32.mxu0 %vm8559_vm0, %v8560_v1  ;;  %7395 = vmatprep.mubr.msk.f32.mxu1 %vm8559_vm0, %v8560_v1 }
 0x94b   :  { %7878 = vmatpush3.bf16.msra.mxu0 %v8918_v20  ;;  %7884 = vmatpush3.bf16.msra.mxu1 %v8926_v25 }
 0x94c   :  { %7885 = vmatprep.subr.bf16.mxu0 %v8558_v0  ;;  %7891 = vmatprep.subr.bf16.mxu1 %v8558_v0 }
 0x94e   :  { %7385 = vmatmul.mubr.msk.f32.vlgmr.msra.gmra.mrb[52].mxu0 %vm549_vm2, %v4932_v51  ;;  %7396 = vmatmul.mubr.msk.f32.vlgmr.msra.gmra.mrb[52].mxu1 %vm549_vm2, %v4932_v51 }
 0x94f   :  { %7887 = vmatpush3.bf16.msra.mxu0 %v8932_v26  ;;  %7406 = vmatprep.mubr.msk.f32.mxu0 %vm8559_vm0, %v8560_v1 }
 0x950   :  { %7888 = vmatprep.subr.bf16.mxu0 %v8558_v0  ;;  %7893 = vmatpush3.bf16.msra.mxu1 %v8958_v33 }
 0x951   :  { %7894 = vmatprep.subr.bf16.mxu1 %v8558_v0  ;;  %7417 = vmatprep.mubr.msk.f32.mxu1 %vm8559_vm0, %v8560_v1 }
 0x953   :  { %7890 = vmatpush3.bf16.msra.mxu0 %v8938_v29 }
 0x954   :  { %7897 = vmatprep.subr.bf16.mxu0 %v8558_v0  ;;  %7896 = vmatpush3.bf16.msra.mxu1 %v8972_v39 }
 0x955   :  { %7903 = vmatprep.subr.bf16.mxu1 %v8558_v0 }
 0x956   :  { %7407 = vmatmul.mubr.msk.f32.vlgmr.msra.gmra.mrb[54].mxu0 %vm549_vm2, %v4932_v51 }
 0x957   :  { %7899 = vmatpush3.bf16.msra.mxu0 %v8960_v35  ;;  %7428 = vmatprep.mubr.msk.f32.mxu0 %vm8559_vm0, %v8560_v1 }
 0x958   :  { %7900 = vmatprep.subr.bf16.mxu0 %v8558_v0 }
 0x95b   :  { %7902 = vmatpush3.bf16.msra.mxu0 %v8974_v41 }
 0x95c   :  { %7915 = vmatprep.subr.bf16.mxu0 %v8558_v0 }
 0xa11   :  { %v5141_v14 = vpop.f32.mrb[50].mxu0  ;;  %v5284_v19 = vpop.f32.mrb[48].mxu1 }
 0xa12   :  { %v7342_v20 = vpop.f32.mrb[51].mxu0  ;;  %v7364_v25 = vpop.f32.mrb[49].mxu1  ;;  %v7946_v21 = vadd.f32 %v9520_v44, %v5284_v19  ;;  %v5142_v55 = vadd.f32 %v9534_v16, %v5141_v14 }
 0xa14   :  { %v6272_v10 = vmul.f32 -1.442695, %v7946_v21 }
 0xa19   :  { %v5214_v26 = vpop.f32.mrb[48].mxu0  ;;  %v5368_v29 = vpop.f32.mrb[50].mxu1 }
 0xa1a   :  { %v7945_v33 = vadd.f32 %v9514_v40, %v5214_v26  ;;  %v7353_v39 = vpop.f32.mrb[49].mxu0  ;;  %v7375_v9 = vpop.f32.mrb[51].mxu1  ;;  %v5369_v37 = vadd.f32 %v9528_v4, %v5368_v29 }
 0xa1c   :  { %v6271_v35 = vmul.f32 -1.442695, %v7945_v33 }
 0xa1e   :  { %8132 = vpow2.f32 %v6271_v35 }
 0xa21   :  { %v5444_v31 = vpop.f32.mrb[52].mxu0  ;;  %v5514_v5 = vpop.f32.mrb[52].mxu1 }
 0xa22   :  { %v5519_v62 = vrot.slane %v5444_v31, 1  ;;  %v7386_v41 = vpop.f32.mrb[53].mxu0  ;;  %v7397_v6 = vpop.f32.mrb[53].mxu1  ;;  %v5529_v18 = vrot.slane %v5514_v5, 1 }
 0xa24   :  { %v5521_v30 = vadd.f32 %v5519_v62, %v8980_v49  ;;  %v5531_v56 = vadd.f32 %v5529_v18, %v8983_v57 }
 0xa26   :  { %v6276_v8 = vmul.f32 -1.442695, %v5521_v30  ;;  %v6277_v49 = vmul.f32 -1.442695, %v5531_v56 }
 0xa28   :  { %v8133_v11 = vpop.eup %8132  ;;  %8134 = vpow2.f32 %v6276_v8 }
 0xa29   :  { %v5292_v13 = vadd.f32 1.0, %v8133_v11  ;;  %v5604_v15 = vpop.f32.mrb[54].mxu0  ;;  %8136 = vpow2.f32 %v6272_v10 }
 0xa2a   :  { %v7408_v17 = vpop.f32.mrb[55].mxu0  ;;  %v5605_v47 = vadd.f32 %v9437_v58, %v5604_v15 }
 0xa2b   :  { %8138 = vrcp.f32 %v5292_v13 }
 0xa2c   :  { %v5609_v53 = vrot.slane %v5605_v47, 1 }
 0xa32   :  { %v8135_v61 = vpop.eup %8134 }
 0xa33   :  { %v5525_v36 = vadd.f32 1.0, %v8135_v61  ;;  %v8137_v24 = vpop.eup %8136 }
 0xa34   :  { %v5299_v38 = vadd.f32 1.0, %v8137_v24 }
 0xa35   :  { %v8139_v27 = vpop.eup %8138  ;;  %8140 = vrcp.f32 %v5525_v36 }
 0xa36   :  { %v5372_v45 = vmul.f32 %v8139_v27, %v5369_v37  ;;  %8142 = vpow2.f32 %v6277_v49 }
 0xa38   :  { %v5373_v46 = vadd.f32 %v5372_v45, %v5142_v55 }
 0xa3a   :  { %8144 = vtanh.f32 %v5373_v46 }
 0xa3b   :  { %8146 = vrcp.f32 %v5299_v38 }
 0xa3f   :  { %v8141_v57 = vpop.eup %8140 }
 0xa40   :  { %v5611_v63 = vmul.f32 %v8141_v57, %v5609_v53  ;;  %v8143_v59 = vpop.eup %8142 }
 0xa41   :  { %v5535_v3 = vadd.f32 1.0, %v8143_v59 }
 0xa42   :  { %v5612_v54 = vadd.f32 %v5611_v63, %v8989_v7 }
 0xa44   :  { %v8145_v2 = vpop.eup %8144  ;;  %8148 = vtanh.f32 %v5612_v54 }
 0xa45   :  { %v5375_v12 = vsub.f32 %v9540_v52, %v8145_v2  ;;  %v8147_v60 = vpop.eup %8146  ;;  %8150 = vrcp.f32 %v5535_v3 }
 0xa47   :  { %v5376_v51 = vmul.f32 %v8147_v60, %v5375_v12 }
 0xa49   :  { %v9621_v14 = vadd.f32 %v8145_v2, %v5376_v51 }
 0xa4e   :  { %v8149_v19 = vpop.eup %8148 }
 0xa4f   :  { %v5615_v20 = vrot.slane %v8149_v19, 1  ;;  %v8151_v26 = vpop.eup %8150 }
 0xa51   :  { %v5617_v58 = vsub.f32 %v9543_v28, %v5615_v20 }
 0xa53   :  { %v5619_v25 = vrot.slane %v5617_v58, 7 }
 0xa55   :  { %v5621_v29 = vmul.f32 %v8151_v26, %v5619_v25 }
 0xa57   :  { %v5622_v33 = vadd.f32 %v8149_v19, %v5621_v29 }
 0xa59   :  { %v5624_v7 = vrot.slane %v5622_v33, 7 }
 0xa5b   :  { %7418 = vmatmul.mubr.msk.f32.vlgmr.msra.gmra.mrb[54].mxu1 %vm549_vm2, %v5624_v7  ;;  %7429 = vmatmul.mubr.msk.f32.vlgmr.msra.gmra.mrb[56].mxu0 %vm549_vm2, %v5624_v7 }
 0xa5c   :  { %7905 = vmatpush3.bf16.msra.mxu1 %v8998_v22  ;;  %7917 = vmatpush3.bf16.msra.mxu0 %v9000_v23  ;;  %v6070_v22 = vld [vmem:[%s9748_s10] sm:$0xff]  ;;  %v6071_v23 = vld [vmem:[%s9748_s10 + $0x8] sm:$0xff] }
 0xa5d   :  { %7906 = vmatprep.subr.bf16.mxu1 %v8558_v0  ;;  %7918 = vmatprep.subr.bf16.mxu0 %v8558_v0 }
 0xa5e   :  { %7439 = vmatprep.mubr.msk.f32.mxu1 %vm8559_vm0, %v8560_v1  ;;  %7461 = vmatprep.mubr.msk.f32.mxu0 %vm8559_vm0, %v8560_v1 }
 0xa60   :  { %7908 = vmatpush3.bf16.msra.mxu1 %v9016_v32  ;;  %7920 = vmatpush3.bf16.msra.mxu0 %v9018_v34  ;;  %v6072_v32 = vld [vmem:[%s9748_s10 + $0x10] sm:$0xff]  ;;  %v7928_v34 = vpack.c.bf16 %v6071_v23, %v6070_v22 }
 0xa61   :  { %7909 = vmatprep.subr.bf16.mxu1 %v8558_v0  ;;  %7921 = vmatprep.subr.bf16.mxu0 %v8558_v0 }
 0xa63   :  { %7440 = vmatmul.mubr.msk.f32.vlgmr.msra.gmra.mrb[56].mxu1 %vm549_vm2, %v5624_v7  ;;  %7462 = vmatmul.mubr.msk.f32.vlgmr.msra.gmra.mrb[56].mxu0 %vm549_vm2, %v9621_v14 }
 0xa64   :  { %7911 = vmatpush3.bf16.msra.mxu1 %v9028_v42  ;;  %7923 = vmatpush3.bf16.msra.mxu0 %v9030_v43  ;;  %v6073_v42 = vld [vmem:[%s9748_s10 + $0x18] sm:$0xff] }
 0xa65   :  { %7912 = vmatprep.subr.bf16.mxu1 %v8558_v0  ;;  %7924 = vmatprep.subr.bf16.mxu0 %v8558_v0  ;;  %v7931_v43 = vpack.c.bf16 %v6073_v42, %v6072_v32 }
 0xa66   :  { %7450 = vmatprep.mubr.msk.f32.mxu1 %vm8559_vm0, %v8560_v1  ;;  %7472 = vmatprep.mubr.msk.f32.mxu0 %vm8559_vm0, %v8560_v1 }
 0xa68   :  { %7914 = vmatpush3.bf16.msra.mxu1 %v9039_v48  ;;  %7926 = vmatpush3.bf16.msra.mxu0 %v9041_v50 }
 0xa69   :  { %7927 = vmatprep.subr.bf16.mxu1 %v8558_v0 }
 0xa6b   :  { %7451 = vmatmul.mubr.msk.f32.vlgmr.msra.gmra.mrb[54].mxu1 %vm549_vm2, %v9621_v14  ;;  %7473 = vmatmul.mubr.msk.f32.vlgmr.msra.gmra.mrb[58].mxu0 %vm549_vm2, %v9621_v14 }
 0xa6c   :  { %7483 = vmatprep.mubr.msk.f32.mxu1 %vm8559_vm0, %v8560_v1  ;;  %7929 = vmatpush3.bf16.msra.mxu1 %v7928_v34 }
 0xa6d   :  { %7930 = vmatprep.subr.bf16.mxu1 %v8558_v0 }
 0xa70   :  { %7932 = vmatpush3.bf16.msra.mxu1 %v7931_v43 }
 0xb36   :  { %v5833_v1 = vpop.f32.mrb[56].mxu1  ;;  %v5976_v48 = vpop.f32.mrb[56].mxu0 }
 0xb37   :  { %v7441_v50 = vpop.f32.mrb[57].mxu1  ;;  %v7463_v52 = vpop.f32.mrb[57].mxu0  ;;  %v7948_v21 = vadd.f32 %v9520_v44, %v5976_v48  ;;  %v5834_v8 = vadd.f32 %v9534_v16, %v5833_v1 }
 0xb39   :  { %v6285_v62 = vmul.f32 -1.442695, %v7948_v21 }
 0xb3e   :  { %v5906_v28 = vpop.f32.mrb[54].mxu1  ;;  %v6060_v39 = vpop.f32.mrb[58].mxu0 }
 0xb3f   :  { %v7947_v9 = vadd.f32 %v9514_v40, %v5906_v28  ;;  %v7452_v35 = vpop.f32.mrb[55].mxu1  ;;  %v7474_v31 = vpop.f32.mrb[59].mxu0  ;;  %v6061_v30 = vadd.f32 %v9528_v4, %v6060_v39  ;;  %v6074_v4 = vld [vmem:[%s9749_s11] sm:$0x1] }
 0xb41   :  { %v6284_v5 = vmul.f32 -1.442695, %v7947_v9 }
 0xb43   :  { %8152 = vpow2.f32 %v6284_v5 }
 0xb44   :  { %8154 = vpow2.f32 %v6285_v62 }
 0xb4d   :  { %v8153_v41 = vpop.eup %8152 }
 0xb4e   :  { %v5984_v6 = vadd.f32 1.0, %v8153_v41  ;;  %v8155_v0 = vpop.eup %8154 }
 0xb4f   :  { %v5991_v13 = vadd.f32 1.0, %v8155_v0 }
 0xb50   :  { %8156 = vrcp.f32 %v5984_v6 }
 0xb5a   :  { %v8157_v10 = vpop.eup %8156 }
 0xb5b   :  { %v6064_v11 = vmul.f32 %v8157_v10, %v6061_v30 }
 0xb5d   :  { %v6065_v40 = vadd.f32 %v6064_v11, %v5834_v8 }
 0xb5f   :  { %8158 = vtanh.f32 %v6065_v40 }
 0xb60   :  { %8160 = vrcp.f32 %v5991_v13 }
 0xb69   :  { %v8159_v15 = vpop.eup %8158 }
 0xb6a   :  { %v6067_v17 = vsub.f32 %v9621_v14, %v8159_v15  ;;  %v8161_v44 = vpop.eup %8160 }
 0xb6c   :  { %v6068_v18 = vmul.f32 %v8161_v44, %v6067_v17 }
 0xb6e   :  { %v6069_v56 = vadd.f32 %v8159_v15, %v6068_v18 }
 0xb70   :  { %7484 = vmatmul.mubr.msk.f32.vlgmr.msra.gmra.mrb[58].mxu1 %vm549_vm2, %v6069_v56 }
 0xc43   :  { %v6144_v61 = vpop.f32.mrb[58].mxu1 }
 0xc44   :  { %v6145_v16 = vadd.f32 %v6144_v61, %v6074_v4  ;;  %v7485_v36 = vpop.f32.mrb[59].mxu1 }
 0xc46   :  { %v6149_v24 = vsel %vm6148_vm3, %v6145_v16, -inf }
 0xc47   :  { %6150 = vmax.xlane.f32.xlu0 %v6149_v24 }
 0xcd4   :  { %v6151_v37 = vpop.xlane.xlu0 %6150 }
 0xcd5   :  { %v6152_v27 = vsub.f32 %v6145_v16, %v6151_v37 }
 0xcd7   :  { %v6153_v49 = vmul.f32 1.442695, %v6152_v27 }
 0xcd9   :  { %8162 = vpow2.f32 %v6153_v49 }
 0xce3   :  { %v8163_v55 = vpop.eup %8162 }
 0xce4   :  { %v6155_v45 = vsel %vm6148_vm3, %v8163_v55, 0.0 }
 0xce5   :  { %6156 = vadd.xlane.f32.xlu0 %v6155_v45 }
 0xd72   :  { %v6157_v38 = vpop.xlane.xlu0 %6156 }
 0xd73   :  { %8164 = vrcp.f32 %v6157_v38 }
 0xd7d   :  { %v8165_v46 = vpop.eup %8164 }
 0xd7e   :  { %v6159_v47 = vmul.f32 %v8165_v46, %v8163_v55 }
 0xd80   :  { %6160 = vst.msk [vmem:[#allocation26] sm:$0x1] %vm6148_vm3, %v6159_v47 }
 0xd81   :  { %8512 = shalt.err (!%p8509_p12)
}
 0xd82   :  { %s9750_s6 = sld [smem:[#allocation46_spill]] }
 0xd88   :  { %s8513_s15 = scalar_lea.hbm %s9750_s6, 16 }
 0xd89   :  { %p8514_p13 = scmp.ne.s32.totalorder %s9750_s6, %s8513_s15  ;;  %p8517_p0 = scmp.lt.u32.totalorder %s8513_s15, %s9750_s6 }
 0xd8b   :  { %p8519_p1 = pnand %p8517_p0, %p8514_p13 }
 0xd8d   :  { %8522 = shalt.err (!%p8519_p1)
}
 0xd8e   :  { %6170 = dma.vmem_to_hbm [thread:$0]  %s6168_s22, 16, %s9750_s6, [#allocation4]  }
 0xd8f   :  { %8539 = dma.done.wait [#allocation4], 16  }
 0xd90   :  { %8540 = vsyncadd [#allocation4], 4294967280 }
 0xd91   :  { %6174 = vsyncpa [#allocation3], 1 }
 0xd92   :  { %6175 = vsyncpa [#allocation6], 1 }
 0xd93   :  { %6176 = vsyncpa [#allocation9], 1 }
 0xd94   :  { %6177 = vsyncpa [#allocation12], 1 }
 0xd95   :  { %6178 = vsyncpa [#allocation15], 1 }
 0xd96   :  { %6179 = vsyncpa [#allocation18], 1 }
 0xd97   :  { %6180 = vsyncpa [#allocation21], 1 }
 0xd98   :  { %6181 = vsyncpa [#allocation24], 1 }
 0xd99   :  { %6182 = vsyncpa [#allocation4], 1 }

</bundles_post_ra>
